<compile_context>
chip_gen: v5e
topology: v5e:2x2
jax: 0.10.0
libtpu: 0.0.40
codegen_flags: <defaults>
</compile_context>

<pallas_src>
import functools

import jax
import jax.numpy as jnp
import numpy as np
from jax.experimental import pallas as pl
from jax.experimental.pallas import tpu as pltpu


# ----------------------------- Pallas kernel -------------------------------

def decoder_tcn_kernel(*refs, bb, T, k, layer_cfg, c0_pad, use_xlu_roll,
                       compute_dtype):
    """Fused Decoder_TCN forward for one batch block.

    refs = [x_ref,
            per layer: w1s, b1, s1, t1, w2s, b2, s2, t2, (wd, bd if downsample),
            w_out, b_out,
            o_ref]
    x_ref : (bb, T, E)                 input block (true channel width)
    w*s   : (k*C_in_p, C_out_p)        tap-stacked conv weights, channel-padded
    b*, s*, t* : (1, C_out_p)          conv bias / BN(eval) scale / shift (f32)
    wd, bd: (C_in_p, C_out_p), (1, C_out_p) 1x1 downsample (only if C_in != C_out)
    w_out : (C_last_p, O_p), b_out : (1, O_p)
    o_ref : (bb, T, O_p)               lane-dense output block
    """
    x_ref, o_ref = refs[0], refs[-1]
    it = iter(refs[1:-1])
    R = bb * T

    # Load once; flatten to a single (bb*T, C) slab and lane-pad channels once.
    x = x_ref[...].reshape(R, x_ref.shape[-1])
    if x.shape[-1] < c0_pad:
        x = jnp.concatenate(
            [x, jnp.zeros((R, c0_pad - x.shape[-1]), x.dtype)], axis=1)
    h = x.astype(jnp.float32)

    # Time index within each length-T batch segment (hoisted; used for masking).
    pos = jax.lax.broadcasted_iota(jnp.int32, (R, 1), 0) % T

    def shifted(a, s):
        """Rows delayed by s within each segment, zero-filled (causal left pad)."""
        if s == 0:
            return a
        if use_xlu_roll:
            r = pltpu.roll(a, s, axis=0)                    # XLU sublane rotate
        else:                                               # safe slice+concat path
            r = jnp.concatenate([a[R - s:, :], a[:R - s, :]], axis=0)
        # rows with (t mod T) < s would read the previous segment -> zero them
        return jnp.where(pos >= s, r, jnp.zeros((), a.dtype))

    def im2col(a, d):
        """(R, C) -> (R, k*C): column block j pairs with conv tap j = x[t-(k-1-j)*d]."""
        taps = [shifted(a, (k - 1 - j) * d) for j in range(k)]
        return taps[0] if k == 1 else jnp.concatenate(taps, axis=1)

    def mm(lhs, w_ref):                                      # MXU, f32 accumulation
        return jnp.dot(lhs, w_ref[...], preferred_element_type=jnp.float32)

    for d, use_down in layer_cfg:
        w1, b1, s1, t1 = next(it), next(it), next(it), next(it)
        w2, b2, s2, t2 = next(it), next(it), next(it), next(it)
        if use_down:
            wd, bd = next(it), next(it)

        h_mm = h.astype(compute_dtype)              # cast once, before tap stacking
        a = mm(im2col(h_mm, d), w1) + b1[...]       # causal dilated conv1 = 1 matmul
        a = jnp.maximum(a, 0.0) * s1[...] + t1[...]  # ReLU -> BN1(eval); dropout=id
        g = mm(im2col(a.astype(compute_dtype), d), w2) + b2[...]
        g = jnp.maximum(g, 0.0) * s2[...] + t2[...]  # ReLU -> BN2(eval); dropout=id

        # residual on the block input: 1x1 conv or identity (kept in f32)
        res = mm(h_mm, wd) + bd[...] if use_down else h
        h = jnp.maximum(g + res, 0.0)               # block output ReLU

    # output Linear, stored once as a lane-dense (bb, T, O_p) block
    w_out, b_out = next(it), next(it)
    y = mm(h.astype(compute_dtype), w_out) + b_out[...]
    o_ref[...] = y.reshape(bb, T, y.shape[-1]).astype(o_ref.dtype)


# ------------------------------ JAX wrapper --------------------------------

def _round_up(n, m):
    return ((n + m - 1) // m) * m


def _tensorcores_per_chip():
    try:
        kind = jax.devices()[0].device_kind.lower()
    except Exception:
        return 1
    return 2 if ("v7" in kind or "7x" in kind) else 1


def decoder_tcn_forward(x, params, *, kernel_size, weight_dtype=jnp.float32,
                        batch_block=None, lane_multiple=128):
    """x: (B, T, embedding_dim) -> (B, T, output_dim).  Eval-mode forward."""
    B, T, E = x.shape
    layers, w_out, b_out = params["layers"], params["w_out"], params["b_out"]
    O, C_last = w_out.shape
    k = kernel_size

    # --- pad T to a sublane multiple (causal conv => trailing pad is harmless) ---
    T_p = _round_up(T, 8)
    if T_p != T:
        x = jnp.pad(x, ((0, 0), (0, T_p - T), (0, 0)))

    # --- batch blocking: fused single step by default; split across v7x's 2 TCs ---
    if batch_block is None:
        nc = _tensorcores_per_chip()
        if nc > 1 and B % nc == 0 and (B // nc) * T_p >= 128:
            batch_block = B // nc
        else:
            batch_block = B
    bb = batch_block
    assert B % bb == 0, "batch_block must divide batch"

    def cpad(n):
        return _round_up(max(n, 1), lane_multiple)

    # --- operands: weight_norm folded, BN(eval) folded, channels zero-padded ---
    operands, op_shapes, layer_cfg = [x], [], []
    rows = B * T_p
    flops = 0

    def add(a):
        operands.append(a)
        op_shapes.append(a.shape)

    def stack_taps(w, ci_p, co_p):   # (C_out, C_in, k) -> (k*C_in_p, C_out_p)
        co, ci, kk = w.shape
        w = jnp.pad(w, ((0, co_p - co), (0, ci_p - ci), (0, 0)))
        return jnp.transpose(w, (2, 1, 0)).reshape(kk * ci_p, co_p).astype(weight_dtype)

    def vec(v, c_p):                 # (C,) -> (1, C_p) f32 (elementwise math stays f32)
        return jnp.pad(v, (0, c_p - v.shape[0])).reshape(1, c_p).astype(jnp.float32)

    c0_pad = cpad(E)
    c_in, c_in_p = E, c0_pad
    for i, lp in enumerate(layers):
        d = 2 ** i
        c_out = lp["w1"].shape[0]
        c_out_p = cpad(c_out)
        use_down = lp["wd"] is not None
        if not use_down:
            assert c_in == c_out, (
                "identity residual requires n_inputs == n_outputs when downsample is None")
        add(stack_taps(lp["w1"], c_in_p, c_out_p)); add(vec(lp["b1"], c_out_p))
        add(vec(lp["s1"], c_out_p)); add(vec(lp["t1"], c_out_p))
        add(stack_taps(lp["w2"], c_out_p, c_out_p)); add(vec(lp["b2"], c_out_p))
        add(vec(lp["s2"], c_out_p)); add(vec(lp["t2"], c_out_p))
        if use_down:
            wd = jnp.pad(lp["wd"], ((0, c_out_p - c_out), (0, c_in_p - c_in)))
            add(jnp.transpose(wd).astype(weight_dtype))      # (C_in_p, C_out_p)
            add(vec(lp["bd"], c_out_p))
        flops += 2 * rows * (k * c_in_p * c_out_p + k * c_out_p * c_out_p
                             + (c_in_p * c_out_p if use_down else 0))
        layer_cfg.append((d, use_down))
        c_in, c_in_p = c_out, c_out_p

    assert C_last == c_in, "output Linear in_features must match last hidden width"
    O_p = cpad(O)
    w_out_p = jnp.pad(w_out, ((0, O_p - O), (0, c_in_p - C_last)))
    add(jnp.transpose(w_out_p).astype(weight_dtype))         # (C_last_p, O_p)
    add(vec(b_out, O_p))
    flops += 2 * rows * c_in_p * O_p

    # --- scheduler hint + explicit VMEM budget (v7x has only 64 MiB physical) ---
    weight_bytes = sum(int(a.size) * a.dtype.itemsize for a in operands[1:])
    bytes_accessed = int(x.size) * x.dtype.itemsize + weight_bytes + rows * O_p * 4
    cost = pl.CostEstimate(flops=int(flops), transcendentals=0,
                           bytes_accessed=int(bytes_accessed))
    c_max_p = max([c0_pad, O_p] + [cpad(lp["w1"].shape[0]) for lp in layers])
    act_bytes = bb * T_p * (k * c_max_p + 5 * c_max_p) * 4   # taps + h/a/g/res live set
    io_bytes = 2 * bb * T_p * (E + O_p) * 4                  # double-buffered in/out
    vmem_limit = int(min(64 * 2 ** 20,
                         max(32 * 2 ** 20, 2 * weight_bytes + act_bytes + io_bytes)))

    def run(use_xlu_roll, single_buffer_weights):
        kern = functools.partial(
            decoder_tcn_kernel, bb=bb, T=T_p, k=k, layer_cfg=tuple(layer_cfg),
            c0_pad=c0_pad, use_xlu_roll=use_xlu_roll,
            compute_dtype=jnp.dtype(weight_dtype))
        wkw = {}
        if single_buffer_weights:
            # constant index_map -> a single resident copy is enough
            wkw["pipeline_mode"] = pl.Buffered(1)
        in_specs = [pl.BlockSpec((bb, T_p, E), lambda i: (i, 0, 0))]
        in_specs += [pl.BlockSpec(s, lambda i: (0, 0), **wkw) for s in op_shapes]
        return pl.pallas_call(
            kern,
            out_shape=jax.ShapeDtypeStruct((B, T_p, O_p), jnp.float32),
            grid=(B // bb,),
            in_specs=in_specs,
            out_specs=pl.BlockSpec((bb, T_p, O_p), lambda i: (i, 0, 0)),
            compiler_params=pltpu.CompilerParams(
                dimension_semantics=("parallel",),       # batch blocks independent
                vmem_limit_bytes=vmem_limit),
            cost_estimate=cost,
        )(*operands)

    # Preferred config first (XLU roll + single-buffered weights); if the current
    # Pallas/Mosaic build rejects either feature, fall back so the kernel always
    # runs (eager dispatch surfaces lowering errors here).
    y = None
    last_err = None
    for cfg in ((True, True), (True, False), (False, False)):
        try:
            y = run(*cfg)
            break
        except Exception as e:        # lowering / unsupported-feature fallback
            last_err = e
    if y is None:
        raise last_err

    return y[:, :T, :O]               # strip the lane/time padding


# ----------------------- deterministic parameter init ----------------------

def init_params(key, embedding_dim, output_dim, num_layers, hidden_dim, kernel_size):
    """Parameters mimicking the PyTorch module, with weight_norm and eval-mode
    BatchNorm folded (w1/w2: (C_out, C_in, k); s/t: BN scale/shift)."""
    eps = 1e-5
    keys = jax.random.split(key, num_layers + 1)
    layers = []
    in_c = embedding_dim
    for i in range(num_layers):
        kk = jax.random.split(keys[i], 16)
        out_c = hidden_dim

        def conv_w(kv, kg, kb, ci, co):
            # weight_norm: w = g * v / ||v||_{per out-channel}
            v = 0.01 * jax.random.normal(kv, (co, ci, kernel_size), jnp.float32)
            g = 1.0 + 0.1 * jax.random.uniform(kg, (co,), jnp.float32)
            norm = jnp.linalg.norm(v.reshape(co, -1), axis=1) + 1e-12
            w = g[:, None, None] * v / norm[:, None, None]
            b = 0.1 * jax.random.normal(kb, (co,), jnp.float32)
            return w, b

        def bn(kg, kb, km, kv2, c):
            gamma = 1.0 + 0.1 * jax.random.normal(kg, (c,), jnp.float32)
            beta = 0.1 * jax.random.normal(kb, (c,), jnp.float32)
            mean = 0.1 * jax.random.normal(km, (c,), jnp.float32)
            var = 1.0 + 0.1 * jax.random.uniform(kv2, (c,), jnp.float32)
            scale = gamma / jnp.sqrt(var + eps)
            return scale, beta - mean * scale

        w1, b1 = conv_w(kk[0], kk[1], kk[2], in_c, out_c)
        w2, b2 = conv_w(kk[3], kk[4], kk[5], out_c, out_c)
        s1, t1 = bn(kk[6], kk[7], kk[8], kk[9], out_c)
        s2, t2 = bn(kk[10], kk[11], kk[12], kk[13], out_c)

        if in_c != out_c:
            wd = 0.01 * jax.random.normal(kk[14], (out_c, in_c), jnp.float32)
            bd = 0.1 * jax.random.normal(kk[15], (out_c,), jnp.float32)
        else:
            wd, bd = None, None

        layers.append(dict(w1=w1, b1=b1, s1=s1, t1=t1,
                           w2=w2, b2=b2, s2=s2, t2=t2, wd=wd, bd=bd))
        in_c = out_c

    klin = jax.random.split(keys[-1], 2)
    w_out = 0.1 * jax.random.normal(klin[0], (output_dim, hidden_dim), jnp.float32)
    b_out = 0.1 * jax.random.normal(klin[1], (output_dim,), jnp.float32)
    return dict(layers=layers, w_out=w_out, b_out=b_out)


# ------------------------- pure-JAX reference check ------------------------

def ref_forward(x, params, kernel_size):
    h = jnp.transpose(x, (0, 2, 1))                  # (B, C, T)
    for i, p in enumerate(params["layers"]):
        d = 2 ** i
        pad = (kernel_size - 1) * d

        def conv(z, w, b):
            y = jax.lax.conv_general_dilated(
                z, w, window_strides=(1,), padding=[(pad, 0)],
                rhs_dilation=(d,), dimension_numbers=("NCH", "OIH", "NCH"))
            return y + b[None, :, None]

        if p["wd"] is not None:
            res = jnp.einsum("oc,bct->bot", p["wd"], h) + p["bd"][None, :, None]
        else:
            res = h
        a = conv(h, p["w1"], p["b1"])
        a = jnp.maximum(a, 0.0) * p["s1"][None, :, None] + p["t1"][None, :, None]
        a = conv(a, p["w2"], p["b2"])
        a = jnp.maximum(a, 0.0) * p["s2"][None, :, None] + p["t2"][None, :, None]
        h = jnp.maximum(a + res, 0.0)
    y = jnp.einsum("oc,bct->bot", params["w_out"], h) + params["b_out"][None, :, None]
    return jnp.transpose(y, (0, 2, 1))               # (B, T, O)


# ---------------------------------- main -----------------------------------

if __name__ == "__main__":
    B, T = 2, 16
    embedding_dim, hidden_dim, output_dim = 8, 32, 16
    num_layers, kernel_size, dropout = 2, 3, 0.2     # dropout is identity in eval

    key = jax.random.PRNGKey(0)
    kx, kp = jax.random.split(key)
    x = jax.random.normal(kx, (B, T, embedding_dim), jnp.float32)

    params = init_params(kp, embedding_dim, output_dim, num_layers,
                         hidden_dim, kernel_size)

    # f32 path (exact check against the pure-JAX reference)
    y = decoder_tcn_forward(x, params, kernel_size=kernel_size)
    y = jax.block_until_ready(y)
    assert y.shape == (B, T, output_dim)

    y_ref = ref_forward(x, params, kernel_size)
    np.testing.assert_allclose(np.asarray(y), np.asarray(y_ref),
                               rtol=2e-4, atol=2e-4)

    # bf16 matmul operands, f32 accumulation (bf16-native MXUs on v6e/v7x)
    y_bf16 = decoder_tcn_forward(x, params, kernel_size=kernel_size,
                                 weight_dtype=jnp.bfloat16)
    y_bf16 = jax.block_until_ready(y_bf16)
    assert y_bf16.shape == (B, T, output_dim)
    np.testing.assert_allclose(np.asarray(y_bf16), np.asarray(y_ref),
                               rtol=1e-1, atol=1e-1)

    print("KERNEL_OK")
</pallas_src>

<mosaic_0001>
module attributes {stable_mosaic.version = 11 : i64} {
  func.func @decoder_tcn_kernel(%arg0: i32, %arg1: memref<2x16x8xf32, #tpu.memory_space<vmem>>, %arg2: memref<384x128xf32, #tpu.memory_space<vmem>>, %arg3: memref<1x128xf32, #tpu.memory_space<vmem>>, %arg4: memref<1x128xf32, #tpu.memory_space<vmem>>, %arg5: memref<1x128xf32, #tpu.memory_space<vmem>>, %arg6: memref<384x128xf32, #tpu.memory_space<vmem>>, %arg7: memref<1x128xf32, #tpu.memory_space<vmem>>, %arg8: memref<1x128xf32, #tpu.memory_space<vmem>>, %arg9: memref<1x128xf32, #tpu.memory_space<vmem>>, %arg10: memref<128x128xf32, #tpu.memory_space<vmem>>, %arg11: memref<1x128xf32, #tpu.memory_space<vmem>>, %arg12: memref<384x128xf32, #tpu.memory_space<vmem>>, %arg13: memref<1x128xf32, #tpu.memory_space<vmem>>, %arg14: memref<1x128xf32, #tpu.memory_space<vmem>>, %arg15: memref<1x128xf32, #tpu.memory_space<vmem>>, %arg16: memref<384x128xf32, #tpu.memory_space<vmem>>, %arg17: memref<1x128xf32, #tpu.memory_space<vmem>>, %arg18: memref<1x128xf32, #tpu.memory_space<vmem>>, %arg19: memref<1x128xf32, #tpu.memory_space<vmem>>, %arg20: memref<128x128xf32, #tpu.memory_space<vmem>>, %arg21: memref<1x128xf32, #tpu.memory_space<vmem>>, %arg22: memref<2x16x128xf32, #tpu.memory_space<vmem>>) attributes {dimension_semantics = [#tpu.dimension_semantics<parallel>], iteration_bounds = array<i64: 1>, scalar_prefetch = 0 : i64, scratch_operands = 0 : i64, tpu.core_type = #tpu.core_type<tc>, window_params = [{transform_indices = @transform_0, window_bounds = array<i64: 2, 16, 8>}, {pipeline_mode = #tpu.pipeline_mode<synchronous>, transform_indices = @transform_1, window_bounds = array<i64: 384, 128>}, {pipeline_mode = #tpu.pipeline_mode<synchronous>, transform_indices = @transform_2, window_bounds = array<i64: 1, 128>}, {pipeline_mode = #tpu.pipeline_mode<synchronous>, transform_indices = @transform_3, window_bounds = array<i64: 1, 128>}, {pipeline_mode = #tpu.pipeline_mode<synchronous>, transform_indices = @transform_4, window_bounds = array<i64: 1, 128>}, {pipeline_mode = #tpu.pipeline_mode<synchronous>, transform_indices = @transform_5, window_bounds = array<i64: 384, 128>}, {pipeline_mode = #tpu.pipeline_mode<synchronous>, transform_indices = @transform_6, window_bounds = array<i64: 1, 128>}, {pipeline_mode = #tpu.pipeline_mode<synchronous>, transform_indices = @transform_7, window_bounds = array<i64: 1, 128>}, {pipeline_mode = #tpu.pipeline_mode<synchronous>, transform_indices = @transform_8, window_bounds = array<i64: 1, 128>}, {pipeline_mode = #tpu.pipeline_mode<synchronous>, transform_indices = @transform_9, window_bounds = array<i64: 128, 128>}, {pipeline_mode = #tpu.pipeline_mode<synchronous>, transform_indices = @transform_10, window_bounds = array<i64: 1, 128>}, {pipeline_mode = #tpu.pipeline_mode<synchronous>, transform_indices = @transform_11, window_bounds = array<i64: 384, 128>}, {pipeline_mode = #tpu.pipeline_mode<synchronous>, transform_indices = @transform_12, window_bounds = array<i64: 1, 128>}, {pipeline_mode = #tpu.pipeline_mode<synchronous>, transform_indices = @transform_13, window_bounds = array<i64: 1, 128>}, {pipeline_mode = #tpu.pipeline_mode<synchronous>, transform_indices = @transform_14, window_bounds = array<i64: 1, 128>}, {pipeline_mode = #tpu.pipeline_mode<synchronous>, transform_indices = @transform_15, window_bounds = array<i64: 384, 128>}, {pipeline_mode = #tpu.pipeline_mode<synchronous>, transform_indices = @transform_16, window_bounds = array<i64: 1, 128>}, {pipeline_mode = #tpu.pipeline_mode<synchronous>, transform_indices = @transform_17, window_bounds = array<i64: 1, 128>}, {pipeline_mode = #tpu.pipeline_mode<synchronous>, transform_indices = @transform_18, window_bounds = array<i64: 1, 128>}, {pipeline_mode = #tpu.pipeline_mode<synchronous>, transform_indices = @transform_19, window_bounds = array<i64: 128, 128>}, {pipeline_mode = #tpu.pipeline_mode<synchronous>, transform_indices = @transform_20, window_bounds = array<i64: 1, 128>}, {transform_indices = @transform_21, window_bounds = array<i64: 2, 16, 128>}]} {
    %c0 = arith.constant 0 : index
    %c0_0 = arith.constant 0 : index
    %c0_1 = arith.constant 0 : index
    %0 = vector.load %arg1[%c0, %c0_0, %c0_1] : memref<2x16x8xf32, #tpu.memory_space<vmem>>, vector<2x16x8xf32>
    %1 = vector.shape_cast %0 : vector<2x16x8xf32> to vector<32x8xf32>
    %cst = arith.constant 0.000000e+00 : f32
    %2 = vector.broadcast %cst : f32 to vector<32x120xf32>
    %3 = tpu.concatenate %1, %2 in 1 : vector<32x8xf32>, vector<32x120xf32> -> vector<32x128xf32>
    %4 = tpu.iota {dimensions = array<i32: 0>} : vector<32x1xi32>
    %c16_i32 = arith.constant 16 : i32
    %c0_i32 = arith.constant 0 : i32
    %5 = arith.cmpi eq, %c16_i32, %c0_i32 : i32
    %c1_i32 = arith.constant 1 : i32
    %6 = arith.select %5, %c1_i32, %c16_i32 : i32
    %7 = vector.broadcast %6 : i32 to vector<32x1xi32>
    %8 = arith.remsi %4, %7 : vector<32x1xi32>
    %c0_i32_2 = arith.constant 0 : i32
    %9 = vector.broadcast %c0_i32_2 : i32 to vector<32x1xi32>
    %10 = arith.cmpi ne, %8, %9 : vector<32x1xi32>
    %c0_i32_3 = arith.constant 0 : i32
    %11 = vector.broadcast %c0_i32_3 : i32 to vector<32x1xi32>
    %12 = arith.cmpi slt, %8, %11 : vector<32x1xi32>
    %c0_i32_4 = arith.constant 0 : i32
    %13 = arith.cmpi slt, %6, %c0_i32_4 : i32
    %14 = vector.broadcast %13 : i1 to vector<32x1xi1>
    %15 = vector.broadcast %14 : vector<32x1xi1> to vector<32x1xi1>
    %16 = arith.xori %12, %15 : vector<32x1xi1>
    %17 = arith.andi %16, %10 : vector<32x1xi1>
    %18 = vector.broadcast %6 : i32 to vector<32x1xi32>
    %19 = arith.addi %8, %18 : vector<32x1xi32>
    %20 = arith.select %17, %19, %8 : vector<32x1xi1>, vector<32x1xi32>
    %c2_i32 = arith.constant 2 : i32
    %21 = tpu.dynamic_rotate %3 by %c2_i32 dim 0 : vector<32x128xf32>, i32 -> vector<32x128xf32>
    %c2_i32_5 = arith.constant 2 : i32
    %22 = vector.broadcast %c2_i32_5 : i32 to vector<32x1xi32>
    %23 = arith.cmpi sge, %20, %22 : vector<32x1xi32>
    %cst_6 = arith.constant 0.000000e+00 : f32
    %24 = vector.shape_cast %23 : vector<32x1xi1> to vector<32x1xi1>
    %25 = vector.broadcast %24 : vector<32x1xi1> to vector<32x128xi1>
    %26 = vector.broadcast %cst_6 : f32 to vector<32x128xf32>
    %27 = arith.select %25, %21, %26 : vector<32x128xi1>, vector<32x128xf32>
    %c1_i32_7 = arith.constant 1 : i32
    %28 = tpu.dynamic_rotate %3 by %c1_i32_7 dim 0 : vector<32x128xf32>, i32 -> vector<32x128xf32>
    %c1_i32_8 = arith.constant 1 : i32
    %29 = vector.broadcast %c1_i32_8 : i32 to vector<32x1xi32>
    %30 = arith.cmpi sge, %20, %29 : vector<32x1xi32>
    %cst_9 = arith.constant 0.000000e+00 : f32
    %31 = vector.shape_cast %30 : vector<32x1xi1> to vector<32x1xi1>
    %32 = vector.broadcast %31 : vector<32x1xi1> to vector<32x128xi1>
    %33 = vector.broadcast %cst_9 : f32 to vector<32x128xf32>
    %34 = arith.select %32, %28, %33 : vector<32x128xi1>, vector<32x128xf32>
    %35 = tpu.concatenate %27, %34, %3 in 1 : vector<32x128xf32>, vector<32x128xf32>, vector<32x128xf32> -> vector<32x384xf32>
    %c0_10 = arith.constant 0 : index
    %c0_11 = arith.constant 0 : index
    %36 = vector.load %arg2[%c0_10, %c0_11] : memref<384x128xf32, #tpu.memory_space<vmem>>, vector<384x128xf32>
    %cst_12 = arith.constant dense<0.000000e+00> : vector<32x128xf32>
    %37 = tpu.matmul %35, %36, %cst_12 {dimension_numbers = #tpu.dot_dimension_numbers<[1], [0], [0], [1], [0, 0, 1, 1], [], []>} : vector<32x384xf32>, vector<384x128xf32>, vector<32x128xf32> -> vector<32x128xf32>
    %c0_13 = arith.constant 0 : index
    %c0_14 = arith.constant 0 : index
    %38 = vector.load %arg3[%c0_13, %c0_14] : memref<1x128xf32, #tpu.memory_space<vmem>>, vector<1x128xf32>
    %39 = vector.broadcast %38 : vector<1x128xf32> to vector<32x128xf32>
    %40 = arith.addf %37, %39 : vector<32x128xf32>
    %cst_15 = arith.constant 0.000000e+00 : f32
    %41 = vector.broadcast %cst_15 : f32 to vector<32x128xf32>
    %42 = arith.maximumf %40, %41 : vector<32x128xf32>
    %c0_16 = arith.constant 0 : index
    %c0_17 = arith.constant 0 : index
    %43 = vector.load %arg4[%c0_16, %c0_17] : memref<1x128xf32, #tpu.memory_space<vmem>>, vector<1x128xf32>
    %44 = vector.broadcast %43 : vector<1x128xf32> to vector<32x128xf32>
    %45 = arith.mulf %42, %44 : vector<32x128xf32>
    %c0_18 = arith.constant 0 : index
    %c0_19 = arith.constant 0 : index
    %46 = vector.load %arg5[%c0_18, %c0_19] : memref<1x128xf32, #tpu.memory_space<vmem>>, vector<1x128xf32>
    %47 = vector.broadcast %46 : vector<1x128xf32> to vector<32x128xf32>
    %48 = arith.addf %45, %47 : vector<32x128xf32>
    %c2_i32_20 = arith.constant 2 : i32
    %49 = tpu.dynamic_rotate %48 by %c2_i32_20 dim 0 : vector<32x128xf32>, i32 -> vector<32x128xf32>
    %c2_i32_21 = arith.constant 2 : i32
    %50 = vector.broadcast %c2_i32_21 : i32 to vector<32x1xi32>
    %51 = arith.cmpi sge, %20, %50 : vector<32x1xi32>
    %cst_22 = arith.constant 0.000000e+00 : f32
    %52 = vector.shape_cast %51 : vector<32x1xi1> to vector<32x1xi1>
    %53 = vector.broadcast %52 : vector<32x1xi1> to vector<32x128xi1>
    %54 = vector.broadcast %cst_22 : f32 to vector<32x128xf32>
    %55 = arith.select %53, %49, %54 : vector<32x128xi1>, vector<32x128xf32>
    %c1_i32_23 = arith.constant 1 : i32
    %56 = tpu.dynamic_rotate %48 by %c1_i32_23 dim 0 : vector<32x128xf32>, i32 -> vector<32x128xf32>
    %c1_i32_24 = arith.constant 1 : i32
    %57 = vector.broadcast %c1_i32_24 : i32 to vector<32x1xi32>
    %58 = arith.cmpi sge, %20, %57 : vector<32x1xi32>
    %cst_25 = arith.constant 0.000000e+00 : f32
    %59 = vector.shape_cast %58 : vector<32x1xi1> to vector<32x1xi1>
    %60 = vector.broadcast %59 : vector<32x1xi1> to vector<32x128xi1>
    %61 = vector.broadcast %cst_25 : f32 to vector<32x128xf32>
    %62 = arith.select %60, %56, %61 : vector<32x128xi1>, vector<32x128xf32>
    %63 = tpu.concatenate %55, %62, %48 in 1 : vector<32x128xf32>, vector<32x128xf32>, vector<32x128xf32> -> vector<32x384xf32>
    %c0_26 = arith.constant 0 : index
    %c0_27 = arith.constant 0 : index
    %64 = vector.load %arg6[%c0_26, %c0_27] : memref<384x128xf32, #tpu.memory_space<vmem>>, vector<384x128xf32>
    %cst_28 = arith.constant dense<0.000000e+00> : vector<32x128xf32>
    %65 = tpu.matmul %63, %64, %cst_28 {dimension_numbers = #tpu.dot_dimension_numbers<[1], [0], [0], [1], [0, 0, 1, 1], [], []>} : vector<32x384xf32>, vector<384x128xf32>, vector<32x128xf32> -> vector<32x128xf32>
    %c0_29 = arith.constant 0 : index
    %c0_30 = arith.constant 0 : index
    %66 = vector.load %arg7[%c0_29, %c0_30] : memref<1x128xf32, #tpu.memory_space<vmem>>, vector<1x128xf32>
    %67 = vector.broadcast %66 : vector<1x128xf32> to vector<32x128xf32>
    %68 = arith.addf %65, %67 : vector<32x128xf32>
    %cst_31 = arith.constant 0.000000e+00 : f32
    %69 = vector.broadcast %cst_31 : f32 to vector<32x128xf32>
    %70 = arith.maximumf %68, %69 : vector<32x128xf32>
    %c0_32 = arith.constant 0 : index
    %c0_33 = arith.constant 0 : index
    %71 = vector.load %arg8[%c0_32, %c0_33] : memref<1x128xf32, #tpu.memory_space<vmem>>, vector<1x128xf32>
    %72 = vector.broadcast %71 : vector<1x128xf32> to vector<32x128xf32>
    %73 = arith.mulf %70, %72 : vector<32x128xf32>
    %c0_34 = arith.constant 0 : index
    %c0_35 = arith.constant 0 : index
    %74 = vector.load %arg9[%c0_34, %c0_35] : memref<1x128xf32, #tpu.memory_space<vmem>>, vector<1x128xf32>
    %75 = vector.broadcast %74 : vector<1x128xf32> to vector<32x128xf32>
    %76 = arith.addf %73, %75 : vector<32x128xf32>
    %c0_36 = arith.constant 0 : index
    %c0_37 = arith.constant 0 : index
    %77 = vector.load %arg10[%c0_36, %c0_37] : memref<128x128xf32, #tpu.memory_space<vmem>>, vector<128x128xf32>
    %cst_38 = arith.constant dense<0.000000e+00> : vector<32x128xf32>
    %78 = tpu.matmul %3, %77, %cst_38 {dimension_numbers = #tpu.dot_dimension_numbers<[1], [0], [0], [1], [0, 0, 1, 1], [], []>} : vector<32x128xf32>, vector<128x128xf32>, vector<32x128xf32> -> vector<32x128xf32>
    %c0_39 = arith.constant 0 : index
    %c0_40 = arith.constant 0 : index
    %79 = vector.load %arg11[%c0_39, %c0_40] : memref<1x128xf32, #tpu.memory_space<vmem>>, vector<1x128xf32>
    %80 = vector.broadcast %79 : vector<1x128xf32> to vector<32x128xf32>
    %81 = arith.addf %78, %80 : vector<32x128xf32>
    %82 = arith.addf %76, %81 : vector<32x128xf32>
    %cst_41 = arith.constant 0.000000e+00 : f32
    %83 = vector.broadcast %cst_41 : f32 to vector<32x128xf32>
    %84 = arith.maximumf %82, %83 : vector<32x128xf32>
    %c4_i32 = arith.constant 4 : i32
    %85 = tpu.dynamic_rotate %84 by %c4_i32 dim 0 : vector<32x128xf32>, i32 -> vector<32x128xf32>
    %c4_i32_42 = arith.constant 4 : i32
    %86 = vector.broadcast %c4_i32_42 : i32 to vector<32x1xi32>
    %87 = arith.cmpi sge, %20, %86 : vector<32x1xi32>
    %cst_43 = arith.constant 0.000000e+00 : f32
    %88 = vector.shape_cast %87 : vector<32x1xi1> to vector<32x1xi1>
    %89 = vector.broadcast %88 : vector<32x1xi1> to vector<32x128xi1>
    %90 = vector.broadcast %cst_43 : f32 to vector<32x128xf32>
    %91 = arith.select %89, %85, %90 : vector<32x128xi1>, vector<32x128xf32>
    %c2_i32_44 = arith.constant 2 : i32
    %92 = tpu.dynamic_rotate %84 by %c2_i32_44 dim 0 : vector<32x128xf32>, i32 -> vector<32x128xf32>
    %c2_i32_45 = arith.constant 2 : i32
    %93 = vector.broadcast %c2_i32_45 : i32 to vector<32x1xi32>
    %94 = arith.cmpi sge, %20, %93 : vector<32x1xi32>
    %cst_46 = arith.constant 0.000000e+00 : f32
    %95 = vector.shape_cast %94 : vector<32x1xi1> to vector<32x1xi1>
    %96 = vector.broadcast %95 : vector<32x1xi1> to vector<32x128xi1>
    %97 = vector.broadcast %cst_46 : f32 to vector<32x128xf32>
    %98 = arith.select %96, %92, %97 : vector<32x128xi1>, vector<32x128xf32>
    %99 = tpu.concatenate %91, %98, %84 in 1 : vector<32x128xf32>, vector<32x128xf32>, vector<32x128xf32> -> vector<32x384xf32>
    %c0_47 = arith.constant 0 : index
    %c0_48 = arith.constant 0 : index
    %100 = vector.load %arg12[%c0_47, %c0_48] : memref<384x128xf32, #tpu.memory_space<vmem>>, vector<384x128xf32>
    %cst_49 = arith.constant dense<0.000000e+00> : vector<32x128xf32>
    %101 = tpu.matmul %99, %100, %cst_49 {dimension_numbers = #tpu.dot_dimension_numbers<[1], [0], [0], [1], [0, 0, 1, 1], [], []>} : vector<32x384xf32>, vector<384x128xf32>, vector<32x128xf32> -> vector<32x128xf32>
    %c0_50 = arith.constant 0 : index
    %c0_51 = arith.constant 0 : index
    %102 = vector.load %arg13[%c0_50, %c0_51] : memref<1x128xf32, #tpu.memory_space<vmem>>, vector<1x128xf32>
    %103 = vector.broadcast %102 : vector<1x128xf32> to vector<32x128xf32>
    %104 = arith.addf %101, %103 : vector<32x128xf32>
    %cst_52 = arith.constant 0.000000e+00 : f32
    %105 = vector.broadcast %cst_52 : f32 to vector<32x128xf32>
    %106 = arith.maximumf %104, %105 : vector<32x128xf32>
    %c0_53 = arith.constant 0 : index
    %c0_54 = arith.constant 0 : index
    %107 = vector.load %arg14[%c0_53, %c0_54] : memref<1x128xf32, #tpu.memory_space<vmem>>, vector<1x128xf32>
    %108 = vector.broadcast %107 : vector<1x128xf32> to vector<32x128xf32>
    %109 = arith.mulf %106, %108 : vector<32x128xf32>
    %c0_55 = arith.constant 0 : index
    %c0_56 = arith.constant 0 : index
    %110 = vector.load %arg15[%c0_55, %c0_56] : memref<1x128xf32, #tpu.memory_space<vmem>>, vector<1x128xf32>
    %111 = vector.broadcast %110 : vector<1x128xf32> to vector<32x128xf32>
    %112 = arith.addf %109, %111 : vector<32x128xf32>
    %c4_i32_57 = arith.constant 4 : i32
    %113 = tpu.dynamic_rotate %112 by %c4_i32_57 dim 0 : vector<32x128xf32>, i32 -> vector<32x128xf32>
    %c4_i32_58 = arith.constant 4 : i32
    %114 = vector.broadcast %c4_i32_58 : i32 to vector<32x1xi32>
    %115 = arith.cmpi sge, %20, %114 : vector<32x1xi32>
    %cst_59 = arith.constant 0.000000e+00 : f32
    %116 = vector.shape_cast %115 : vector<32x1xi1> to vector<32x1xi1>
    %117 = vector.broadcast %116 : vector<32x1xi1> to vector<32x128xi1>
    %118 = vector.broadcast %cst_59 : f32 to vector<32x128xf32>
    %119 = arith.select %117, %113, %118 : vector<32x128xi1>, vector<32x128xf32>
    %c2_i32_60 = arith.constant 2 : i32
    %120 = tpu.dynamic_rotate %112 by %c2_i32_60 dim 0 : vector<32x128xf32>, i32 -> vector<32x128xf32>
    %c2_i32_61 = arith.constant 2 : i32
    %121 = vector.broadcast %c2_i32_61 : i32 to vector<32x1xi32>
    %122 = arith.cmpi sge, %20, %121 : vector<32x1xi32>
    %cst_62 = arith.constant 0.000000e+00 : f32
    %123 = vector.shape_cast %122 : vector<32x1xi1> to vector<32x1xi1>
    %124 = vector.broadcast %123 : vector<32x1xi1> to vector<32x128xi1>
    %125 = vector.broadcast %cst_62 : f32 to vector<32x128xf32>
    %126 = arith.select %124, %120, %125 : vector<32x128xi1>, vector<32x128xf32>
    %127 = tpu.concatenate %119, %126, %112 in 1 : vector<32x128xf32>, vector<32x128xf32>, vector<32x128xf32> -> vector<32x384xf32>
    %c0_63 = arith.constant 0 : index
    %c0_64 = arith.constant 0 : index
    %128 = vector.load %arg16[%c0_63, %c0_64] : memref<384x128xf32, #tpu.memory_space<vmem>>, vector<384x128xf32>
    %cst_65 = arith.constant dense<0.000000e+00> : vector<32x128xf32>
    %129 = tpu.matmul %127, %128, %cst_65 {dimension_numbers = #tpu.dot_dimension_numbers<[1], [0], [0], [1], [0, 0, 1, 1], [], []>} : vector<32x384xf32>, vector<384x128xf32>, vector<32x128xf32> -> vector<32x128xf32>
    %c0_66 = arith.constant 0 : index
    %c0_67 = arith.constant 0 : index
    %130 = vector.load %arg17[%c0_66, %c0_67] : memref<1x128xf32, #tpu.memory_space<vmem>>, vector<1x128xf32>
    %131 = vector.broadcast %130 : vector<1x128xf32> to vector<32x128xf32>
    %132 = arith.addf %129, %131 : vector<32x128xf32>
    %cst_68 = arith.constant 0.000000e+00 : f32
    %133 = vector.broadcast %cst_68 : f32 to vector<32x128xf32>
    %134 = arith.maximumf %132, %133 : vector<32x128xf32>
    %c0_69 = arith.constant 0 : index
    %c0_70 = arith.constant 0 : index
    %135 = vector.load %arg18[%c0_69, %c0_70] : memref<1x128xf32, #tpu.memory_space<vmem>>, vector<1x128xf32>
    %136 = vector.broadcast %135 : vector<1x128xf32> to vector<32x128xf32>
    %137 = arith.mulf %134, %136 : vector<32x128xf32>
    %c0_71 = arith.constant 0 : index
    %c0_72 = arith.constant 0 : index
    %138 = vector.load %arg19[%c0_71, %c0_72] : memref<1x128xf32, #tpu.memory_space<vmem>>, vector<1x128xf32>
    %139 = vector.broadcast %138 : vector<1x128xf32> to vector<32x128xf32>
    %140 = arith.addf %137, %139 : vector<32x128xf32>
    %141 = arith.addf %140, %84 : vector<32x128xf32>
    %cst_73 = arith.constant 0.000000e+00 : f32
    %142 = vector.broadcast %cst_73 : f32 to vector<32x128xf32>
    %143 = arith.maximumf %141, %142 : vector<32x128xf32>
    %c0_74 = arith.constant 0 : index
    %c0_75 = arith.constant 0 : index
    %144 = vector.load %arg20[%c0_74, %c0_75] : memref<128x128xf32, #tpu.memory_space<vmem>>, vector<128x128xf32>
    %cst_76 = arith.constant dense<0.000000e+00> : vector<32x128xf32>
    %145 = tpu.matmul %143, %144, %cst_76 {dimension_numbers = #tpu.dot_dimension_numbers<[1], [0], [0], [1], [0, 0, 1, 1], [], []>} : vector<32x128xf32>, vector<128x128xf32>, vector<32x128xf32> -> vector<32x128xf32>
    %c0_77 = arith.constant 0 : index
    %c0_78 = arith.constant 0 : index
    %146 = vector.load %arg21[%c0_77, %c0_78] : memref<1x128xf32, #tpu.memory_space<vmem>>, vector<1x128xf32>
    %147 = vector.broadcast %146 : vector<1x128xf32> to vector<32x128xf32>
    %148 = arith.addf %145, %147 : vector<32x128xf32>
    %149 = vector.shape_cast %148 : vector<32x128xf32> to vector<2x16x128xf32>
    %c0_79 = arith.constant 0 : index
    %c0_80 = arith.constant 0 : index
    %c0_81 = arith.constant 0 : index
    %150 = vector.load %arg22[%c0_79, %c0_80, %c0_81] : memref<2x16x128xf32, #tpu.memory_space<vmem>>, vector<2x16x128xf32>
    tpu.vector_store %arg22[%c0_79, %c0_80, %c0_81], %149 {strides = array<i32>} : memref<2x16x128xf32, #tpu.memory_space<vmem>>, vector<2x16x128xf32>,
    return
  }
  func.func @transform_0(%arg0: i32) -> (i32, i32, i32) {
    %c0_i32 = arith.constant 0 : i32
    %c0_i32_0 = arith.constant 0 : i32
    %c0_i32_1 = arith.constant 0 : i32
    return %arg0, %c0_i32, %c0_i32_0 : i32, i32, i32
  }
  func.func @transform_1(%arg0: i32) -> (i32, i32) {
    %c0_i32 = arith.constant 0 : i32
    %c0_i32_0 = arith.constant 0 : i32
    %c0_i32_1 = arith.constant 0 : i32
    return %c0_i32, %c0_i32_0 : i32, i32
  }
  func.func @transform_2(%arg0: i32) -> (i32, i32) {
    %c0_i32 = arith.constant 0 : i32
    %c0_i32_0 = arith.constant 0 : i32
    %c0_i32_1 = arith.constant 0 : i32
    return %c0_i32, %c0_i32_0 : i32, i32
  }
  func.func @transform_3(%arg0: i32) -> (i32, i32) {
    %c0_i32 = arith.constant 0 : i32
    %c0_i32_0 = arith.constant 0 : i32
    %c0_i32_1 = arith.constant 0 : i32
    return %c0_i32, %c0_i32_0 : i32, i32
  }
  func.func @transform_4(%arg0: i32) -> (i32, i32) {
    %c0_i32 = arith.constant 0 : i32
    %c0_i32_0 = arith.constant 0 : i32
    %c0_i32_1 = arith.constant 0 : i32
    return %c0_i32, %c0_i32_0 : i32, i32
  }
  func.func @transform_5(%arg0: i32) -> (i32, i32) {
    %c0_i32 = arith.constant 0 : i32
    %c0_i32_0 = arith.constant 0 : i32
    %c0_i32_1 = arith.constant 0 : i32
    return %c0_i32, %c0_i32_0 : i32, i32
  }
  func.func @transform_6(%arg0: i32) -> (i32, i32) {
    %c0_i32 = arith.constant 0 : i32
    %c0_i32_0 = arith.constant 0 : i32
    %c0_i32_1 = arith.constant 0 : i32
    return %c0_i32, %c0_i32_0 : i32, i32
  }
  func.func @transform_7(%arg0: i32) -> (i32, i32) {
    %c0_i32 = arith.constant 0 : i32
    %c0_i32_0 = arith.constant 0 : i32
    %c0_i32_1 = arith.constant 0 : i32
    return %c0_i32, %c0_i32_0 : i32, i32
  }
  func.func @transform_8(%arg0: i32) -> (i32, i32) {
    %c0_i32 = arith.constant 0 : i32
    %c0_i32_0 = arith.constant 0 : i32
    %c0_i32_1 = arith.constant 0 : i32
    return %c0_i32, %c0_i32_0 : i32, i32
  }
  func.func @transform_9(%arg0: i32) -> (i32, i32) {
    %c0_i32 = arith.constant 0 : i32
    %c0_i32_0 = arith.constant 0 : i32
    %c0_i32_1 = arith.constant 0 : i32
    return %c0_i32, %c0_i32_0 : i32, i32
  }
  func.func @transform_10(%arg0: i32) -> (i32, i32) {
    %c0_i32 = arith.constant 0 : i32
    %c0_i32_0 = arith.constant 0 : i32
    %c0_i32_1 = arith.constant 0 : i32
    return %c0_i32, %c0_i32_0 : i32, i32
  }
  func.func @transform_11(%arg0: i32) -> (i32, i32) {
    %c0_i32 = arith.constant 0 : i32
    %c0_i32_0 = arith.constant 0 : i32
    %c0_i32_1 = arith.constant 0 : i32
    return %c0_i32, %c0_i32_0 : i32, i32
  }
  func.func @transform_12(%arg0: i32) -> (i32, i32) {
    %c0_i32 = arith.constant 0 : i32
    %c0_i32_0 = arith.constant 0 : i32
    %c0_i32_1 = arith.constant 0 : i32
    return %c0_i32, %c0_i32_0 : i32, i32
  }
  func.func @transform_13(%arg0: i32) -> (i32, i32) {
    %c0_i32 = arith.constant 0 : i32
    %c0_i32_0 = arith.constant 0 : i32
    %c0_i32_1 = arith.constant 0 : i32
    return %c0_i32, %c0_i32_0 : i32, i32
  }
  func.func @transform_14(%arg0: i32) -> (i32, i32) {
    %c0_i32 = arith.constant 0 : i32
    %c0_i32_0 = arith.constant 0 : i32
    %c0_i32_1 = arith.constant 0 : i32
    return %c0_i32, %c0_i32_0 : i32, i32
  }
  func.func @transform_15(%arg0: i32) -> (i32, i32) {
    %c0_i32 = arith.constant 0 : i32
    %c0_i32_0 = arith.constant 0 : i32
    %c0_i32_1 = arith.constant 0 : i32
    return %c0_i32, %c0_i32_0 : i32, i32
  }
  func.func @transform_16(%arg0: i32) -> (i32, i32) {
    %c0_i32 = arith.constant 0 : i32
    %c0_i32_0 = arith.constant 0 : i32
    %c0_i32_1 = arith.constant 0 : i32
    return %c0_i32, %c0_i32_0 : i32, i32
  }
  func.func @transform_17(%arg0: i32) -> (i32, i32) {
    %c0_i32 = arith.constant 0 : i32
    %c0_i32_0 = arith.constant 0 : i32
    %c0_i32_1 = arith.constant 0 : i32
    return %c0_i32, %c0_i32_0 : i32, i32
  }
  func.func @transform_18(%arg0: i32) -> (i32, i32) {
    %c0_i32 = arith.constant 0 : i32
    %c0_i32_0 = arith.constant 0 : i32
    %c0_i32_1 = arith.constant 0 : i32
    return %c0_i32, %c0_i32_0 : i32, i32
  }
  func.func @transform_19(%arg0: i32) -> (i32, i32) {
    %c0_i32 = arith.constant 0 : i32
    %c0_i32_0 = arith.constant 0 : i32
    %c0_i32_1 = arith.constant 0 : i32
    return %c0_i32, %c0_i32_0 : i32, i32
  }
  func.func @transform_20(%arg0: i32) -> (i32, i32) {
    %c0_i32 = arith.constant 0 : i32
    %c0_i32_0 = arith.constant 0 : i32
    %c0_i32_1 = arith.constant 0 : i32
    return %c0_i32, %c0_i32_0 : i32, i32
  }
  func.func @transform_21(%arg0: i32) -> (i32, i32, i32) {
    %c0_i32 = arith.constant 0 : i32
    %c0_i32_0 = arith.constant 0 : i32
    %c0_i32_1 = arith.constant 0 : i32
    return %arg0, %c0_i32, %c0_i32_0 : i32, i32, i32
  }
}

module attributes {stable_mosaic.version = 11 : i64} {
  func.func @decoder_tcn_kernel(%arg0: i32, %arg1: memref<2x16x8xf32, #tpu.memory_space<vmem>>, %arg2: memref<384x128xf32, #tpu.memory_space<vmem>>, %arg3: memref<1x128xf32, #tpu.memory_space<vmem>>, %arg4: memref<1x128xf32, #tpu.memory_space<vmem>>, %arg5: memref<1x128xf32, #tpu.memory_space<vmem>>, %arg6: memref<384x128xf32, #tpu.memory_space<vmem>>, %arg7: memref<1x128xf32, #tpu.memory_space<vmem>>, %arg8: memref<1x128xf32, #tpu.memory_space<vmem>>, %arg9: memref<1x128xf32, #tpu.memory_space<vmem>>, %arg10: memref<128x128xf32, #tpu.memory_space<vmem>>, %arg11: memref<1x128xf32, #tpu.memory_space<vmem>>, %arg12: memref<384x128xf32, #tpu.memory_space<vmem>>, %arg13: memref<1x128xf32, #tpu.memory_space<vmem>>, %arg14: memref<1x128xf32, #tpu.memory_space<vmem>>, %arg15: memref<1x128xf32, #tpu.memory_space<vmem>>, %arg16: memref<384x128xf32, #tpu.memory_space<vmem>>, %arg17: memref<1x128xf32, #tpu.memory_space<vmem>>, %arg18: memref<1x128xf32, #tpu.memory_space<vmem>>, %arg19: memref<1x128xf32, #tpu.memory_space<vmem>>, %arg20: memref<128x128xf32, #tpu.memory_space<vmem>>, %arg21: memref<1x128xf32, #tpu.memory_space<vmem>>, %arg22: memref<2x16x128xf32, #tpu.memory_space<vmem>>) attributes {dimension_semantics = [#tpu.dimension_semantics<parallel>], iteration_bounds = array<i64: 1>, scalar_prefetch = 0 : i64, scratch_operands = 0 : i64, tpu.core_type = #tpu.core_type<tc>, window_params = [{transform_indices = @transform_0, window_bounds = array<i64: 2, 16, 8>}, {pipeline_mode = #tpu.pipeline_mode<synchronous>, transform_indices = @transform_1, window_bounds = array<i64: 384, 128>}, {pipeline_mode = #tpu.pipeline_mode<synchronous>, transform_indices = @transform_2, window_bounds = array<i64: 1, 128>}, {pipeline_mode = #tpu.pipeline_mode<synchronous>, transform_indices = @transform_3, window_bounds = array<i64: 1, 128>}, {pipeline_mode = #tpu.pipeline_mode<synchronous>, transform_indices = @transform_4, window_bounds = array<i64: 1, 128>}, {pipeline_mode = #tpu.pipeline_mode<synchronous>, transform_indices = @transform_5, window_bounds = array<i64: 384, 128>}, {pipeline_mode = #tpu.pipeline_mode<synchronous>, transform_indices = @transform_6, window_bounds = array<i64: 1, 128>}, {pipeline_mode = #tpu.pipeline_mode<synchronous>, transform_indices = @transform_7, window_bounds = array<i64: 1, 128>}, {pipeline_mode = #tpu.pipeline_mode<synchronous>, transform_indices = @transform_8, window_bounds = array<i64: 1, 128>}, {pipeline_mode = #tpu.pipeline_mode<synchronous>, transform_indices = @transform_9, window_bounds = array<i64: 128, 128>}, {pipeline_mode = #tpu.pipeline_mode<synchronous>, transform_indices = @transform_10, window_bounds = array<i64: 1, 128>}, {pipeline_mode = #tpu.pipeline_mode<synchronous>, transform_indices = @transform_11, window_bounds = array<i64: 384, 128>}, {pipeline_mode = #tpu.pipeline_mode<synchronous>, transform_indices = @transform_12, window_bounds = array<i64: 1, 128>}, {pipeline_mode = #tpu.pipeline_mode<synchronous>, transform_indices = @transform_13, window_bounds = array<i64: 1, 128>}, {pipeline_mode = #tpu.pipeline_mode<synchronous>, transform_indices = @transform_14, window_bounds = array<i64: 1, 128>}, {pipeline_mode = #tpu.pipeline_mode<synchronous>, transform_indices = @transform_15, window_bounds = array<i64: 384, 128>}, {pipeline_mode = #tpu.pipeline_mode<synchronous>, transform_indices = @transform_16, window_bounds = array<i64: 1, 128>}, {pipeline_mode = #tpu.pipeline_mode<synchronous>, transform_indices = @transform_17, window_bounds = array<i64: 1, 128>}, {pipeline_mode = #tpu.pipeline_mode<synchronous>, transform_indices = @transform_18, window_bounds = array<i64: 1, 128>}, {pipeline_mode = #tpu.pipeline_mode<synchronous>, transform_indices = @transform_19, window_bounds = array<i64: 128, 128>}, {pipeline_mode = #tpu.pipeline_mode<synchronous>, transform_indices = @transform_20, window_bounds = array<i64: 1, 128>}, {transform_indices = @transform_21, window_bounds = array<i64: 2, 16, 128>}]} {
    %c0 = arith.constant 0 : index
    %c0_0 = arith.constant 0 : index
    %c0_1 = arith.constant 0 : index
    %0 = vector.load %arg1[%c0, %c0_0, %c0_1] : memref<2x16x8xf32, #tpu.memory_space<vmem>>, vector<2x16x8xf32>
    %1 = vector.shape_cast %0 : vector<2x16x8xf32> to vector<32x8xf32>
    %cst = arith.constant 0.000000e+00 : f32
    %2 = vector.broadcast %cst : f32 to vector<32x120xf32>
    %3 = tpu.concatenate %1, %2 in 1 : vector<32x8xf32>, vector<32x120xf32> -> vector<32x128xf32>
    %4 = tpu.iota {dimensions = array<i32: 0>} : vector<32x1xi32>
    %c16_i32 = arith.constant 16 : i32
    %c0_i32 = arith.constant 0 : i32
    %5 = arith.cmpi eq, %c16_i32, %c0_i32 : i32
    %c1_i32 = arith.constant 1 : i32
    %6 = arith.select %5, %c1_i32, %c16_i32 : i32
    %7 = vector.broadcast %6 : i32 to vector<32x1xi32>
    %8 = arith.remsi %4, %7 : vector<32x1xi32>
    %c0_i32_2 = arith.constant 0 : i32
    %9 = vector.broadcast %c0_i32_2 : i32 to vector<32x1xi32>
    %10 = arith.cmpi ne, %8, %9 : vector<32x1xi32>
    %c0_i32_3 = arith.constant 0 : i32
    %11 = vector.broadcast %c0_i32_3 : i32 to vector<32x1xi32>
    %12 = arith.cmpi slt, %8, %11 : vector<32x1xi32>
    %c0_i32_4 = arith.constant 0 : i32
    %13 = arith.cmpi slt, %6, %c0_i32_4 : i32
    %14 = vector.broadcast %13 : i1 to vector<32x1xi1>
    %15 = vector.broadcast %14 : vector<32x1xi1> to vector<32x1xi1>
    %16 = arith.xori %12, %15 : vector<32x1xi1>
    %17 = arith.andi %16, %10 : vector<32x1xi1>
    %18 = vector.broadcast %6 : i32 to vector<32x1xi32>
    %19 = arith.addi %8, %18 : vector<32x1xi32>
    %20 = arith.select %17, %19, %8 : vector<32x1xi1>, vector<32x1xi32>
    %c2_i32 = arith.constant 2 : i32
    %21 = tpu.dynamic_rotate %3 by %c2_i32 dim 0 : vector<32x128xf32>, i32 -> vector<32x128xf32>
    %c2_i32_5 = arith.constant 2 : i32
    %22 = vector.broadcast %c2_i32_5 : i32 to vector<32x1xi32>
    %23 = arith.cmpi sge, %20, %22 : vector<32x1xi32>
    %cst_6 = arith.constant 0.000000e+00 : f32
    %24 = vector.shape_cast %23 : vector<32x1xi1> to vector<32x1xi1>
    %25 = vector.broadcast %24 : vector<32x1xi1> to vector<32x128xi1>
    %26 = vector.broadcast %cst_6 : f32 to vector<32x128xf32>
    %27 = arith.select %25, %21, %26 : vector<32x128xi1>, vector<32x128xf32>
    %c1_i32_7 = arith.constant 1 : i32
    %28 = tpu.dynamic_rotate %3 by %c1_i32_7 dim 0 : vector<32x128xf32>, i32 -> vector<32x128xf32>
    %c1_i32_8 = arith.constant 1 : i32
    %29 = vector.broadcast %c1_i32_8 : i32 to vector<32x1xi32>
    %30 = arith.cmpi sge, %20, %29 : vector<32x1xi32>
    %cst_9 = arith.constant 0.000000e+00 : f32
    %31 = vector.shape_cast %30 : vector<32x1xi1> to vector<32x1xi1>
    %32 = vector.broadcast %31 : vector<32x1xi1> to vector<32x128xi1>
    %33 = vector.broadcast %cst_9 : f32 to vector<32x128xf32>
    %34 = arith.select %32, %28, %33 : vector<32x128xi1>, vector<32x128xf32>
    %35 = tpu.concatenate %27, %34, %3 in 1 : vector<32x128xf32>, vector<32x128xf32>, vector<32x128xf32> -> vector<32x384xf32>
    %c0_10 = arith.constant 0 : index
    %c0_11 = arith.constant 0 : index
    %36 = vector.load %arg2[%c0_10, %c0_11] : memref<384x128xf32, #tpu.memory_space<vmem>>, vector<384x128xf32>
    %cst_12 = arith.constant dense<0.000000e+00> : vector<32x128xf32>
    %37 = tpu.matmul %35, %36, %cst_12 {dimension_numbers = #tpu.dot_dimension_numbers<[1], [0], [0], [1], [0, 0, 1, 1], [], []>} : vector<32x384xf32>, vector<384x128xf32>, vector<32x128xf32> -> vector<32x128xf32>
    %c0_13 = arith.constant 0 : index
    %c0_14 = arith.constant 0 : index
    %38 = vector.load %arg3[%c0_13, %c0_14] : memref<1x128xf32, #tpu.memory_space<vmem>>, vector<1x128xf32>
    %39 = vector.broadcast %38 : vector<1x128xf32> to vector<32x128xf32>
    %40 = arith.addf %37, %39 : vector<32x128xf32>
    %cst_15 = arith.constant 0.000000e+00 : f32
    %41 = vector.broadcast %cst_15 : f32 to vector<32x128xf32>
    %42 = arith.maximumf %40, %41 : vector<32x128xf32>
    %c0_16 = arith.constant 0 : index
    %c0_17 = arith.constant 0 : index
    %43 = vector.load %arg4[%c0_16, %c0_17] : memref<1x128xf32, #tpu.memory_space<vmem>>, vector<1x128xf32>
    %44 = vector.broadcast %43 : vector<1x128xf32> to vector<32x128xf32>
    %45 = arith.mulf %42, %44 : vector<32x128xf32>
    %c0_18 = arith.constant 0 : index
    %c0_19 = arith.constant 0 : index
    %46 = vector.load %arg5[%c0_18, %c0_19] : memref<1x128xf32, #tpu.memory_space<vmem>>, vector<1x128xf32>
    %47 = vector.broadcast %46 : vector<1x128xf32> to vector<32x128xf32>
    %48 = arith.addf %45, %47 : vector<32x128xf32>
    %c2_i32_20 = arith.constant 2 : i32
    %49 = tpu.dynamic_rotate %48 by %c2_i32_20 dim 0 : vector<32x128xf32>, i32 -> vector<32x128xf32>
    %c2_i32_21 = arith.constant 2 : i32
    %50 = vector.broadcast %c2_i32_21 : i32 to vector<32x1xi32>
    %51 = arith.cmpi sge, %20, %50 : vector<32x1xi32>
    %cst_22 = arith.constant 0.000000e+00 : f32
    %52 = vector.shape_cast %51 : vector<32x1xi1> to vector<32x1xi1>
    %53 = vector.broadcast %52 : vector<32x1xi1> to vector<32x128xi1>
    %54 = vector.broadcast %cst_22 : f32 to vector<32x128xf32>
    %55 = arith.select %53, %49, %54 : vector<32x128xi1>, vector<32x128xf32>
    %c1_i32_23 = arith.constant 1 : i32
    %56 = tpu.dynamic_rotate %48 by %c1_i32_23 dim 0 : vector<32x128xf32>, i32 -> vector<32x128xf32>
    %c1_i32_24 = arith.constant 1 : i32
    %57 = vector.broadcast %c1_i32_24 : i32 to vector<32x1xi32>
    %58 = arith.cmpi sge, %20, %57 : vector<32x1xi32>
    %cst_25 = arith.constant 0.000000e+00 : f32
    %59 = vector.shape_cast %58 : vector<32x1xi1> to vector<32x1xi1>
    %60 = vector.broadcast %59 : vector<32x1xi1> to vector<32x128xi1>
    %61 = vector.broadcast %cst_25 : f32 to vector<32x128xf32>
    %62 = arith.select %60, %56, %61 : vector<32x128xi1>, vector<32x128xf32>
    %63 = tpu.concatenate %55, %62, %48 in 1 : vector<32x128xf32>, vector<32x128xf32>, vector<32x128xf32> -> vector<32x384xf32>
    %c0_26 = arith.constant 0 : index
    %c0_27 = arith.constant 0 : index
    %64 = vector.load %arg6[%c0_26, %c0_27] : memref<384x128xf32, #tpu.memory_space<vmem>>, vector<384x128xf32>
    %cst_28 = arith.constant dense<0.000000e+00> : vector<32x128xf32>
    %65 = tpu.matmul %63, %64, %cst_28 {dimension_numbers = #tpu.dot_dimension_numbers<[1], [0], [0], [1], [0, 0, 1, 1], [], []>} : vector<32x384xf32>, vector<384x128xf32>, vector<32x128xf32> -> vector<32x128xf32>
    %c0_29 = arith.constant 0 : index
    %c0_30 = arith.constant 0 : index
    %66 = vector.load %arg7[%c0_29, %c0_30] : memref<1x128xf32, #tpu.memory_space<vmem>>, vector<1x128xf32>
    %67 = vector.broadcast %66 : vector<1x128xf32> to vector<32x128xf32>
    %68 = arith.addf %65, %67 : vector<32x128xf32>
    %cst_31 = arith.constant 0.000000e+00 : f32
    %69 = vector.broadcast %cst_31 : f32 to vector<32x128xf32>
    %70 = arith.maximumf %68, %69 : vector<32x128xf32>
    %c0_32 = arith.constant 0 : index
    %c0_33 = arith.constant 0 : index
    %71 = vector.load %arg8[%c0_32, %c0_33] : memref<1x128xf32, #tpu.memory_space<vmem>>, vector<1x128xf32>
    %72 = vector.broadcast %71 : vector<1x128xf32> to vector<32x128xf32>
    %73 = arith.mulf %70, %72 : vector<32x128xf32>
    %c0_34 = arith.constant 0 : index
    %c0_35 = arith.constant 0 : index
    %74 = vector.load %arg9[%c0_34, %c0_35] : memref<1x128xf32, #tpu.memory_space<vmem>>, vector<1x128xf32>
    %75 = vector.broadcast %74 : vector<1x128xf32> to vector<32x128xf32>
    %76 = arith.addf %73, %75 : vector<32x128xf32>
    %c0_36 = arith.constant 0 : index
    %c0_37 = arith.constant 0 : index
    %77 = vector.load %arg10[%c0_36, %c0_37] : memref<128x128xf32, #tpu.memory_space<vmem>>, vector<128x128xf32>
    %cst_38 = arith.constant dense<0.000000e+00> : vector<32x128xf32>
    %78 = tpu.matmul %3, %77, %cst_38 {dimension_numbers = #tpu.dot_dimension_numbers<[1], [0], [0], [1], [0, 0, 1, 1], [], []>} : vector<32x128xf32>, vector<128x128xf32>, vector<32x128xf32> -> vector<32x128xf32>
    %c0_39 = arith.constant 0 : index
    %c0_40 = arith.constant 0 : index
    %79 = vector.load %arg11[%c0_39, %c0_40] : memref<1x128xf32, #tpu.memory_space<vmem>>, vector<1x128xf32>
    %80 = vector.broadcast %79 : vector<1x128xf32> to vector<32x128xf32>
    %81 = arith.addf %78, %80 : vector<32x128xf32>
    %82 = arith.addf %76, %81 : vector<32x128xf32>
    %cst_41 = arith.constant 0.000000e+00 : f32
    %83 = vector.broadcast %cst_41 : f32 to vector<32x128xf32>
    %84 = arith.maximumf %82, %83 : vector<32x128xf32>
    %c4_i32 = arith.constant 4 : i32
    %85 = tpu.dynamic_rotate %84 by %c4_i32 dim 0 : vector<32x128xf32>, i32 -> vector<32x128xf32>
    %c4_i32_42 = arith.constant 4 : i32
    %86 = vector.broadcast %c4_i32_42 : i32 to vector<32x1xi32>
    %87 = arith.cmpi sge, %20, %86 : vector<32x1xi32>
    %cst_43 = arith.constant 0.000000e+00 : f32
    %88 = vector.shape_cast %87 : vector<32x1xi1> to vector<32x1xi1>
    %89 = vector.broadcast %88 : vector<32x1xi1> to vector<32x128xi1>
    %90 = vector.broadcast %cst_43 : f32 to vector<32x128xf32>
    %91 = arith.select %89, %85, %90 : vector<32x128xi1>, vector<32x128xf32>
    %c2_i32_44 = arith.constant 2 : i32
    %92 = tpu.dynamic_rotate %84 by %c2_i32_44 dim 0 : vector<32x128xf32>, i32 -> vector<32x128xf32>
    %c2_i32_45 = arith.constant 2 : i32
    %93 = vector.broadcast %c2_i32_45 : i32 to vector<32x1xi32>
    %94 = arith.cmpi sge, %20, %93 : vector<32x1xi32>
    %cst_46 = arith.constant 0.000000e+00 : f32
    %95 = vector.shape_cast %94 : vector<32x1xi1> to vector<32x1xi1>
    %96 = vector.broadcast %95 : vector<32x1xi1> to vector<32x128xi1>
    %97 = vector.broadcast %cst_46 : f32 to vector<32x128xf32>
    %98 = arith.select %96, %92, %97 : vector<32x128xi1>, vector<32x128xf32>
    %99 = tpu.concatenate %91, %98, %84 in 1 : vector<32x128xf32>, vector<32x128xf32>, vector<32x128xf32> -> vector<32x384xf32>
    %c0_47 = arith.constant 0 : index
    %c0_48 = arith.constant 0 : index
    %100 = vector.load %arg12[%c0_47, %c0_48] : memref<384x128xf32, #tpu.memory_space<vmem>>, vector<384x128xf32>
    %cst_49 = arith.constant dense<0.000000e+00> : vector<32x128xf32>
    %101 = tpu.matmul %99, %100, %cst_49 {dimension_numbers = #tpu.dot_dimension_numbers<[1], [0], [0], [1], [0, 0, 1, 1], [], []>} : vector<32x384xf32>, vector<384x128xf32>, vector<32x128xf32> -> vector<32x128xf32>
    %c0_50 = arith.constant 0 : index
    %c0_51 = arith.constant 0 : index
    %102 = vector.load %arg13[%c0_50, %c0_51] : memref<1x128xf32, #tpu.memory_space<vmem>>, vector<1x128xf32>
    %103 = vector.broadcast %102 : vector<1x128xf32> to vector<32x128xf32>
    %104 = arith.addf %101, %103 : vector<32x128xf32>
    %cst_52 = arith.constant 0.000000e+00 : f32
    %105 = vector.broadcast %cst_52 : f32 to vector<32x128xf32>
    %106 = arith.maximumf %104, %105 : vector<32x128xf32>
    %c0_53 = arith.constant 0 : index
    %c0_54 = arith.constant 0 : index
    %107 = vector.load %arg14[%c0_53, %c0_54] : memref<1x128xf32, #tpu.memory_space<vmem>>, vector<1x128xf32>
    %108 = vector.broadcast %107 : vector<1x128xf32> to vector<32x128xf32>
    %109 = arith.mulf %106, %108 : vector<32x128xf32>
    %c0_55 = arith.constant 0 : index
    %c0_56 = arith.constant 0 : index
    %110 = vector.load %arg15[%c0_55, %c0_56] : memref<1x128xf32, #tpu.memory_space<vmem>>, vector<1x128xf32>
    %111 = vector.broadcast %110 : vector<1x128xf32> to vector<32x128xf32>
    %112 = arith.addf %109, %111 : vector<32x128xf32>
    %c4_i32_57 = arith.constant 4 : i32
    %113 = tpu.dynamic_rotate %112 by %c4_i32_57 dim 0 : vector<32x128xf32>, i32 -> vector<32x128xf32>
    %c4_i32_58 = arith.constant 4 : i32
    %114 = vector.broadcast %c4_i32_58 : i32 to vector<32x1xi32>
    %115 = arith.cmpi sge, %20, %114 : vector<32x1xi32>
    %cst_59 = arith.constant 0.000000e+00 : f32
    %116 = vector.shape_cast %115 : vector<32x1xi1> to vector<32x1xi1>
    %117 = vector.broadcast %116 : vector<32x1xi1> to vector<32x128xi1>
    %118 = vector.broadcast %cst_59 : f32 to vector<32x128xf32>
    %119 = arith.select %117, %113, %118 : vector<32x128xi1>, vector<32x128xf32>
    %c2_i32_60 = arith.constant 2 : i32
    %120 = tpu.dynamic_rotate %112 by %c2_i32_60 dim 0 : vector<32x128xf32>, i32 -> vector<32x128xf32>
    %c2_i32_61 = arith.constant 2 : i32
    %121 = vector.broadcast %c2_i32_61 : i32 to vector<32x1xi32>
    %122 = arith.cmpi sge, %20, %121 : vector<32x1xi32>
    %cst_62 = arith.constant 0.000000e+00 : f32
    %123 = vector.shape_cast %122 : vector<32x1xi1> to vector<32x1xi1>
    %124 = vector.broadcast %123 : vector<32x1xi1> to vector<32x128xi1>
    %125 = vector.broadcast %cst_62 : f32 to vector<32x128xf32>
    %126 = arith.select %124, %120, %125 : vector<32x128xi1>, vector<32x128xf32>
    %127 = tpu.concatenate %119, %126, %112 in 1 : vector<32x128xf32>, vector<32x128xf32>, vector<32x128xf32> -> vector<32x384xf32>
    %c0_63 = arith.constant 0 : index
    %c0_64 = arith.constant 0 : index
    %128 = vector.load %arg16[%c0_63, %c0_64] : memref<384x128xf32, #tpu.memory_space<vmem>>, vector<384x128xf32>
    %cst_65 = arith.constant dense<0.000000e+00> : vector<32x128xf32>
    %129 = tpu.matmul %127, %128, %cst_65 {dimension_numbers = #tpu.dot_dimension_numbers<[1], [0], [0], [1], [0, 0, 1, 1], [], []>} : vector<32x384xf32>, vector<384x128xf32>, vector<32x128xf32> -> vector<32x128xf32>
    %c0_66 = arith.constant 0 : index
    %c0_67 = arith.constant 0 : index
    %130 = vector.load %arg17[%c0_66, %c0_67] : memref<1x128xf32, #tpu.memory_space<vmem>>, vector<1x128xf32>
    %131 = vector.broadcast %130 : vector<1x128xf32> to vector<32x128xf32>
    %132 = arith.addf %129, %131 : vector<32x128xf32>
    %cst_68 = arith.constant 0.000000e+00 : f32
    %133 = vector.broadcast %cst_68 : f32 to vector<32x128xf32>
    %134 = arith.maximumf %132, %133 : vector<32x128xf32>
    %c0_69 = arith.constant 0 : index
    %c0_70 = arith.constant 0 : index
    %135 = vector.load %arg18[%c0_69, %c0_70] : memref<1x128xf32, #tpu.memory_space<vmem>>, vector<1x128xf32>
    %136 = vector.broadcast %135 : vector<1x128xf32> to vector<32x128xf32>
    %137 = arith.mulf %134, %136 : vector<32x128xf32>
    %c0_71 = arith.constant 0 : index
    %c0_72 = arith.constant 0 : index
    %138 = vector.load %arg19[%c0_71, %c0_72] : memref<1x128xf32, #tpu.memory_space<vmem>>, vector<1x128xf32>
    %139 = vector.broadcast %138 : vector<1x128xf32> to vector<32x128xf32>
    %140 = arith.addf %137, %139 : vector<32x128xf32>
    %141 = arith.addf %140, %84 : vector<32x128xf32>
    %cst_73 = arith.constant 0.000000e+00 : f32
    %142 = vector.broadcast %cst_73 : f32 to vector<32x128xf32>
    %143 = arith.maximumf %141, %142 : vector<32x128xf32>
    %c0_74 = arith.constant 0 : index
    %c0_75 = arith.constant 0 : index
    %144 = vector.load %arg20[%c0_74, %c0_75] : memref<128x128xf32, #tpu.memory_space<vmem>>, vector<128x128xf32>
    %cst_76 = arith.constant dense<0.000000e+00> : vector<32x128xf32>
    %145 = tpu.matmul %143, %144, %cst_76 {dimension_numbers = #tpu.dot_dimension_numbers<[1], [0], [0], [1], [0, 0, 1, 1], [], []>} : vector<32x128xf32>, vector<128x128xf32>, vector<32x128xf32> -> vector<32x128xf32>
    %c0_77 = arith.constant 0 : index
    %c0_78 = arith.constant 0 : index
    %146 = vector.load %arg21[%c0_77, %c0_78] : memref<1x128xf32, #tpu.memory_space<vmem>>, vector<1x128xf32>
    %147 = vector.broadcast %146 : vector<1x128xf32> to vector<32x128xf32>
    %148 = arith.addf %145, %147 : vector<32x128xf32>
    %149 = vector.shape_cast %148 : vector<32x128xf32> to vector<2x16x128xf32>
    %c0_79 = arith.constant 0 : index
    %c0_80 = arith.constant 0 : index
    %c0_81 = arith.constant 0 : index
    %150 = vector.load %arg22[%c0_79, %c0_80, %c0_81] : memref<2x16x128xf32, #tpu.memory_space<vmem>>, vector<2x16x128xf32>
    tpu.vector_store %arg22[%c0_79, %c0_80, %c0_81], %149 {strides = array<i32>} : memref<2x16x128xf32, #tpu.memory_space<vmem>>, vector<2x16x128xf32>,
    return
  }
  func.func @transform_0(%arg0: i32) -> (i32, i32, i32) {
    %c0_i32 = arith.constant 0 : i32
    %c0_i32_0 = arith.constant 0 : i32
    %c0_i32_1 = arith.constant 0 : i32
    return %arg0, %c0_i32, %c0_i32_0 : i32, i32, i32
  }
  func.func @transform_1(%arg0: i32) -> (i32, i32) {
    %c0_i32 = arith.constant 0 : i32
    %c0_i32_0 = arith.constant 0 : i32
    %c0_i32_1 = arith.constant 0 : i32
    return %c0_i32, %c0_i32_0 : i32, i32
  }
  func.func @transform_2(%arg0: i32) -> (i32, i32) {
    %c0_i32 = arith.constant 0 : i32
    %c0_i32_0 = arith.constant 0 : i32
    %c0_i32_1 = arith.constant 0 : i32
    return %c0_i32, %c0_i32_0 : i32, i32
  }
  func.func @transform_3(%arg0: i32) -> (i32, i32) {
    %c0_i32 = arith.constant 0 : i32
    %c0_i32_0 = arith.constant 0 : i32
    %c0_i32_1 = arith.constant 0 : i32
    return %c0_i32, %c0_i32_0 : i32, i32
  }
  func.func @transform_4(%arg0: i32) -> (i32, i32) {
    %c0_i32 = arith.constant 0 : i32
    %c0_i32_0 = arith.constant 0 : i32
    %c0_i32_1 = arith.constant 0 : i32
    return %c0_i32, %c0_i32_0 : i32, i32
  }
  func.func @transform_5(%arg0: i32) -> (i32, i32) {
    %c0_i32 = arith.constant 0 : i32
    %c0_i32_0 = arith.constant 0 : i32
    %c0_i32_1 = arith.constant 0 : i32
    return %c0_i32, %c0_i32_0 : i32, i32
  }
  func.func @transform_6(%arg0: i32) -> (i32, i32) {
    %c0_i32 = arith.constant 0 : i32
    %c0_i32_0 = arith.constant 0 : i32
    %c0_i32_1 = arith.constant 0 : i32
    return %c0_i32, %c0_i32_0 : i32, i32
  }
  func.func @transform_7(%arg0: i32) -> (i32, i32) {
    %c0_i32 = arith.constant 0 : i32
    %c0_i32_0 = arith.constant 0 : i32
    %c0_i32_1 = arith.constant 0 : i32
    return %c0_i32, %c0_i32_0 : i32, i32
  }
  func.func @transform_8(%arg0: i32) -> (i32, i32) {
    %c0_i32 = arith.constant 0 : i32
    %c0_i32_0 = arith.constant 0 : i32
    %c0_i32_1 = arith.constant 0 : i32
    return %c0_i32, %c0_i32_0 : i32, i32
  }
  func.func @transform_9(%arg0: i32) -> (i32, i32) {
    %c0_i32 = arith.constant 0 : i32
    %c0_i32_0 = arith.constant 0 : i32
    %c0_i32_1 = arith.constant 0 : i32
    return %c0_i32, %c0_i32_0 : i32, i32
  }
  func.func @transform_10(%arg0: i32) -> (i32, i32) {
    %c0_i32 = arith.constant 0 : i32
    %c0_i32_0 = arith.constant 0 : i32
    %c0_i32_1 = arith.constant 0 : i32
    return %c0_i32, %c0_i32_0 : i32, i32
  }
  func.func @transform_11(%arg0: i32) -> (i32, i32) {
    %c0_i32 = arith.constant 0 : i32
    %c0_i32_0 = arith.constant 0 : i32
    %c0_i32_1 = arith.constant 0 : i32
    return %c0_i32, %c0_i32_0 : i32, i32
  }
  func.func @transform_12(%arg0: i32) -> (i32, i32) {
    %c0_i32 = arith.constant 0 : i32
    %c0_i32_0 = arith.constant 0 : i32
    %c0_i32_1 = arith.constant 0 : i32
    return %c0_i32, %c0_i32_0 : i32, i32
  }
  func.func @transform_13(%arg0: i32) -> (i32, i32) {
    %c0_i32 = arith.constant 0 : i32
    %c0_i32_0 = arith.constant 0 : i32
    %c0_i32_1 = arith.constant 0 : i32
    return %c0_i32, %c0_i32_0 : i32, i32
  }
  func.func @transform_14(%arg0: i32) -> (i32, i32) {
    %c0_i32 = arith.constant 0 : i32
    %c0_i32_0 = arith.constant 0 : i32
    %c0_i32_1 = arith.constant 0 : i32
    return %c0_i32, %c0_i32_0 : i32, i32
  }
  func.func @transform_15(%arg0: i32) -> (i32, i32) {
    %c0_i32 = arith.constant 0 : i32
    %c0_i32_0 = arith.constant 0 : i32
    %c0_i32_1 = arith.constant 0 : i32
    return %c0_i32, %c0_i32_0 : i32, i32
  }
  func.func @transform_16(%arg0: i32) -> (i32, i32) {
    %c0_i32 = arith.constant 0 : i32
    %c0_i32_0 = arith.constant 0 : i32
    %c0_i32_1 = arith.constant 0 : i32
    return %c0_i32, %c0_i32_0 : i32, i32
  }
  func.func @transform_17(%arg0: i32) -> (i32, i32) {
    %c0_i32 = arith.constant 0 : i32
    %c0_i32_0 = arith.constant 0 : i32
    %c0_i32_1 = arith.constant 0 : i32
    return %c0_i32, %c0_i32_0 : i32, i32
  }
  func.func @transform_18(%arg0: i32) -> (i32, i32) {
    %c0_i32 = arith.constant 0 : i32
    %c0_i32_0 = arith.constant 0 : i32
    %c0_i32_1 = arith.constant 0 : i32
    return %c0_i32, %c0_i32_0 : i32, i32
  }
  func.func @transform_19(%arg0: i32) -> (i32, i32) {
    %c0_i32 = arith.constant 0 : i32
    %c0_i32_0 = arith.constant 0 : i32
    %c0_i32_1 = arith.constant 0 : i32
    return %c0_i32, %c0_i32_0 : i32, i32
  }
  func.func @transform_20(%arg0: i32) -> (i32, i32) {
    %c0_i32 = arith.constant 0 : i32
    %c0_i32_0 = arith.constant 0 : i32
    %c0_i32_1 = arith.constant 0 : i32
    return %c0_i32, %c0_i32_0 : i32, i32
  }
  func.func @transform_21(%arg0: i32) -> (i32, i32, i32) {
    %c0_i32 = arith.constant 0 : i32
    %c0_i32_0 = arith.constant 0 : i32
    %c0_i32_1 = arith.constant 0 : i32
    return %arg0, %c0_i32, %c0_i32_0 : i32, i32, i32
  }
}

module attributes {stable_mosaic.version = 11 : i64} {
  func.func @decoder_tcn_kernel(%arg0: i32, %arg1: memref<2x16x8xf32, #tpu.memory_space<vmem>>, %arg2: memref<384x128xf32, #tpu.memory_space<vmem>>, %arg3: memref<1x128xf32, #tpu.memory_space<vmem>>, %arg4: memref<1x128xf32, #tpu.memory_space<vmem>>, %arg5: memref<1x128xf32, #tpu.memory_space<vmem>>, %arg6: memref<384x128xf32, #tpu.memory_space<vmem>>, %arg7: memref<1x128xf32, #tpu.memory_space<vmem>>, %arg8: memref<1x128xf32, #tpu.memory_space<vmem>>, %arg9: memref<1x128xf32, #tpu.memory_space<vmem>>, %arg10: memref<128x128xf32, #tpu.memory_space<vmem>>, %arg11: memref<1x128xf32, #tpu.memory_space<vmem>>, %arg12: memref<384x128xf32, #tpu.memory_space<vmem>>, %arg13: memref<1x128xf32, #tpu.memory_space<vmem>>, %arg14: memref<1x128xf32, #tpu.memory_space<vmem>>, %arg15: memref<1x128xf32, #tpu.memory_space<vmem>>, %arg16: memref<384x128xf32, #tpu.memory_space<vmem>>, %arg17: memref<1x128xf32, #tpu.memory_space<vmem>>, %arg18: memref<1x128xf32, #tpu.memory_space<vmem>>, %arg19: memref<1x128xf32, #tpu.memory_space<vmem>>, %arg20: memref<128x128xf32, #tpu.memory_space<vmem>>, %arg21: memref<1x128xf32, #tpu.memory_space<vmem>>, %arg22: memref<2x16x128xf32, #tpu.memory_space<vmem>>) attributes {dimension_semantics = [#tpu.dimension_semantics<parallel>], iteration_bounds = array<i64: 1>, scalar_prefetch = 0 : i64, scratch_operands = 0 : i64, tpu.core_type = #tpu.core_type<tc>, window_params = [{transform_indices = @transform_0, window_bounds = array<i64: 2, 16, 8>}, {pipeline_mode = #tpu.pipeline_mode<synchronous>, transform_indices = @transform_1, window_bounds = array<i64: 384, 128>}, {pipeline_mode = #tpu.pipeline_mode<synchronous>, transform_indices = @transform_2, window_bounds = array<i64: 1, 128>}, {pipeline_mode = #tpu.pipeline_mode<synchronous>, transform_indices = @transform_3, window_bounds = array<i64: 1, 128>}, {pipeline_mode = #tpu.pipeline_mode<synchronous>, transform_indices = @transform_4, window_bounds = array<i64: 1, 128>}, {pipeline_mode = #tpu.pipeline_mode<synchronous>, transform_indices = @transform_5, window_bounds = array<i64: 384, 128>}, {pipeline_mode = #tpu.pipeline_mode<synchronous>, transform_indices = @transform_6, window_bounds = array<i64: 1, 128>}, {pipeline_mode = #tpu.pipeline_mode<synchronous>, transform_indices = @transform_7, window_bounds = array<i64: 1, 128>}, {pipeline_mode = #tpu.pipeline_mode<synchronous>, transform_indices = @transform_8, window_bounds = array<i64: 1, 128>}, {pipeline_mode = #tpu.pipeline_mode<synchronous>, transform_indices = @transform_9, window_bounds = array<i64: 128, 128>}, {pipeline_mode = #tpu.pipeline_mode<synchronous>, transform_indices = @transform_10, window_bounds = array<i64: 1, 128>}, {pipeline_mode = #tpu.pipeline_mode<synchronous>, transform_indices = @transform_11, window_bounds = array<i64: 384, 128>}, {pipeline_mode = #tpu.pipeline_mode<synchronous>, transform_indices = @transform_12, window_bounds = array<i64: 1, 128>}, {pipeline_mode = #tpu.pipeline_mode<synchronous>, transform_indices = @transform_13, window_bounds = array<i64: 1, 128>}, {pipeline_mode = #tpu.pipeline_mode<synchronous>, transform_indices = @transform_14, window_bounds = array<i64: 1, 128>}, {pipeline_mode = #tpu.pipeline_mode<synchronous>, transform_indices = @transform_15, window_bounds = array<i64: 384, 128>}, {pipeline_mode = #tpu.pipeline_mode<synchronous>, transform_indices = @transform_16, window_bounds = array<i64: 1, 128>}, {pipeline_mode = #tpu.pipeline_mode<synchronous>, transform_indices = @transform_17, window_bounds = array<i64: 1, 128>}, {pipeline_mode = #tpu.pipeline_mode<synchronous>, transform_indices = @transform_18, window_bounds = array<i64: 1, 128>}, {pipeline_mode = #tpu.pipeline_mode<synchronous>, transform_indices = @transform_19, window_bounds = array<i64: 128, 128>}, {pipeline_mode = #tpu.pipeline_mode<synchronous>, transform_indices = @transform_20, window_bounds = array<i64: 1, 128>}, {transform_indices = @transform_21, window_bounds = array<i64: 2, 16, 128>}]} {
    %c0 = arith.constant 0 : index
    %c0_0 = arith.constant 0 : index
    %c0_1 = arith.constant 0 : index
    %0 = vector.load %arg1[%c0, %c0_0, %c0_1] : memref<2x16x8xf32, #tpu.memory_space<vmem>>, vector<2x16x8xf32>
    %1 = vector.shape_cast %0 : vector<2x16x8xf32> to vector<32x8xf32>
    %cst = arith.constant 0.000000e+00 : f32
    %2 = vector.broadcast %cst : f32 to vector<32x120xf32>
    %3 = tpu.concatenate %1, %2 in 1 : vector<32x8xf32>, vector<32x120xf32> -> vector<32x128xf32>
    %4 = tpu.iota {dimensions = array<i32: 0>} : vector<32x1xi32>
    %c16_i32 = arith.constant 16 : i32
    %c0_i32 = arith.constant 0 : i32
    %5 = arith.cmpi eq, %c16_i32, %c0_i32 : i32
    %c1_i32 = arith.constant 1 : i32
    %6 = arith.select %5, %c1_i32, %c16_i32 : i32
    %7 = vector.broadcast %6 : i32 to vector<32x1xi32>
    %8 = arith.remsi %4, %7 : vector<32x1xi32>
    %c0_i32_2 = arith.constant 0 : i32
    %9 = vector.broadcast %c0_i32_2 : i32 to vector<32x1xi32>
    %10 = arith.cmpi ne, %8, %9 : vector<32x1xi32>
    %c0_i32_3 = arith.constant 0 : i32
    %11 = vector.broadcast %c0_i32_3 : i32 to vector<32x1xi32>
    %12 = arith.cmpi slt, %8, %11 : vector<32x1xi32>
    %c0_i32_4 = arith.constant 0 : i32
    %13 = arith.cmpi slt, %6, %c0_i32_4 : i32
    %14 = vector.broadcast %13 : i1 to vector<32x1xi1>
    %15 = vector.broadcast %14 : vector<32x1xi1> to vector<32x1xi1>
    %16 = arith.xori %12, %15 : vector<32x1xi1>
    %17 = arith.andi %16, %10 : vector<32x1xi1>
    %18 = vector.broadcast %6 : i32 to vector<32x1xi32>
    %19 = arith.addi %8, %18 : vector<32x1xi32>
    %20 = arith.select %17, %19, %8 : vector<32x1xi1>, vector<32x1xi32>
    %21 = vector.extract_strided_slice %3 {offsets = [30, 0], sizes = [2, 128], strides = [1, 1]} : vector<32x128xf32> to vector<2x128xf32>
    %22 = vector.extract_strided_slice %3 {offsets = [0, 0], sizes = [30, 128], strides = [1, 1]} : vector<32x128xf32> to vector<30x128xf32>
    %23 = tpu.concatenate %21, %22 in 0 : vector<2x128xf32>, vector<30x128xf32> -> vector<32x128xf32>
    %c2_i32 = arith.constant 2 : i32
    %24 = vector.broadcast %c2_i32 : i32 to vector<32x1xi32>
    %25 = arith.cmpi sge, %20, %24 : vector<32x1xi32>
    %cst_5 = arith.constant 0.000000e+00 : f32
    %26 = vector.shape_cast %25 : vector<32x1xi1> to vector<32x1xi1>
    %27 = vector.broadcast %26 : vector<32x1xi1> to vector<32x128xi1>
    %28 = vector.broadcast %cst_5 : f32 to vector<32x128xf32>
    %29 = arith.select %27, %23, %28 : vector<32x128xi1>, vector<32x128xf32>
    %30 = vector.extract_strided_slice %3 {offsets = [31, 0], sizes = [1, 128], strides = [1, 1]} : vector<32x128xf32> to vector<1x128xf32>
    %31 = vector.extract_strided_slice %3 {offsets = [0, 0], sizes = [31, 128], strides = [1, 1]} : vector<32x128xf32> to vector<31x128xf32>
    %32 = tpu.concatenate %30, %31 in 0 : vector<1x128xf32>, vector<31x128xf32> -> vector<32x128xf32>
    %c1_i32_6 = arith.constant 1 : i32
    %33 = vector.broadcast %c1_i32_6 : i32 to vector<32x1xi32>
    %34 = arith.cmpi sge, %20, %33 : vector<32x1xi32>
    %cst_7 = arith.constant 0.000000e+00 : f32
    %35 = vector.shape_cast %34 : vector<32x1xi1> to vector<32x1xi1>
    %36 = vector.broadcast %35 : vector<32x1xi1> to vector<32x128xi1>
    %37 = vector.broadcast %cst_7 : f32 to vector<32x128xf32>
    %38 = arith.select %36, %32, %37 : vector<32x128xi1>, vector<32x128xf32>
    %39 = tpu.concatenate %29, %38, %3 in 1 : vector<32x128xf32>, vector<32x128xf32>, vector<32x128xf32> -> vector<32x384xf32>
    %c0_8 = arith.constant 0 : index
    %c0_9 = arith.constant 0 : index
    %40 = vector.load %arg2[%c0_8, %c0_9] : memref<384x128xf32, #tpu.memory_space<vmem>>, vector<384x128xf32>
    %cst_10 = arith.constant dense<0.000000e+00> : vector<32x128xf32>
    %41 = tpu.matmul %39, %40, %cst_10 {dimension_numbers = #tpu.dot_dimension_numbers<[1], [0], [0], [1], [0, 0, 1, 1], [], []>} : vector<32x384xf32>, vector<384x128xf32>, vector<32x128xf32> -> vector<32x128xf32>
    %c0_11 = arith.constant 0 : index
    %c0_12 = arith.constant 0 : index
    %42 = vector.load %arg3[%c0_11, %c0_12] : memref<1x128xf32, #tpu.memory_space<vmem>>, vector<1x128xf32>
    %43 = vector.broadcast %42 : vector<1x128xf32> to vector<32x128xf32>
    %44 = arith.addf %41, %43 : vector<32x128xf32>
    %cst_13 = arith.constant 0.000000e+00 : f32
    %45 = vector.broadcast %cst_13 : f32 to vector<32x128xf32>
    %46 = arith.maximumf %44, %45 : vector<32x128xf32>
    %c0_14 = arith.constant 0 : index
    %c0_15 = arith.constant 0 : index
    %47 = vector.load %arg4[%c0_14, %c0_15] : memref<1x128xf32, #tpu.memory_space<vmem>>, vector<1x128xf32>
    %48 = vector.broadcast %47 : vector<1x128xf32> to vector<32x128xf32>
    %49 = arith.mulf %46, %48 : vector<32x128xf32>
    %c0_16 = arith.constant 0 : index
    %c0_17 = arith.constant 0 : index
    %50 = vector.load %arg5[%c0_16, %c0_17] : memref<1x128xf32, #tpu.memory_space<vmem>>, vector<1x128xf32>
    %51 = vector.broadcast %50 : vector<1x128xf32> to vector<32x128xf32>
    %52 = arith.addf %49, %51 : vector<32x128xf32>
    %53 = vector.extract_strided_slice %52 {offsets = [30, 0], sizes = [2, 128], strides = [1, 1]} : vector<32x128xf32> to vector<2x128xf32>
    %54 = vector.extract_strided_slice %52 {offsets = [0, 0], sizes = [30, 128], strides = [1, 1]} : vector<32x128xf32> to vector<30x128xf32>
    %55 = tpu.concatenate %53, %54 in 0 : vector<2x128xf32>, vector<30x128xf32> -> vector<32x128xf32>
    %c2_i32_18 = arith.constant 2 : i32
    %56 = vector.broadcast %c2_i32_18 : i32 to vector<32x1xi32>
    %57 = arith.cmpi sge, %20, %56 : vector<32x1xi32>
    %cst_19 = arith.constant 0.000000e+00 : f32
    %58 = vector.shape_cast %57 : vector<32x1xi1> to vector<32x1xi1>
    %59 = vector.broadcast %58 : vector<32x1xi1> to vector<32x128xi1>
    %60 = vector.broadcast %cst_19 : f32 to vector<32x128xf32>
    %61 = arith.select %59, %55, %60 : vector<32x128xi1>, vector<32x128xf32>
    %62 = vector.extract_strided_slice %52 {offsets = [31, 0], sizes = [1, 128], strides = [1, 1]} : vector<32x128xf32> to vector<1x128xf32>
    %63 = vector.extract_strided_slice %52 {offsets = [0, 0], sizes = [31, 128], strides = [1, 1]} : vector<32x128xf32> to vector<31x128xf32>
    %64 = tpu.concatenate %62, %63 in 0 : vector<1x128xf32>, vector<31x128xf32> -> vector<32x128xf32>
    %c1_i32_20 = arith.constant 1 : i32
    %65 = vector.broadcast %c1_i32_20 : i32 to vector<32x1xi32>
    %66 = arith.cmpi sge, %20, %65 : vector<32x1xi32>
    %cst_21 = arith.constant 0.000000e+00 : f32
    %67 = vector.shape_cast %66 : vector<32x1xi1> to vector<32x1xi1>
    %68 = vector.broadcast %67 : vector<32x1xi1> to vector<32x128xi1>
    %69 = vector.broadcast %cst_21 : f32 to vector<32x128xf32>
    %70 = arith.select %68, %64, %69 : vector<32x128xi1>, vector<32x128xf32>
    %71 = tpu.concatenate %61, %70, %52 in 1 : vector<32x128xf32>, vector<32x128xf32>, vector<32x128xf32> -> vector<32x384xf32>
    %c0_22 = arith.constant 0 : index
    %c0_23 = arith.constant 0 : index
    %72 = vector.load %arg6[%c0_22, %c0_23] : memref<384x128xf32, #tpu.memory_space<vmem>>, vector<384x128xf32>
    %cst_24 = arith.constant dense<0.000000e+00> : vector<32x128xf32>
    %73 = tpu.matmul %71, %72, %cst_24 {dimension_numbers = #tpu.dot_dimension_numbers<[1], [0], [0], [1], [0, 0, 1, 1], [], []>} : vector<32x384xf32>, vector<384x128xf32>, vector<32x128xf32> -> vector<32x128xf32>
    %c0_25 = arith.constant 0 : index
    %c0_26 = arith.constant 0 : index
    %74 = vector.load %arg7[%c0_25, %c0_26] : memref<1x128xf32, #tpu.memory_space<vmem>>, vector<1x128xf32>
    %75 = vector.broadcast %74 : vector<1x128xf32> to vector<32x128xf32>
    %76 = arith.addf %73, %75 : vector<32x128xf32>
    %cst_27 = arith.constant 0.000000e+00 : f32
    %77 = vector.broadcast %cst_27 : f32 to vector<32x128xf32>
    %78 = arith.maximumf %76, %77 : vector<32x128xf32>
    %c0_28 = arith.constant 0 : index
    %c0_29 = arith.constant 0 : index
    %79 = vector.load %arg8[%c0_28, %c0_29] : memref<1x128xf32, #tpu.memory_space<vmem>>, vector<1x128xf32>
    %80 = vector.broadcast %79 : vector<1x128xf32> to vector<32x128xf32>
    %81 = arith.mulf %78, %80 : vector<32x128xf32>
    %c0_30 = arith.constant 0 : index
    %c0_31 = arith.constant 0 : index
    %82 = vector.load %arg9[%c0_30, %c0_31] : memref<1x128xf32, #tpu.memory_space<vmem>>, vector<1x128xf32>
    %83 = vector.broadcast %82 : vector<1x128xf32> to vector<32x128xf32>
    %84 = arith.addf %81, %83 : vector<32x128xf32>
    %c0_32 = arith.constant 0 : index
    %c0_33 = arith.constant 0 : index
    %85 = vector.load %arg10[%c0_32, %c0_33] : memref<128x128xf32, #tpu.memory_space<vmem>>, vector<128x128xf32>
    %cst_34 = arith.constant dense<0.000000e+00> : vector<32x128xf32>
    %86 = tpu.matmul %3, %85, %cst_34 {dimension_numbers = #tpu.dot_dimension_numbers<[1], [0], [0], [1], [0, 0, 1, 1], [], []>} : vector<32x128xf32>, vector<128x128xf32>, vector<32x128xf32> -> vector<32x128xf32>
    %c0_35 = arith.constant 0 : index
    %c0_36 = arith.constant 0 : index
    %87 = vector.load %arg11[%c0_35, %c0_36] : memref<1x128xf32, #tpu.memory_space<vmem>>, vector<1x128xf32>
    %88 = vector.broadcast %87 : vector<1x128xf32> to vector<32x128xf32>
    %89 = arith.addf %86, %88 : vector<32x128xf32>
    %90 = arith.addf %84, %89 : vector<32x128xf32>
    %cst_37 = arith.constant 0.000000e+00 : f32
    %91 = vector.broadcast %cst_37 : f32 to vector<32x128xf32>
    %92 = arith.maximumf %90, %91 : vector<32x128xf32>
    %93 = vector.extract_strided_slice %92 {offsets = [28, 0], sizes = [4, 128], strides = [1, 1]} : vector<32x128xf32> to vector<4x128xf32>
    %94 = vector.extract_strided_slice %92 {offsets = [0, 0], sizes = [28, 128], strides = [1, 1]} : vector<32x128xf32> to vector<28x128xf32>
    %95 = tpu.concatenate %93, %94 in 0 : vector<4x128xf32>, vector<28x128xf32> -> vector<32x128xf32>
    %c4_i32 = arith.constant 4 : i32
    %96 = vector.broadcast %c4_i32 : i32 to vector<32x1xi32>
    %97 = arith.cmpi sge, %20, %96 : vector<32x1xi32>
    %cst_38 = arith.constant 0.000000e+00 : f32
    %98 = vector.shape_cast %97 : vector<32x1xi1> to vector<32x1xi1>
    %99 = vector.broadcast %98 : vector<32x1xi1> to vector<32x128xi1>
    %100 = vector.broadcast %cst_38 : f32 to vector<32x128xf32>
    %101 = arith.select %99, %95, %100 : vector<32x128xi1>, vector<32x128xf32>
    %102 = vector.extract_strided_slice %92 {offsets = [30, 0], sizes = [2, 128], strides = [1, 1]} : vector<32x128xf32> to vector<2x128xf32>
    %103 = vector.extract_strided_slice %92 {offsets = [0, 0], sizes = [30, 128], strides = [1, 1]} : vector<32x128xf32> to vector<30x128xf32>
    %104 = tpu.concatenate %102, %103 in 0 : vector<2x128xf32>, vector<30x128xf32> -> vector<32x128xf32>
    %c2_i32_39 = arith.constant 2 : i32
    %105 = vector.broadcast %c2_i32_39 : i32 to vector<32x1xi32>
    %106 = arith.cmpi sge, %20, %105 : vector<32x1xi32>
    %cst_40 = arith.constant 0.000000e+00 : f32
    %107 = vector.shape_cast %106 : vector<32x1xi1> to vector<32x1xi1>
    %108 = vector.broadcast %107 : vector<32x1xi1> to vector<32x128xi1>
    %109 = vector.broadcast %cst_40 : f32 to vector<32x128xf32>
    %110 = arith.select %108, %104, %109 : vector<32x128xi1>, vector<32x128xf32>
    %111 = tpu.concatenate %101, %110, %92 in 1 : vector<32x128xf32>, vector<32x128xf32>, vector<32x128xf32> -> vector<32x384xf32>
    %c0_41 = arith.constant 0 : index
    %c0_42 = arith.constant 0 : index
    %112 = vector.load %arg12[%c0_41, %c0_42] : memref<384x128xf32, #tpu.memory_space<vmem>>, vector<384x128xf32>
    %cst_43 = arith.constant dense<0.000000e+00> : vector<32x128xf32>
    %113 = tpu.matmul %111, %112, %cst_43 {dimension_numbers = #tpu.dot_dimension_numbers<[1], [0], [0], [1], [0, 0, 1, 1], [], []>} : vector<32x384xf32>, vector<384x128xf32>, vector<32x128xf32> -> vector<32x128xf32>
    %c0_44 = arith.constant 0 : index
    %c0_45 = arith.constant 0 : index
    %114 = vector.load %arg13[%c0_44, %c0_45] : memref<1x128xf32, #tpu.memory_space<vmem>>, vector<1x128xf32>
    %115 = vector.broadcast %114 : vector<1x128xf32> to vector<32x128xf32>
    %116 = arith.addf %113, %115 : vector<32x128xf32>
    %cst_46 = arith.constant 0.000000e+00 : f32
    %117 = vector.broadcast %cst_46 : f32 to vector<32x128xf32>
    %118 = arith.maximumf %116, %117 : vector<32x128xf32>
    %c0_47 = arith.constant 0 : index
    %c0_48 = arith.constant 0 : index
    %119 = vector.load %arg14[%c0_47, %c0_48] : memref<1x128xf32, #tpu.memory_space<vmem>>, vector<1x128xf32>
    %120 = vector.broadcast %119 : vector<1x128xf32> to vector<32x128xf32>
    %121 = arith.mulf %118, %120 : vector<32x128xf32>
    %c0_49 = arith.constant 0 : index
    %c0_50 = arith.constant 0 : index
    %122 = vector.load %arg15[%c0_49, %c0_50] : memref<1x128xf32, #tpu.memory_space<vmem>>, vector<1x128xf32>
    %123 = vector.broadcast %122 : vector<1x128xf32> to vector<32x128xf32>
    %124 = arith.addf %121, %123 : vector<32x128xf32>
    %125 = vector.extract_strided_slice %124 {offsets = [28, 0], sizes = [4, 128], strides = [1, 1]} : vector<32x128xf32> to vector<4x128xf32>
    %126 = vector.extract_strided_slice %124 {offsets = [0, 0], sizes = [28, 128], strides = [1, 1]} : vector<32x128xf32> to vector<28x128xf32>
    %127 = tpu.concatenate %125, %126 in 0 : vector<4x128xf32>, vector<28x128xf32> -> vector<32x128xf32>
    %c4_i32_51 = arith.constant 4 : i32
    %128 = vector.broadcast %c4_i32_51 : i32 to vector<32x1xi32>
    %129 = arith.cmpi sge, %20, %128 : vector<32x1xi32>
    %cst_52 = arith.constant 0.000000e+00 : f32
    %130 = vector.shape_cast %129 : vector<32x1xi1> to vector<32x1xi1>
    %131 = vector.broadcast %130 : vector<32x1xi1> to vector<32x128xi1>
    %132 = vector.broadcast %cst_52 : f32 to vector<32x128xf32>
    %133 = arith.select %131, %127, %132 : vector<32x128xi1>, vector<32x128xf32>
    %134 = vector.extract_strided_slice %124 {offsets = [30, 0], sizes = [2, 128], strides = [1, 1]} : vector<32x128xf32> to vector<2x128xf32>
    %135 = vector.extract_strided_slice %124 {offsets = [0, 0], sizes = [30, 128], strides = [1, 1]} : vector<32x128xf32> to vector<30x128xf32>
    %136 = tpu.concatenate %134, %135 in 0 : vector<2x128xf32>, vector<30x128xf32> -> vector<32x128xf32>
    %c2_i32_53 = arith.constant 2 : i32
    %137 = vector.broadcast %c2_i32_53 : i32 to vector<32x1xi32>
    %138 = arith.cmpi sge, %20, %137 : vector<32x1xi32>
    %cst_54 = arith.constant 0.000000e+00 : f32
    %139 = vector.shape_cast %138 : vector<32x1xi1> to vector<32x1xi1>
    %140 = vector.broadcast %139 : vector<32x1xi1> to vector<32x128xi1>
    %141 = vector.broadcast %cst_54 : f32 to vector<32x128xf32>
    %142 = arith.select %140, %136, %141 : vector<32x128xi1>, vector<32x128xf32>
    %143 = tpu.concatenate %133, %142, %124 in 1 : vector<32x128xf32>, vector<32x128xf32>, vector<32x128xf32> -> vector<32x384xf32>
    %c0_55 = arith.constant 0 : index
    %c0_56 = arith.constant 0 : index
    %144 = vector.load %arg16[%c0_55, %c0_56] : memref<384x128xf32, #tpu.memory_space<vmem>>, vector<384x128xf32>
    %cst_57 = arith.constant dense<0.000000e+00> : vector<32x128xf32>
    %145 = tpu.matmul %143, %144, %cst_57 {dimension_numbers = #tpu.dot_dimension_numbers<[1], [0], [0], [1], [0, 0, 1, 1], [], []>} : vector<32x384xf32>, vector<384x128xf32>, vector<32x128xf32> -> vector<32x128xf32>
    %c0_58 = arith.constant 0 : index
    %c0_59 = arith.constant 0 : index
    %146 = vector.load %arg17[%c0_58, %c0_59] : memref<1x128xf32, #tpu.memory_space<vmem>>, vector<1x128xf32>
    %147 = vector.broadcast %146 : vector<1x128xf32> to vector<32x128xf32>
    %148 = arith.addf %145, %147 : vector<32x128xf32>
    %cst_60 = arith.constant 0.000000e+00 : f32
    %149 = vector.broadcast %cst_60 : f32 to vector<32x128xf32>
    %150 = arith.maximumf %148, %149 : vector<32x128xf32>
    %c0_61 = arith.constant 0 : index
    %c0_62 = arith.constant 0 : index
    %151 = vector.load %arg18[%c0_61, %c0_62] : memref<1x128xf32, #tpu.memory_space<vmem>>, vector<1x128xf32>
    %152 = vector.broadcast %151 : vector<1x128xf32> to vector<32x128xf32>
    %153 = arith.mulf %150, %152 : vector<32x128xf32>
    %c0_63 = arith.constant 0 : index
    %c0_64 = arith.constant 0 : index
    %154 = vector.load %arg19[%c0_63, %c0_64] : memref<1x128xf32, #tpu.memory_space<vmem>>, vector<1x128xf32>
    %155 = vector.broadcast %154 : vector<1x128xf32> to vector<32x128xf32>
    %156 = arith.addf %153, %155 : vector<32x128xf32>
    %157 = arith.addf %156, %92 : vector<32x128xf32>
    %cst_65 = arith.constant 0.000000e+00 : f32
    %158 = vector.broadcast %cst_65 : f32 to vector<32x128xf32>
    %159 = arith.maximumf %157, %158 : vector<32x128xf32>
    %c0_66 = arith.constant 0 : index
    %c0_67 = arith.constant 0 : index
    %160 = vector.load %arg20[%c0_66, %c0_67] : memref<128x128xf32, #tpu.memory_space<vmem>>, vector<128x128xf32>
    %cst_68 = arith.constant dense<0.000000e+00> : vector<32x128xf32>
    %161 = tpu.matmul %159, %160, %cst_68 {dimension_numbers = #tpu.dot_dimension_numbers<[1], [0], [0], [1], [0, 0, 1, 1], [], []>} : vector<32x128xf32>, vector<128x128xf32>, vector<32x128xf32> -> vector<32x128xf32>
    %c0_69 = arith.constant 0 : index
    %c0_70 = arith.constant 0 : index
    %162 = vector.load %arg21[%c0_69, %c0_70] : memref<1x128xf32, #tpu.memory_space<vmem>>, vector<1x128xf32>
    %163 = vector.broadcast %162 : vector<1x128xf32> to vector<32x128xf32>
    %164 = arith.addf %161, %163 : vector<32x128xf32>
    %165 = vector.shape_cast %164 : vector<32x128xf32> to vector<2x16x128xf32>
    %c0_71 = arith.constant 0 : index
    %c0_72 = arith.constant 0 : index
    %c0_73 = arith.constant 0 : index
    %166 = vector.load %arg22[%c0_71, %c0_72, %c0_73] : memref<2x16x128xf32, #tpu.memory_space<vmem>>, vector<2x16x128xf32>
    tpu.vector_store %arg22[%c0_71, %c0_72, %c0_73], %165 {strides = array<i32>} : memref<2x16x128xf32, #tpu.memory_space<vmem>>, vector<2x16x128xf32>,
    return
  }
  func.func @transform_0(%arg0: i32) -> (i32, i32, i32) {
    %c0_i32 = arith.constant 0 : i32
    %c0_i32_0 = arith.constant 0 : i32
    %c0_i32_1 = arith.constant 0 : i32
    return %arg0, %c0_i32, %c0_i32_0 : i32, i32, i32
  }
  func.func @transform_1(%arg0: i32) -> (i32, i32) {
    %c0_i32 = arith.constant 0 : i32
    %c0_i32_0 = arith.constant 0 : i32
    %c0_i32_1 = arith.constant 0 : i32
    return %c0_i32, %c0_i32_0 : i32, i32
  }
  func.func @transform_2(%arg0: i32) -> (i32, i32) {
    %c0_i32 = arith.constant 0 : i32
    %c0_i32_0 = arith.constant 0 : i32
    %c0_i32_1 = arith.constant 0 : i32
    return %c0_i32, %c0_i32_0 : i32, i32
  }
  func.func @transform_3(%arg0: i32) -> (i32, i32) {
    %c0_i32 = arith.constant 0 : i32
    %c0_i32_0 = arith.constant 0 : i32
    %c0_i32_1 = arith.constant 0 : i32
    return %c0_i32, %c0_i32_0 : i32, i32
  }
  func.func @transform_4(%arg0: i32) -> (i32, i32) {
    %c0_i32 = arith.constant 0 : i32
    %c0_i32_0 = arith.constant 0 : i32
    %c0_i32_1 = arith.constant 0 : i32
    return %c0_i32, %c0_i32_0 : i32, i32
  }
  func.func @transform_5(%arg0: i32) -> (i32, i32) {
    %c0_i32 = arith.constant 0 : i32
    %c0_i32_0 = arith.constant 0 : i32
    %c0_i32_1 = arith.constant 0 : i32
    return %c0_i32, %c0_i32_0 : i32, i32
  }
  func.func @transform_6(%arg0: i32) -> (i32, i32) {
    %c0_i32 = arith.constant 0 : i32
    %c0_i32_0 = arith.constant 0 : i32
    %c0_i32_1 = arith.constant 0 : i32
    return %c0_i32, %c0_i32_0 : i32, i32
  }
  func.func @transform_7(%arg0: i32) -> (i32, i32) {
    %c0_i32 = arith.constant 0 : i32
    %c0_i32_0 = arith.constant 0 : i32
    %c0_i32_1 = arith.constant 0 : i32
    return %c0_i32, %c0_i32_0 : i32, i32
  }
  func.func @transform_8(%arg0: i32) -> (i32, i32) {
    %c0_i32 = arith.constant 0 : i32
    %c0_i32_0 = arith.constant 0 : i32
    %c0_i32_1 = arith.constant 0 : i32
    return %c0_i32, %c0_i32_0 : i32, i32
  }
  func.func @transform_9(%arg0: i32) -> (i32, i32) {
    %c0_i32 = arith.constant 0 : i32
    %c0_i32_0 = arith.constant 0 : i32
    %c0_i32_1 = arith.constant 0 : i32
    return %c0_i32, %c0_i32_0 : i32, i32
  }
  func.func @transform_10(%arg0: i32) -> (i32, i32) {
    %c0_i32 = arith.constant 0 : i32
    %c0_i32_0 = arith.constant 0 : i32
    %c0_i32_1 = arith.constant 0 : i32
    return %c0_i32, %c0_i32_0 : i32, i32
  }
  func.func @transform_11(%arg0: i32) -> (i32, i32) {
    %c0_i32 = arith.constant 0 : i32
    %c0_i32_0 = arith.constant 0 : i32
    %c0_i32_1 = arith.constant 0 : i32
    return %c0_i32, %c0_i32_0 : i32, i32
  }
  func.func @transform_12(%arg0: i32) -> (i32, i32) {
    %c0_i32 = arith.constant 0 : i32
    %c0_i32_0 = arith.constant 0 : i32
    %c0_i32_1 = arith.constant 0 : i32
    return %c0_i32, %c0_i32_0 : i32, i32
  }
  func.func @transform_13(%arg0: i32) -> (i32, i32) {
    %c0_i32 = arith.constant 0 : i32
    %c0_i32_0 = arith.constant 0 : i32
    %c0_i32_1 = arith.constant 0 : i32
    return %c0_i32, %c0_i32_0 : i32, i32
  }
  func.func @transform_14(%arg0: i32) -> (i32, i32) {
    %c0_i32 = arith.constant 0 : i32
    %c0_i32_0 = arith.constant 0 : i32
    %c0_i32_1 = arith.constant 0 : i32
    return %c0_i32, %c0_i32_0 : i32, i32
  }
  func.func @transform_15(%arg0: i32) -> (i32, i32) {
    %c0_i32 = arith.constant 0 : i32
    %c0_i32_0 = arith.constant 0 : i32
    %c0_i32_1 = arith.constant 0 : i32
    return %c0_i32, %c0_i32_0 : i32, i32
  }
  func.func @transform_16(%arg0: i32) -> (i32, i32) {
    %c0_i32 = arith.constant 0 : i32
    %c0_i32_0 = arith.constant 0 : i32
    %c0_i32_1 = arith.constant 0 : i32
    return %c0_i32, %c0_i32_0 : i32, i32
  }
  func.func @transform_17(%arg0: i32) -> (i32, i32) {
    %c0_i32 = arith.constant 0 : i32
    %c0_i32_0 = arith.constant 0 : i32
    %c0_i32_1 = arith.constant 0 : i32
    return %c0_i32, %c0_i32_0 : i32, i32
  }
  func.func @transform_18(%arg0: i32) -> (i32, i32) {
    %c0_i32 = arith.constant 0 : i32
    %c0_i32_0 = arith.constant 0 : i32
    %c0_i32_1 = arith.constant 0 : i32
    return %c0_i32, %c0_i32_0 : i32, i32
  }
  func.func @transform_19(%arg0: i32) -> (i32, i32) {
    %c0_i32 = arith.constant 0 : i32
    %c0_i32_0 = arith.constant 0 : i32
    %c0_i32_1 = arith.constant 0 : i32
    return %c0_i32, %c0_i32_0 : i32, i32
  }
  func.func @transform_20(%arg0: i32) -> (i32, i32) {
    %c0_i32 = arith.constant 0 : i32
    %c0_i32_0 = arith.constant 0 : i32
    %c0_i32_1 = arith.constant 0 : i32
    return %c0_i32, %c0_i32_0 : i32, i32
  }
  func.func @transform_21(%arg0: i32) -> (i32, i32, i32) {
    %c0_i32 = arith.constant 0 : i32
    %c0_i32_0 = arith.constant 0 : i32
    %c0_i32_1 = arith.constant 0 : i32
    return %arg0, %c0_i32, %c0_i32_0 : i32, i32, i32
  }
}

</mosaic_0001>

<bundles_post_ra>
// kernel: tpu_custom_call.1
= control target key start
LH: loop header
LB: loop body
LE: loop exit
PB: predicated region body
PF: predicated region fallthrough
CT: control target
= control target key end

     0   :  { %s1861_s0 = inlined_call_operand.vmem [shape: f32[2,16,8], index: 0, kind: input, shape index: {}]   ;;  %s1862_s1 = inlined_call_operand.hbm [shape: f32[384,128], index: 1, kind: input, shape index: {}]   ;;  %s1863_s2 = inlined_call_operand.vmem [shape: f32[1,128], index: 2, kind: input, shape index: {}]   ;;  %s1864_s3 = inlined_call_operand.vmem [shape: f32[1,128], index: 3, kind: input, shape index: {}]   ;;  %s1865_s4 = inlined_call_operand.vmem [shape: f32[1,128], index: 4, kind: input, shape index: {}]   ;;  %s1866_s5 = inlined_call_operand.hbm [shape: f32[384,128], index: 5, kind: input, shape index: {}]   ;;  %s1867_s6 = inlined_call_operand.vmem [shape: f32[1,128], index: 6, kind: input, shape index: {}]   ;;  %s1868_s7 = inlined_call_operand.vmem [shape: f32[1,128], index: 7, kind: input, shape index: {}]   ;;  %s1869_s8 = inlined_call_operand.vmem [shape: f32[1,128], index: 8, kind: input, shape index: {}]   ;;  %s1870_s9 = inlined_call_operand.hbm [shape: f32[128,128], index: 9, kind: input, shape index: {}]   ;;  %s1871_s10 = inlined_call_operand.vmem [shape: f32[1,128], index: 10, kind: input, shape index: {}]   ;;  %s1872_s11 = inlined_call_operand.hbm [shape: f32[384,128], index: 11, kind: input, shape index: {}]   ;;  %s1873_s12 = inlined_call_operand.vmem [shape: f32[1,128], index: 12, kind: input, shape index: {}]   ;;  %s1874_s13 = inlined_call_operand.vmem [shape: f32[1,128], index: 13, kind: input, shape index: {}]   ;;  %s1875_s14 = inlined_call_operand.vmem [shape: f32[1,128], index: 14, kind: input, shape index: {}]   ;;  %s1876_s15 = inlined_call_operand.hbm [shape: f32[384,128], index: 15, kind: input, shape index: {}]   ;;  %s1877_s16 = inlined_call_operand.vmem [shape: f32[1,128], index: 16, kind: input, shape index: {}]   ;;  %s1878_s17 = inlined_call_operand.vmem [shape: f32[1,128], index: 17, kind: input, shape index: {}]   ;;  %s1879_s18 = inlined_call_operand.vmem [shape: f32[1,128], index: 18, kind: input, shape index: {}]   ;;  %s1880_s19 = inlined_call_operand.hbm [shape: f32[128,128], index: 19, kind: input, shape index: {}]   ;;  %s1881_s20 = inlined_call_operand.vmem [shape: f32[1,128], index: 20, kind: input, shape index: {}]   ;;  %s1882_s21 = inlined_call_operand.hbm [shape: f32[2,16,128], index: 21, kind: output, shape index: {}]  }
   0x1   :  { %1884 = sst [smem:[#allocation19_spill]] %s1861_s0 }
   0x2   :  { %1885 = sst [smem:[#allocation20_spill]] %s1862_s1 }
   0x3   :  { %1886 = sst [smem:[#allocation21_spill]] %s1863_s2 }
   0x4   :  { %1887 = sst [smem:[#allocation22_spill]] %s1864_s3 }
   0x5   :  { %1888 = sst [smem:[#allocation23_spill]] %s1865_s4 }
   0x6   :  { %1889 = sst [smem:[#allocation24_spill]] %s1866_s5 }
   0x7   :  { %26 = vsyncpa [#allocation3], 0 }
   0x8   :  { %27 = vsyncpa [#allocation6], 0 }
   0x9   :  { %28 = vsyncpa [#allocation9], 0 }
   0xa   :  { %29 = vsyncpa [#allocation12], 0 }
   0xb   :  { %30 = vsyncpa [#allocation4], 0  ;;  %s1890_s26 = sld [smem:[#allocation24_spill]]  ;;  %s1393_s3 = smov [#allocation5]  }
   0xc   :  { %s58_s28 = sshll.u32 %s1393_s3, 4  ;;  %s90_s4 = sshll.u32 %s1872_s11, 4  ;;  %s59_s28 = int_to_ptr.vmem [resolvable:$true] %s58_s28  ;;  %s91_s4 = int_to_ptr.hbm [resolvable:$true] %s90_s4 }
   0xd   :  { %s1394_s30 = smov 128   ;;  %s1395_s5 = smov 8  }
   0xe   :  { %s1396_s22 = smov [#allocation8]   ;;  %s1891_s2 = sld [smem:[#allocation20_spill]] }
   0xf   :  { %s92_s23 = sshll.u32 %s1396_s22, 4  ;;  %s75_s3 = sshll.u32 %s1870_s9, 4  ;;  %s93_s23 = int_to_ptr.vmem [resolvable:$true] %s92_s23  ;;  %s76_s3 = int_to_ptr.hbm [resolvable:$true] %s75_s3 }
  0x10   :  { %98 = dma.hbm_to_vmem [thread:$0]  %s91_s4, 6144, %s93_s23, [#allocation9], %s1394_s30, %s1394_s30, %s1395_s5  }
  0x11   :  { %s56_s27 = sshll.u32 %s1890_s26, 4  ;;  %s1397_s29 = smov [#allocation2]   ;;  %s57_s27 = int_to_ptr.hbm [resolvable:$true] %s56_s27 }
  0x12   :  { %64 = dma.hbm_to_vmem [thread:$0]  %s57_s27, 6144, %s59_s28, [#allocation6], %s1394_s30, %s1394_s30, %s1395_s5  }
  0x13   :  { %s39_s0 = sshll.u32 %s1397_s29, 4  ;;  %s1398_s27 = smov [#allocation7]   ;;  %s40_s0 = int_to_ptr.vmem [resolvable:$true] %s39_s0 }
  0x14   :  { %s37_s25 = sshll.u32 %s1891_s2, 4  ;;  %s77_s28 = sshll.u32 %s1398_s27, 4  ;;  %s38_s25 = int_to_ptr.hbm [resolvable:$true] %s37_s25  ;;  %s78_s28 = int_to_ptr.vmem [resolvable:$true] %s77_s28 }
  0x15   :  { %45 = dma.hbm_to_vmem [thread:$0]  %s38_s25, 6144, %s40_s0, [#allocation3], %s1394_s30, %s1394_s30, %s1395_s5  }
  0x16   :  { %s109_s24 = sshll.u32 %s1876_s15, 4  ;;  %s128_s23 = sshll.u32 %s1880_s19, 4  ;;  %s110_s24 = int_to_ptr.hbm [resolvable:$true] %s109_s24  ;;  %s129_s23 = int_to_ptr.hbm [resolvable:$true] %s128_s23 }
  0x17   :  { %83 = dma.hbm_to_vmem [thread:$0]  %s76_s3, 2048, %s78_s28, [#allocation6], %s1394_s30, %s1394_s30, %s1395_s5  }
  0x18   :  { %s1399_s2 = smov [#allocation10]   ;;  %s1400_s25 = smov [#allocation11]  }
  0x19   :  { %s111_s11 = sshll.u32 %s1399_s2, 4  ;;  %s130_s15 = sshll.u32 %s1400_s25, 4  ;;  %s112_s11 = int_to_ptr.vmem [resolvable:$true] %s111_s11  ;;  %s131_s15 = int_to_ptr.vmem [resolvable:$true] %s130_s15 }
  0x1a   :  { %117 = dma.hbm_to_vmem [thread:$0]  %s110_s24, 6144, %s112_s11, [#allocation9], %s1394_s30, %s1394_s30, %s1395_s5  }
  0x1b   :  { %136 = dma.hbm_to_vmem [thread:$0]  %s129_s23, 2048, %s131_s15, [#allocation12], %s1394_s30, %s1394_s30, %s1395_s5  }
  0x1c   :  { %1383 = dma.done.wait [#allocation3], 6144  }
  0x1d   :  { %1384 = vsyncadd [#allocation3], 4294961152 }
  0x1e   :  { %1385 = dma.done.wait [#allocation6], 8192  }
  0x1f   :  { %1386 = vsyncadd [#allocation6], 4294959104 }
  0x20   :  { %1387 = dma.done.wait [#allocation9], 12288  }
  0x21   :  { %1388 = vsyncadd [#allocation9], 4294955008 }
  0x22   :  { %1389 = dma.done.wait [#allocation12], 2048  }
  0x23   :  { %1390 = vsyncadd [#allocation12], 4294965248  ;;  %v322_v0 = vld [vmem:[#allocation2 + $0x178] sm:$0xff]  ;;  %v321_v2 = vld [vmem:[#allocation2 + $0x170] sm:$0xff]  ;;  %v172_v27 = vlaneseq  ;;  %s1892_s3 = sld [smem:[#allocation19_spill]]  ;;  %vm167_vm0 = vcmask 64512  }
  0x24   :  { %v290_v1 = vld [vmem:[#allocation2 + $0x78] sm:$0xff]  ;;  %385 = vmatpush.msra.mxu2 %v322_v0  ;;  %v289_v3 = vld [vmem:[#allocation2 + $0x70] sm:$0xff]  ;;  %v320_v5 = vld [vmem:[#allocation2 + $0x168] sm:$0xff]  ;;  %s1893_s4 = sld [smem:[#allocation21_spill]] }
  0x25   :  { %327 = vmatpush.msra.mxu0 %v290_v1  ;;  %v306_v4 = vld [vmem:[#allocation2 + $0xf8] sm:$0xff]  ;;  %v288_v6 = vld [vmem:[#allocation2 + $0x68] sm:$0xff]  ;;  %v305_v7 = vld [vmem:[#allocation2 + $0xf0] sm:$0xff]  ;;  %v1558_v39 = vshrl.u32 %v172_v27, 7  ;;  %s1894_s11 = sld [smem:[#allocation22_spill]] }
  0x26   :  { %356 = vmatpush.msra.mxu1 %v306_v4  ;;  %386 = vmatpush.msra.mxu2 %v321_v2  ;;  %v304_v8 = vld [vmem:[#allocation2 + $0xe8] sm:$0xff]  ;;  %v319_v9 = vld [vmem:[#allocation2 + $0x160] sm:$0xff]  ;;  %v318_v12 = vld [vmem:[#allocation2 + $0x158] sm:$0xff]  ;;  %s1895_s19 = sld [smem:[#allocation23_spill]] }
  0x27   :  { %328 = vmatpush.msra.mxu0 %v289_v3  ;;  %v287_v10 = vld [vmem:[#allocation2 + $0x60] sm:$0xff]  ;;  %v286_v13 = vld [vmem:[#allocation2 + $0x58] sm:$0xff]  ;;  %v317_v15 = vld [vmem:[#allocation2 + $0x150] sm:$0xff]  ;;  %v1567_v49 = vand.u32 15, %v1558_v39  ;;  %vm229_vm1 = vcmp.lt.s32.totalorder %v1558_v39, 2  ;;  %vm254_vm2 = vcmp.lt.s32.totalorder %v1558_v39, 1 }
  0x28   :  { %357 = vmatpush.msra.mxu1 %v305_v7  ;;  %387 = vmatpush.msra.mxu2 %v320_v5  ;;  %v303_v11 = vld [vmem:[#allocation2 + $0xe0] sm:$0xff]  ;;  %v302_v14 = vld [vmem:[#allocation2 + $0xd8] sm:$0xff]  ;;  %v285_v16 = vld [vmem:[#allocation2 + $0x50] sm:$0xff]  ;;  %vm678_vm8 = vcmp.lt.s32.totalorder %v1558_v39, 4 }
  0x29   :  { %329 = vmatpush.msra.mxu0 %v288_v6  ;;  %v301_v17 = vld [vmem:[#allocation2 + $0xd0] sm:$0xff]  ;;  %v316_v18 = vld [vmem:[#allocation2 + $0x148] sm:$0xff]  ;;  %v315_v21 = vld [vmem:[#allocation2 + $0x140] sm:$0xff]  ;;  %vm234_vm3 = vcmp.ge.s32.totalorder %v1567_v49, 2  ;;  %vm259_vm4 = vcmp.ge.s32.totalorder %v1567_v49, 1  ;;  %v175_v6 = vadd.s32 16, %v1558_v39 }
  0x2a   :  { %358 = vmatpush.msra.mxu1 %v304_v8  ;;  %388 = vmatpush.msra.mxu2 %v319_v9  ;;  %v284_v19 = vld [vmem:[#allocation2 + $0x48] sm:$0xff]  ;;  %v283_v22 = vld [vmem:[#allocation2 + $0x40] sm:$0xff]  ;;  %v314_v24 = vld [vmem:[#allocation2 + $0x138] sm:$0xff]  ;;  %vm683_vm7 = vcmp.ge.s32.totalorder %v1567_v49, 4 }
  0x2b   :  { %330 = vmatpush.msra.mxu0 %v287_v10  ;;  %v300_v20 = vld [vmem:[#allocation2 + $0xc8] sm:$0xff]  ;;  %v299_v23 = vld [vmem:[#allocation2 + $0xc0] sm:$0xff]  ;;  %v282_v25 = vld [vmem:[#allocation2 + $0x38] sm:$0xff] }
  0x2c   :  { %359 = vmatpush.msra.mxu1 %v303_v11  ;;  %389 = vmatpush.msra.mxu2 %v318_v12  ;;  %v298_v26 = vld [vmem:[#allocation2 + $0xb8] sm:$0xff]  ;;  %v313_v28 = vld [vmem:[#allocation2 + $0x130] sm:$0xff]  ;;  %v312_v30 = vld [vmem:[#allocation2 + $0x128] sm:$0xff]  ;;  %v1608_v12 = vand.u32 15, %v175_v6 }
  0x2d   :  { %331 = vmatpush.msra.mxu0 %v286_v13  ;;  %v281_v29 = vld [vmem:[#allocation2 + $0x30] sm:$0xff]  ;;  %v280_v31 = vld [vmem:[#allocation2 + $0x28] sm:$0xff]  ;;  %v311_v33 = vld [vmem:[#allocation2 + $0x120] sm:$0xff] }
  0x2e   :  { %360 = vmatpush.msra.mxu1 %v302_v14  ;;  %390 = vmatpush.msra.mxu2 %v317_v15  ;;  %v297_v32 = vld [vmem:[#allocation2 + $0xb0] sm:$0xff]  ;;  %v279_v34 = vld [vmem:[#allocation2 + $0x20] sm:$0xff]  ;;  %v1556_v36 = vld [vmem:[%s1892_s3 + $0x18] sm:$0xff]  ;;  %vm236_vm5 = vcmp.ge.s32.totalorder %v1608_v12, 2  ;;  %vm261_vm6 = vcmp.ge.s32.totalorder %v1608_v12, 1  ;;  %vm685_vm9 = vcmp.ge.s32.totalorder %v1608_v12, 4 }
  0x2f   :  { %332 = vmatpush.msra.mxu0 %v285_v16  ;;  %v1551_v35 = vld [vmem:[%s1892_s3] sm:$0xff]  ;;  %v296_v37 = vld [vmem:[#allocation2 + $0xa8] sm:$0xff]  ;;  %v310_v40 = vld [vmem:[#allocation2 + $0x118] sm:$0xff]  ;;  %v1564_v44 = vsel %vm167_vm0, %v1556_v36, 0.0 }
  0x30   :  { %361 = vmatpush.msra.mxu1 %v301_v17  ;;  %391 = vmatpush.msra.mxu2 %v316_v18  ;;  %v295_v38 = vld [vmem:[#allocation2 + $0xa0] sm:$0xff]  ;;  %v278_v41 = vld [vmem:[#allocation2 + $0x18] sm:$0xff]  ;;  %v168_v43 = vsel %vm167_vm0, %v1551_v35, 0.0  ;;  %v309_v45 = vld [vmem:[#allocation2 + $0x110] sm:$0xff]  ;;  %v228_v50 = vrot.slane %v1564_v44, 6  ;;  %v253_v55 = vrot.slane %v1564_v44, 7 }
  0x31   :  { %333 = vmatpush.msra.mxu0 %v284_v19  ;;  %v294_v42 = vld [vmem:[#allocation2 + $0x98] sm:$0xff]  ;;  %v277_v46 = vld [vmem:[#allocation2 + $0x10] sm:$0xff]  ;;  %v225_v48 = vrot.slane %v168_v43, 6  ;;  %v308_v51 = vld [vmem:[#allocation2 + $0x108] sm:$0xff]  ;;  %v250_v53 = vrot.slane %v168_v43, 7 }
  0x32   :  { %362 = vmatpush.msra.mxu1 %v300_v20  ;;  %392 = vmatpush.msra.mxu2 %v315_v21  ;;  %v293_v47 = vld [vmem:[#allocation2 + $0x90] sm:$0xff]  ;;  %v276_v52 = vld [vmem:[#allocation2 + $0x8] sm:$0xff]  ;;  %v307_v57 = vld [vmem:[#allocation2 + $0x100] sm:$0xff] }
  0x33   :  { %334 = vmatpush.msra.mxu0 %v283_v22  ;;  %v292_v54 = vld [vmem:[#allocation2 + $0x88] sm:$0xff]  ;;  %v275_v58 = vld [vmem:[#allocation2] sm:$0xff]  ;;  %v233_v59 = vsel %vm229_vm1, %v228_v50, %v225_v48  ;;  %v258_v62 = vsel %vm254_vm2, %v253_v55, %v250_v53  ;;  %v505_v63 = vld [vmem:[#allocation5 + $0x178] sm:$0xff] }
  0x34   :  { %363 = vmatpush.msra.mxu1 %v299_v23  ;;  %393 = vmatpush.msra.mxu2 %v314_v24  ;;  %v1575_v56 = vld [vmem:[%s1892_s3 + $0x8] sm:$0xff]  ;;  %v291_v60 = vld [vmem:[#allocation2 + $0x80] sm:$0xff]  ;;  %v504_v1 = vld [vmem:[#allocation5 + $0x170] sm:$0xff] }
  0x35   :  { %335 = vmatpush.msra.mxu0 %v282_v25  ;;  %v169_v61 = vsel %vm167_vm0, %v1575_v56, 0.0  ;;  %v1597_v3 = vld [vmem:[%s1892_s3 + $0x10] sm:$0xff]  ;;  %v503_v4 = vld [vmem:[#allocation5 + $0x168] sm:$0xff]  ;;  %v502_v8 = vld [vmem:[#allocation5 + $0x160] sm:$0xff] }
  0x36   :  { %364 = vmatpush.msra.mxu1 %v298_v26  ;;  %394 = vmatpush.msra.mxu2 %v313_v28  ;;  %v226_v0 = vrot.slane %v169_v61, 6  ;;  %v251_v2 = vrot.slane %v169_v61, 7  ;;  %v170_v7 = vsel %vm167_vm0, %v1597_v3, 0.0  ;;  %v501_v10 = vld [vmem:[#allocation5 + $0x158] sm:$0xff]  ;;  %v500_v13 = vld [vmem:[#allocation5 + $0x150] sm:$0xff]  ;;  %v499_v15 = vld [vmem:[#allocation5 + $0x148] sm:$0xff] }
  0x37   :  { %336 = vmatpush.msra.mxu0 %v281_v29  ;;  %v227_v11 = vrot.slane %v170_v7, 6  ;;  %v252_v14 = vrot.slane %v170_v7, 7  ;;  %v498_v17 = vld [vmem:[#allocation5 + $0x140] sm:$0xff]  ;;  %v497_v19 = vld [vmem:[#allocation5 + $0x138] sm:$0xff]  ;;  %v496_v22 = vld [vmem:[#allocation5 + $0x130] sm:$0xff] }
  0x38   :  { %365 = vmatpush.msra.mxu1 %v297_v32  ;;  %395 = vmatpush.msra.mxu2 %v312_v30  ;;  %v232_v5 = vsel %vm229_vm1, %v225_v48, %v226_v0  ;;  %v257_v9 = vsel %vm254_vm2, %v250_v53, %v251_v2  ;;  %v495_v23 = vld [vmem:[#allocation5 + $0x128] sm:$0xff]  ;;  %v494_v24 = vld [vmem:[#allocation5 + $0x120] sm:$0xff]  ;;  %v493_v25 = vld [vmem:[#allocation5 + $0x118] sm:$0xff] }
  0x39   :  { %337 = vmatpush.msra.mxu0 %v280_v31  ;;  %v231_v16 = vsel %vm229_vm1, %v226_v0, %v227_v11  ;;  %v256_v18 = vsel %vm254_vm2, %v251_v2, %v252_v14  ;;  %v230_v20 = vsel %vm229_vm1, %v227_v11, %v228_v50  ;;  %v255_v21 = vsel %vm254_vm2, %v252_v14, %v253_v55  ;;  %v492_v26 = vld [vmem:[#allocation5 + $0x110] sm:$0xff]  ;;  %v473_v27 = vld [vmem:[#allocation5 + $0x78] sm:$0xff]  ;;  %v491_v29 = vld [vmem:[#allocation5 + $0x108] sm:$0xff] }
  0x3a   :  { %366 = vmatpush.msra.mxu1 %v296_v37  ;;  %396 = vmatpush.msra.mxu2 %v311_v33  ;;  %v489_v28 = vld [vmem:[#allocation5 + $0xf8] sm:$0xff]  ;;  %v472_v30 = vld [vmem:[#allocation5 + $0x70] sm:$0xff]  ;;  %v490_v32 = vld [vmem:[#allocation5 + $0x100] sm:$0xff] }
  0x3b   :  { %338 = vmatpush.msra.mxu0 %v279_v34  ;;  %510 = vmatpush.msra.mxu3 %v473_v27  ;;  %v488_v31 = vld [vmem:[#allocation5 + $0xf0] sm:$0xff]  ;;  %v471_v33 = vld [vmem:[#allocation5 + $0x68] sm:$0xff]  ;;  %v470_v37 = vld [vmem:[#allocation5 + $0x60] sm:$0xff] }
  0x3c   :  { %367 = vmatpush.msra.mxu1 %v295_v38  ;;  %397 = vmatpush.msra.mxu2 %v310_v40  ;;  %v487_v34 = vld [vmem:[#allocation5 + $0xe8] sm:$0xff]  ;;  %v486_v38 = vld [vmem:[#allocation5 + $0xe0] sm:$0xff]  ;;  %v469_v40 = vld [vmem:[#allocation5 + $0x58] sm:$0xff] }
  0x3d   :  { %339 = vmatpush.msra.mxu0 %v278_v41  ;;  %511 = vmatpush.msra.mxu3 %v472_v30  ;;  %v485_v41 = vld [vmem:[#allocation5 + $0xd8] sm:$0xff]  ;;  %v468_v43 = vld [vmem:[#allocation5 + $0x50] sm:$0xff]  ;;  %v630_v48 = vld [vmem:[#allocation7 + $0x68] sm:$0xff] }
  0x3e   :  { %368 = vmatpush.msra.mxu1 %v294_v42  ;;  %398 = vmatpush.msra.mxu2 %v309_v45  ;;  %v632_v42 = vld [vmem:[#allocation7 + $0x78] sm:$0xff]  ;;  %v484_v44 = vld [vmem:[#allocation5 + $0xd0] sm:$0xff]  ;;  %v466_v50 = vld [vmem:[#allocation5 + $0x40] sm:$0xff] }
  0x3f   :  { %340 = vmatpush.msra.mxu0 %v277_v46  ;;  %512 = vmatpush.msra.mxu3 %v471_v33  ;;  %v631_v45 = vld [vmem:[#allocation7 + $0x70] sm:$0xff]  ;;  %v467_v46 = vld [vmem:[#allocation5 + $0x48] sm:$0xff]  ;;  %v465_v53 = vld [vmem:[#allocation5 + $0x38] sm:$0xff] }
  0x40   :  { %369 = vmatpush.msra.mxu1 %v293_v47  ;;  %399 = vmatpush.msra.mxu2 %v308_v51  ;;  %v483_v47 = vld [vmem:[#allocation5 + $0xc8] sm:$0xff]  ;;  %v482_v51 = vld [vmem:[#allocation5 + $0xc0] sm:$0xff]  ;;  %v628_v55 = vld [vmem:[#allocation7 + $0x58] sm:$0xff] }
  0x41   :  { %341 = vmatpush.msra.mxu0 %v276_v52  ;;  %513 = vmatpush.msra.mxu3 %v470_v37  ;;  %v629_v52 = vld [vmem:[#allocation7 + $0x60] sm:$0xff]  ;;  %v463_v61 = vld [vmem:[#allocation5 + $0x28] sm:$0xff]  ;;  %v461_v7 = vld [vmem:[#allocation5 + $0x18] sm:$0xff] }
  0x42   :  { %370 = vmatpush.msra.mxu1 %v292_v54  ;;  %400 = vmatpush.msra.mxu2 %v307_v57  ;;  %v481_v54 = vld [vmem:[#allocation5 + $0xb8] sm:$0xff]  ;;  %v464_v57 = vld [vmem:[#allocation5 + $0x30] sm:$0xff]  ;;  %v626_v0 = vld [vmem:[#allocation7 + $0x48] sm:$0xff] }
  0x43   :  { %342 = vmatpush.msra.mxu0 %v275_v58  ;;  %1140 = vmatmul.msk.f32.vlgmr.msra.gmra.mxu2 %vm167_vm0, %v1551_v35  ;;  %v480_v58 = vld [vmem:[#allocation5 + $0xb0] sm:$0xff]  ;;  %v478_v2 = vld [vmem:[#allocation5 + $0xa0] sm:$0xff]  ;;  %v618_v37 = vld [vmem:[#allocation7 + $0x8] sm:$0xff] }
  0x44   :  { %1136 = vmatmul.msk.f32.vlgmr.msra.gmra.mxu0 %vm234_vm3, %v233_v59  ;;  %371 = vmatpush.msra.mxu1 %v291_v60  ;;  %v1633_v59 = vld [vmem:[%s1893_s4] ss:$0 sm:$0xff]  ;;  %v627_v60 = vld [vmem:[#allocation7 + $0x50] sm:$0xff]  ;;  %v1072_v12 = vld [vmem:[#allocation11 + $0x58] sm:$0xff] }
  0x45   :  { %1138 = vmatmul.msk.f32.vlgmr.msra.gmra.mxu1 %vm259_vm4, %v258_v62  ;;  %539 = vmatpush.msrb.mxu0 %v489_v28  ;;  %v479_v62 = vld [vmem:[#allocation5 + $0xa8] sm:$0xff]  ;;  %v625_v6 = vld [vmem:[#allocation7 + $0x40] sm:$0xff]  ;;  %v460_v11 = vld [vmem:[#allocation5 + $0x10] sm:$0xff] }
  0x46   :  { %568 = vmatpush.msrb.mxu1 %v505_v63  ;;  %514 = vmatpush.msra.mxu3 %v469_v40  ;;  %v623_v14 = vld [vmem:[#allocation7 + $0x30] sm:$0xff]  ;;  %v621_v28 = vld [vmem:[#allocation7 + $0x20] sm:$0xff]  ;;  %v1070_v39 = vld [vmem:[#allocation11 + $0x48] sm:$0xff] }
  0x47   :  { %540 = vmatpush.msrb.mxu0 %v488_v31  ;;  %637 = vmatpush.msrb.mxu2 %v632_v42 }
  0x48   :  { %569 = vmatpush.msrb.mxu1 %v504_v1  ;;  %515 = vmatpush.msra.mxu3 %v468_v43  ;;  %v462_v1 = vld [vmem:[#allocation5 + $0x20] sm:$0xff] }
  0x49   :  { %541 = vmatpush.msrb.mxu0 %v487_v34  ;;  %638 = vmatpush.msrb.mxu2 %v631_v45 }
  0x4a   :  { %570 = vmatpush.msrb.mxu1 %v503_v4  ;;  %516 = vmatpush.msra.mxu3 %v467_v46 }
  0x4b   :  { %1141 = vmatmul.msk.f32.gmra.mxu2 %vm167_vm0, %v1575_v56  ;;  %542 = vmatpush.msrb.mxu0 %v486_v38 }
  0x4c   :  { %346 = vmatmul.f32.gmra.mxu0 %v232_v5  ;;  %571 = vmatpush.msrb.mxu1 %v502_v8  ;;  %v477_v8 = vld [vmem:[#allocation5 + $0x98] sm:$0xff] }
  0x4d   :  { %375 = vmatmul.f32.gmra.mxu1 %v257_v9  ;;  %543 = vmatpush.msrb.mxu0 %v485_v41 }
  0x4e   :  { %572 = vmatpush.msrb.mxu1 %v501_v10  ;;  %639 = vmatpush.msrb.mxu2 %v630_v48  ;;  %v624_v10 = vld [vmem:[#allocation7 + $0x38] sm:$0xff] }
  0x4f   :  { %544 = vmatpush.msrb.mxu0 %v484_v44  ;;  %517 = vmatpush.msra.mxu3 %v466_v50  ;;  %v617_v44 = vld [vmem:[#allocation7] sm:$0xff] }
  0x50   :  { %573 = vmatpush.msrb.mxu1 %v500_v13  ;;  %640 = vmatpush.msrb.mxu2 %v629_v52  ;;  %v476_v13 = vld [vmem:[#allocation5 + $0x90] sm:$0xff] }
  0x51   :  { %545 = vmatpush.msrb.mxu0 %v483_v47  ;;  %518 = vmatpush.msra.mxu3 %v465_v53 }
  0x52   :  { %574 = vmatpush.msrb.mxu1 %v499_v15  ;;  %641 = vmatpush.msrb.mxu2 %v628_v55  ;;  %v459_v15 = vld [vmem:[#allocation5 + $0x8] sm:$0xff] }
  0x53   :  { %1142 = vmatmul.msk.f32.gmra.mxu2 %vm167_vm0, %v1597_v3  ;;  %546 = vmatpush.msrb.mxu0 %v482_v51 }
  0x54   :  { %1137 = vmatmul.msk.f32.gmra.mxu0 %vm236_vm5, %v231_v16  ;;  %575 = vmatpush.msrb.mxu1 %v498_v17  ;;  %v475_v16 = vld [vmem:[#allocation5 + $0x88] sm:$0xff] }
  0x55   :  { %1139 = vmatmul.msk.f32.gmra.mxu1 %vm261_vm6, %v256_v18  ;;  %547 = vmatpush.msrb.mxu0 %v481_v54  ;;  %v1202_v18 = vld [vmem:[%s1894_s11] ss:$0 sm:$0xff] }
  0x56   :  { %576 = vmatpush.msrb.mxu1 %v497_v19  ;;  %519 = vmatpush.msra.mxu3 %v464_v57 }
  0x57   :  { %548 = vmatpush.msrb.mxu0 %v480_v58  ;;  %642 = vmatpush.msrb.mxu2 %v627_v60 }
  0x58   :  { %577 = vmatpush.msrb.mxu1 %v496_v22  ;;  %520 = vmatpush.msra.mxu3 %v463_v61  ;;  %v474_v22 = vld [vmem:[#allocation5 + $0x80] sm:$0xff] }
  0x59   :  { %549 = vmatpush.msrb.mxu0 %v479_v62  ;;  %643 = vmatpush.msrb.mxu2 %v626_v0 }
  0x5a   :  { %578 = vmatpush.msrb.mxu1 %v495_v23  ;;  %521 = vmatpush.msra.mxu3 %v462_v1 }
  0x5b   :  { %1143 = vmatmul.msk.f32.gmra.mxu2 %vm167_vm0, %v1556_v36  ;;  %550 = vmatpush.msrb.mxu0 %v478_v2 }
  0x5c   :  { %352 = vmatmul.f32.gmra.mxu0 %v230_v20  ;;  %579 = vmatpush.msrb.mxu1 %v494_v24  ;;  %v622_v20 = vld [vmem:[#allocation7 + $0x28] sm:$0xff] }
  0x5d   :  { %381 = vmatmul.f32.gmra.mxu1 %v255_v21  ;;  %644 = vmatpush.msrb.mxu2 %v625_v6  ;;  %v458_v21 = vld [vmem:[#allocation5] sm:$0xff] }
  0x5e   :  { %580 = vmatpush.msrb.mxu1 %v493_v25  ;;  %522 = vmatpush.msra.mxu3 %v461_v7 }
  0x5f   :  { %551 = vmatpush.msrb.mxu0 %v477_v8  ;;  %645 = vmatpush.msrb.mxu2 %v624_v10 }
  0x60   :  { %581 = vmatpush.msrb.mxu1 %v492_v26  ;;  %523 = vmatpush.msra.mxu3 %v460_v11  ;;  %v1203_v26 = vld [vmem:[%s1895_s19] ss:$0 sm:$0xff]  ;;  %s1120_s19 = sshll.u32 %s1882_s21, 4  ;;  %s1121_s19 = int_to_ptr.hbm [resolvable:$true] %s1120_s19 }
  0x61   :  { %552 = vmatpush.msrb.mxu0 %v476_v13  ;;  %646 = vmatpush.msrb.mxu2 %v623_v14  ;;  %v758_v14 = vld [vmem:[#allocation8 + $0x178] sm:$0xff] }
  0x62   :  { %582 = vmatpush.msrb.mxu1 %v491_v29  ;;  %524 = vmatpush.msra.mxu3 %v459_v15  ;;  %v620_v29 = vld [vmem:[#allocation7 + $0x18] sm:$0xff]  ;;  %v757_v15 = vld [vmem:[#allocation8 + $0x170] sm:$0xff] }
  0x63   :  { %553 = vmatpush.msrb.mxu0 %v475_v16  ;;  %647 = vmatpush.msrb.mxu2 %v622_v20  ;;  %v756_v16 = vld [vmem:[#allocation8 + $0x168] sm:$0xff] }
  0x64   :  { %583 = vmatpush.msrb.mxu1 %v490_v32  ;;  %525 = vmatpush.msra.mxu3 %v458_v21  ;;  %v619_v32 = vld [vmem:[#allocation7 + $0x10] sm:$0xff]  ;;  %v752_v20 = vld [vmem:[#allocation8 + $0x148] sm:$0xff]  ;;  %v751_v21 = vld [vmem:[#allocation8 + $0x140] sm:$0xff] }
  0x65   :  { %554 = vmatpush.msrb.mxu0 %v474_v22  ;;  %648 = vmatpush.msrb.mxu2 %v621_v28  ;;  %v750_v22 = vld [vmem:[#allocation8 + $0x138] sm:$0xff] }
  0x66   :  { %821 = vmatpush.msra.mxu1 %v758_v14  ;;  %v726_v28 = vld [vmem:[#allocation8 + $0x78] sm:$0xff] }
  0x67   :  { %649 = vmatpush.msrb.mxu2 %v620_v29  ;;  %v742_v29 = vld [vmem:[#allocation8 + $0xf8] sm:$0xff]  ;;  %763 = vmatpush.msrb.mxu3 %v726_v28 }
  0x68   :  { %822 = vmatpush.msra.mxu1 %v757_v15  ;;  %792 = vmatpush.msra.mxu0 %v742_v29 }
  0x69   :  { %650 = vmatpush.msrb.mxu2 %v619_v32  ;;  %v741_v32 = vld [vmem:[#allocation8 + $0xf0] sm:$0xff] }
  0x6a   :  { %823 = vmatpush.msra.mxu1 %v756_v16  ;;  %793 = vmatpush.msra.mxu0 %v741_v32 }
  0x6b   :  { %651 = vmatpush.msrb.mxu2 %v618_v37  ;;  %v740_v37 = vld [vmem:[#allocation8 + $0xe8] sm:$0xff] }
  0x6c   :  { %794 = vmatpush.msra.mxu0 %v740_v37 }
  0x6d   :  { %652 = vmatpush.msrb.mxu2 %v617_v44  ;;  %v737_v44 = vld [vmem:[#allocation8 + $0xd0] sm:$0xff] }
  0x6e   :  { %1148 = vmatmul.msk.f32.vlgmr.msrb.gmra.mxu2 %vm167_vm0, %v1551_v35 }
  0x76   :  { %1149 = vmatmul.msk.f32.gmra.mxu2 %vm167_vm0, %v1575_v56 }
  0x7e   :  { %1150 = vmatmul.msk.f32.gmra.mxu2 %vm167_vm0, %v1597_v3 }
  0x86   :  { %1151 = vmatmul.msk.f32.gmra.mxu2 %vm167_vm0, %v1556_v36 }
  0xc1   :  { %v344_v63 = vpop.f32.mrf.mxu0 }
  0xc2   :  { %v345_v4 = vadd.f32 %v1633_v59, %v344_v63  ;;  %v373_v5 = vpop.f32.mrf.mxu1 }
  0xc4   :  { %v374_v9 = vadd.f32 %v373_v5, %v345_v4 }
  0xc6   :  { %v402_v17 = vpop.f32.mrf.mxu2 }
  0xc7   :  { %v403_v19 = vadd.f32 %v402_v17, %v374_v9  ;;  %v755_v17 = vld [vmem:[#allocation8 + $0x160] sm:$0xff] }
  0xc8   :  { %824 = vmatpush.msra.mxu1 %v755_v17  ;;  %v711_v17 = vld [vmem:[#allocation8] sm:$0xff] }
  0xc9   :  { %v347_v23 = vpop.f32.mrf.mxu0  ;;  %v414_v24 = vmax.f32 %v403_v19, 0.0  ;;  %v753_v19 = vld [vmem:[#allocation8 + $0x150] sm:$0xff] }
  0xca   :  { %v348_v25 = vadd.f32 %v1633_v59, %v347_v23  ;;  %v376_v27 = vpop.f32.mrf.mxu1  ;;  %v749_v23 = vld [vmem:[#allocation8 + $0x130] sm:$0xff] }
  0xcb   :  { %v422_v30 = vmul.f32 %v1202_v18, %v414_v24  ;;  %v748_v24 = vld [vmem:[#allocation8 + $0x128] sm:$0xff] }
  0xcc   :  { %v377_v31 = vadd.f32 %v376_v27, %v348_v25  ;;  %v747_v25 = vld [vmem:[#allocation8 + $0x120] sm:$0xff]  ;;  %v745_v27 = vld [vmem:[#allocation8 + $0x110] sm:$0xff] }
  0xcd   :  { %v430_v33 = vadd.f32 %v1203_v26, %v422_v30  ;;  %v744_v30 = vld [vmem:[#allocation8 + $0x108] sm:$0xff] }
  0xce   :  { %v405_v34 = vpop.f32.mrf.mxu2 }
  0xcf   :  { %v406_v38 = vadd.f32 %v405_v34, %v377_v31  ;;  %584 = vmatmul.f32.vlgmr.msrb.gmra.mxu1 %v430_v33  ;;  %v434_v0 = vrot.slane %v430_v33, 6  ;;  %v725_v31 = vld [vmem:[#allocation8 + $0x70] sm:$0xff]  ;;  %v724_v34 = vld [vmem:[#allocation8 + $0x68] sm:$0xff] }
  0xd0   :  { %764 = vmatpush.msrb.mxu3 %v725_v31 }
  0xd1   :  { %v350_v40 = vpop.f32.mrf.mxu0  ;;  %v415_v41 = vmax.f32 %v406_v38, 0.0  ;;  %v723_v38 = vld [vmem:[#allocation8 + $0x60] sm:$0xff] }
  0xd2   :  { %v351_v42 = vadd.f32 %v1633_v59, %v350_v40  ;;  %v379_v43 = vpop.f32.mrf.mxu1  ;;  %765 = vmatpush.msrb.mxu3 %v724_v34  ;;  %v739_v40 = vld [vmem:[#allocation8 + $0xe0] sm:$0xff] }
  0xd3   :  { %v423_v45 = vmul.f32 %v1202_v18, %v415_v41  ;;  %795 = vmatpush.msra.mxu0 %v739_v40  ;;  %v722_v41 = vld [vmem:[#allocation8 + $0x58] sm:$0xff] }
  0xd4   :  { %v380_v46 = vadd.f32 %v379_v43, %v351_v42  ;;  %766 = vmatpush.msrb.mxu3 %v723_v38  ;;  %v738_v42 = vld [vmem:[#allocation8 + $0xd8] sm:$0xff]  ;;  %v721_v43 = vld [vmem:[#allocation8 + $0x50] sm:$0xff] }
  0xd5   :  { %v431_v47 = vadd.f32 %v1203_v26, %v423_v45  ;;  %796 = vmatpush.msra.mxu0 %v738_v42  ;;  %v720_v45 = vld [vmem:[#allocation8 + $0x48] sm:$0xff] }
  0xd6   :  { %v408_v48 = vpop.f32.mrf.mxu2  ;;  %767 = vmatpush.msrb.mxu3 %v722_v41 }
  0xd7   :  { %v409_v50 = vadd.f32 %v408_v48, %v380_v46  ;;  %587 = vmatmul.f32.gmra.mxu1 %v431_v47  ;;  %v435_v3 = vrot.slane %v431_v47, 6  ;;  %v447_v5 = vrot.slane %v431_v47, 7  ;;  %797 = vmatpush.msra.mxu0 %v737_v44  ;;  %v736_v46 = vld [vmem:[#allocation8 + $0xc8] sm:$0xff]  ;;  %v719_v47 = vld [vmem:[#allocation8 + $0x40] sm:$0xff] }
  0xd8   :  { %768 = vmatpush.msrb.mxu3 %v721_v43  ;;  %v735_v48 = vld [vmem:[#allocation8 + $0xc0] sm:$0xff] }
  0xd9   :  { %v353_v51 = vpop.f32.mrf.mxu0  ;;  %v416_v52 = vmax.f32 %v409_v50, 0.0  ;;  %v440_v6 = vsel %vm229_vm1, %v434_v0, %v435_v3  ;;  %798 = vmatpush.msra.mxu0 %v736_v46 }
  0xda   :  { %v354_v53 = vadd.f32 %v1633_v59, %v353_v51  ;;  %v382_v54 = vpop.f32.mrf.mxu1  ;;  %v446_v59 = vrot.slane %v430_v33, 7  ;;  %v743_v33 = vld [vmem:[#allocation8 + $0x100] sm:$0xff]  ;;  %769 = vmatpush.msrb.mxu3 %v720_v45  ;;  %v718_v51 = vld [vmem:[#allocation8 + $0x38] sm:$0xff] }
  0xdb   :  { %v424_v55 = vmul.f32 %v1202_v18, %v416_v52  ;;  %799 = vmatpush.msra.mxu0 %v735_v48  ;;  %v734_v52 = vld [vmem:[#allocation8 + $0xb8] sm:$0xff] }
  0xdc   :  { %v383_v57 = vadd.f32 %v382_v54, %v354_v53  ;;  %v452_v7 = vsel %vm254_vm2, %v446_v59, %v447_v5  ;;  %770 = vmatpush.msrb.mxu3 %v719_v47  ;;  %v1680_v53 = vld [vmem:[%s1867_s6] ss:$0 sm:$0xff] }
  0xdd   :  { %v432_v58 = vadd.f32 %v1203_v26, %v424_v55  ;;  %800 = vmatpush.msra.mxu0 %v734_v52  ;;  %v717_v55 = vld [vmem:[#allocation8 + $0x30] sm:$0xff] }
  0xde   :  { %v411_v60 = vpop.f32.mrf.mxu2  ;;  %771 = vmatpush.msrb.mxu3 %v718_v51 }
  0xdf   :  { %v412_v61 = vadd.f32 %v411_v60, %v383_v57  ;;  %590 = vmatmul.f32.gmra.mxu1 %v432_v58  ;;  %v436_v8 = vrot.slane %v432_v58, 6  ;;  %v448_v9 = vrot.slane %v432_v58, 7  ;;  %v733_v57 = vld [vmem:[#allocation8 + $0xb0] sm:$0xff]  ;;  %v716_v58 = vld [vmem:[#allocation8 + $0x28] sm:$0xff] }
  0xe0   :  { %772 = vmatpush.msrb.mxu3 %v717_v55  ;;  %801 = vmatpush.msra.mxu0 %v733_v57  ;;  %v732_v60 = vld [vmem:[#allocation8 + $0xa8] sm:$0xff] }
  0xe1   :  { %v417_v62 = vmax.f32 %v412_v61, 0.0  ;;  %v439_v10 = vsel %vm229_vm1, %v435_v3, %v436_v8  ;;  %v451_v11 = vsel %vm254_vm2, %v447_v5, %v448_v9  ;;  %v1207_v3 = vld [vmem:[%s1871_s10] ss:$0 sm:$0xff] }
  0xe2   :  { %773 = vmatpush.msrb.mxu3 %v716_v58  ;;  %802 = vmatpush.msra.mxu0 %v732_v60 }
  0xe3   :  { %v425_v35 = vmul.f32 %v1202_v18, %v417_v62  ;;  %v754_v18 = vld [vmem:[#allocation8 + $0x158] sm:$0xff] }
  0xe4   :  { %825 = vmatpush.msra.mxu1 %v754_v18  ;;  %v727_v18 = vld [vmem:[#allocation8 + $0x80] sm:$0xff] }
  0xe5   :  { %v433_v63 = vadd.f32 %v1203_v26, %v425_v35  ;;  %v746_v26 = vld [vmem:[#allocation8 + $0x118] sm:$0xff] }
  0xe6   :  { %826 = vmatpush.msra.mxu1 %v753_v19 }
  0xe7   :  { %593 = vmatmul.f32.gmra.mxu1 %v433_v63  ;;  %v437_v1 = vrot.slane %v433_v63, 6  ;;  %v449_v2 = vrot.slane %v433_v63, 7  ;;  %v715_v63 = vld [vmem:[#allocation8 + $0x20] sm:$0xff] }
  0xe8   :  { %827 = vmatpush.msra.mxu1 %v752_v20  ;;  %774 = vmatpush.msrb.mxu3 %v715_v63 }
  0xe9   :  { %v441_v4 = vsel %vm229_vm1, %v437_v1, %v434_v0  ;;  %v453_v56 = vsel %vm254_vm2, %v449_v2, %v446_v59  ;;  %v438_v36 = vsel %vm229_vm1, %v436_v8, %v437_v1  ;;  %v450_v13 = vsel %vm254_vm2, %v448_v9, %v449_v2  ;;  %v731_v0 = vld [vmem:[#allocation8 + $0xa0] sm:$0xff]  ;;  %v714_v59 = vld [vmem:[#allocation8 + $0x18] sm:$0xff] }
  0xea   :  { %1144 = vmatmul.msk.f32.vlgmr.msra.gmra.mxu3 %vm234_vm3, %v441_v4  ;;  %1146 = vmatmul.msk.f32.vlgmr.msrb.gmra.mxu0 %vm259_vm4, %v453_v56  ;;  %v730_v2 = vld [vmem:[#allocation8 + $0x98] sm:$0xff]  ;;  %v1205_v56 = vld [vmem:[%s1868_s7] ss:$0 sm:$0xff] }
  0xeb   :  { %828 = vmatpush.msra.mxu1 %v751_v21  ;;  %803 = vmatpush.msra.mxu0 %v731_v0  ;;  %v1206_v9 = vld [vmem:[%s1869_s8] ss:$0 sm:$0xff] }
  0xec   :  { %775 = vmatpush.msrb.mxu3 %v714_v59 }
  0xed   :  { %829 = vmatpush.msra.mxu1 %v750_v22  ;;  %804 = vmatpush.msra.mxu0 %v730_v2 }
  0xef   :  { %830 = vmatpush.msra.mxu1 %v749_v23 }
  0xf1   :  { %831 = vmatpush.msra.mxu1 %v748_v24  ;;  %v654_v62 = vpop.f32.mrf.mxu2 }
  0xf2   :  { %529 = vmatmul.f32.gmra.mxu3 %v440_v6  ;;  %558 = vmatmul.f32.gmra.mxu0 %v452_v7  ;;  %v713_v6 = vld [vmem:[#allocation8 + $0x10] sm:$0xff]  ;;  %v655_v16 = vadd.f32 %v1207_v3, %v654_v62 }
  0xf3   :  { %832 = vmatpush.msra.mxu1 %v747_v25  ;;  %v729_v7 = vld [vmem:[#allocation8 + $0x90] sm:$0xff]  ;;  %776 = vmatpush.msrb.mxu3 %v713_v6 }
  0xf4   :  { %805 = vmatpush.msra.mxu0 %v729_v7 }
  0xf5   :  { %833 = vmatpush.msra.mxu1 %v746_v26 }
  0xf7   :  { %834 = vmatpush.msra.mxu1 %v745_v27 }
  0xf9   :  { %835 = vmatpush.msra.mxu1 %v744_v30  ;;  %v657_v19 = vpop.f32.mrf.mxu2 }
  0xfa   :  { %1145 = vmatmul.msk.f32.gmra.mxu3 %vm236_vm5, %v439_v10  ;;  %1147 = vmatmul.msk.f32.gmra.mxu0 %vm261_vm6, %v451_v11  ;;  %v712_v10 = vld [vmem:[#allocation8 + $0x8] sm:$0xff]  ;;  %v658_v30 = vadd.f32 %v1207_v3, %v657_v19  ;;  %v1763_v19 = vld [vmem:[#allocation10 + $0x140] sm:$0xff] }
  0xfb   :  { %836 = vmatpush.msra.mxu1 %v743_v33  ;;  %v728_v11 = vld [vmem:[#allocation8 + $0x88] sm:$0xff]  ;;  %777 = vmatpush.msrb.mxu3 %v712_v10 }
  0xfc   :  { %806 = vmatpush.msra.mxu0 %v728_v11 }
  0xfd   :  { %778 = vmatpush.msrb.mxu3 %v711_v17  ;;  %v1757_v17 = vld [vmem:[#allocation10 + $0x150] sm:$0xff] }
  0xfe   :  { %807 = vmatpush.msra.mxu0 %v727_v18  ;;  %v1760_v18 = vld [vmem:[#allocation10 + $0x148] sm:$0xff] }
 0x101   :  { %v660_v34 = vpop.f32.mrf.mxu2 }
 0x102   :  { %535 = vmatmul.f32.gmra.mxu3 %v438_v36  ;;  %564 = vmatmul.f32.gmra.mxu0 %v450_v13  ;;  %v661_v45 = vadd.f32 %v1207_v3, %v660_v34  ;;  %v923_v34 = vld [vmem:[#allocation10 + $0xe8] sm:$0xff] }
 0x14c   :  { %v585_v54 = vpop.f32.mrf.mxu1 }
 0x154   :  { %v588_v36 = vpop.f32.mrf.mxu1 }
 0x15c   :  { %v591_v31 = vpop.f32.mrf.mxu1 }
 0x167   :  { %v556_v50 = vpop.f32.mrf.mxu0 }
 0x16d   :  { %v527_v61 = vpop.f32.mrf.mxu3 }
 0x16e   :  { %v528_v35 = vadd.f32 %v1680_v53, %v527_v61 }
 0x16f   :  { %v559_v5 = vpop.f32.mrf.mxu0 }
 0x170   :  { %v557_v1 = vadd.f32 %v556_v50, %v528_v35  ;;  %v594_v50 = vpop.f32.mrf.mxu1 }
 0x172   :  { %v586_v4 = vadd.f32 %v585_v54, %v557_v1  ;;  %v663_v54 = vpop.f32.mrf.mxu2 }
 0x173   :  { %v664_v60 = vadd.f32 %v1207_v3, %v663_v54  ;;  %v916_v54 = vld [vmem:[#allocation10 + $0xb0] sm:$0xff] }
 0x174   :  { %v597_v8 = vmax.f32 %v586_v4, 0.0 }
 0x175   :  { %v530_v13 = vpop.f32.mrf.mxu3 }
 0x176   :  { %v531_v14 = vadd.f32 %v1680_v53, %v530_v13  ;;  %v605_v15 = vmul.f32 %v1205_v56, %v597_v8  ;;  %v1745_v13 = vld [vmem:[#allocation10 + $0x170] sm:$0xff] }
 0x177   :  { %v562_v26 = vpop.f32.mrf.mxu0 }
 0x178   :  { %v560_v20 = vadd.f32 %v559_v5, %v531_v14  ;;  %v613_v21 = vadd.f32 %v1206_v9, %v605_v15  ;;  %v1747_v14 = vld [vmem:[#allocation10 + $0x168] sm:$0xff]  ;;  %v1750_v15 = vld [vmem:[#allocation10 + $0x160] sm:$0xff] }
 0x17a   :  { %v589_v22 = vadd.f32 %v588_v36, %v560_v20  ;;  %v666_v23 = vadd.f32 %v655_v16, %v613_v21  ;;  %v1742_v36 = vld [vmem:[#allocation10 + $0x178] sm:$0xff]  ;;  %v1769_v21 = vld [vmem:[#allocation10 + $0x130] sm:$0xff] }
 0x17b   :  { %1004 = vmatpush.msrb.mxu0 %v1742_v36  ;;  %v1753_v16 = vld [vmem:[#allocation10 + $0x158] sm:$0xff] }
 0x17c   :  { %v598_v24 = vmax.f32 %v589_v22, 0.0  ;;  %v1693_v25 = vmax.f32 %v666_v23, 0.0  ;;  %v1765_v20 = vld [vmem:[#allocation10 + $0x138] sm:$0xff]  ;;  %v1772_v22 = vld [vmem:[#allocation10 + $0x128] sm:$0xff]  ;;  %v1775_v23 = vld [vmem:[#allocation10 + $0x120] sm:$0xff] }
 0x17d   :  { %v533_v27 = vpop.f32.mrf.mxu3  ;;  %1005 = vmatpush.msrb.mxu0 %v1745_v13 }
 0x17e   :  { %v534_v28 = vadd.f32 %v1680_v53, %v533_v27  ;;  %837 = vmatmul.f32.vlgmr.msra.gmra.mxu1 %v1693_v25  ;;  %v606_v29 = vmul.f32 %v1205_v56, %v598_v24  ;;  %v674_v35 = vrot.slane %v1693_v25, 4  ;;  %v699_v0 = vrot.slane %v1693_v25, 6  ;;  %v1778_v24 = vld [vmem:[#allocation10 + $0x118] sm:$0xff] }
 0x17f   :  { %v565_v46 = vpop.f32.mrf.mxu0  ;;  %1006 = vmatpush.msrb.mxu0 %v1747_v14  ;;  %v909_v27 = vld [vmem:[#allocation10 + $0x78] sm:$0xff] }
 0x180   :  { %v563_v32 = vadd.f32 %v562_v26, %v534_v28  ;;  %v614_v33 = vadd.f32 %v1206_v9, %v606_v29  ;;  %v1781_v26 = vld [vmem:[#allocation10 + $0x110] sm:$0xff]  ;;  %v925_v28 = vld [vmem:[#allocation10 + $0xf8] sm:$0xff]  ;;  %946 = vmatpush.msra.mxu2 %v909_v27  ;;  %v1784_v29 = vld [vmem:[#allocation10 + $0x108] sm:$0xff] }
 0x181   :  { %1007 = vmatpush.msrb.mxu0 %v1750_v15  ;;  %975 = vmatpush.msra.mxu3 %v925_v28  ;;  %v1210_v28 = vld [vmem:[%s1875_s14] ss:$0 sm:$0xff] }
 0x182   :  { %v592_v37 = vadd.f32 %v591_v31, %v563_v32  ;;  %v667_v38 = vadd.f32 %v658_v30, %v614_v33  ;;  %v908_v30 = vld [vmem:[#allocation10 + $0x70] sm:$0xff]  ;;  %v1787_v32 = vld [vmem:[#allocation10 + $0x100] sm:$0xff]  ;;  %v907_v33 = vld [vmem:[#allocation10 + $0x68] sm:$0xff] }
 0x183   :  { %1008 = vmatpush.msrb.mxu0 %v1753_v16  ;;  %v924_v31 = vld [vmem:[#allocation10 + $0xf0] sm:$0xff]  ;;  %947 = vmatpush.msra.mxu2 %v908_v30 }
 0x184   :  { %v599_v40 = vmax.f32 %v592_v37, 0.0  ;;  %v1697_v41 = vmax.f32 %v667_v38, 0.0  ;;  %976 = vmatpush.msra.mxu3 %v924_v31  ;;  %v906_v37 = vld [vmem:[#allocation10 + $0x60] sm:$0xff] }
 0x185   :  { %v536_v42 = vpop.f32.mrf.mxu3  ;;  %1009 = vmatpush.msrb.mxu0 %v1757_v17  ;;  %948 = vmatpush.msra.mxu2 %v907_v33  ;;  %v922_v38 = vld [vmem:[#allocation10 + $0xe0] sm:$0xff] }
 0x186   :  { %v537_v43 = vadd.f32 %v1680_v53, %v536_v42  ;;  %840 = vmatmul.f32.gmra.mxu1 %v1697_v41  ;;  %v607_v44 = vmul.f32 %v1205_v56, %v599_v40  ;;  %v675_v4 = vrot.slane %v1697_v41, 4  ;;  %977 = vmatpush.msra.mxu3 %v923_v34  ;;  %v905_v40 = vld [vmem:[#allocation10 + $0x58] sm:$0xff] }
 0x187   :  { %1010 = vmatpush.msrb.mxu0 %v1760_v18  ;;  %949 = vmatpush.msra.mxu2 %v906_v37  ;;  %v921_v42 = vld [vmem:[#allocation10 + $0xd8] sm:$0xff] }
 0x188   :  { %v566_v47 = vadd.f32 %v565_v46, %v537_v43  ;;  %v615_v48 = vadd.f32 %v1206_v9, %v607_v44  ;;  %v681_v3 = vsel %vm678_vm8, %v674_v35, %v675_v4  ;;  %978 = vmatpush.msra.mxu3 %v922_v38  ;;  %v904_v43 = vld [vmem:[#allocation10 + $0x50] sm:$0xff]  ;;  %v919_v46 = vld [vmem:[#allocation10 + $0xc8] sm:$0xff] }
 0x189   :  { %1011 = vmatpush.msrb.mxu0 %v1763_v19  ;;  %950 = vmatpush.msra.mxu2 %v905_v40  ;;  %v920_v44 = vld [vmem:[#allocation10 + $0xd0] sm:$0xff] }
 0x18a   :  { %v595_v51 = vadd.f32 %v594_v50, %v566_v47  ;;  %v668_v52 = vadd.f32 %v661_v45, %v615_v48  ;;  %979 = vmatpush.msra.mxu3 %v921_v42  ;;  %v903_v45 = vld [vmem:[#allocation10 + $0x48] sm:$0xff]  ;;  %v902_v47 = vld [vmem:[#allocation10 + $0x40] sm:$0xff]  ;;  %v901_v50 = vld [vmem:[#allocation10 + $0x38] sm:$0xff] }
 0x18b   :  { %1012 = vmatpush.msrb.mxu0 %v1765_v20  ;;  %951 = vmatpush.msra.mxu2 %v904_v43  ;;  %v918_v48 = vld [vmem:[#allocation10 + $0xc0] sm:$0xff] }
 0x18c   :  { %v600_v55 = vmax.f32 %v595_v51, 0.0  ;;  %v1701_v57 = vmax.f32 %v668_v52, 0.0  ;;  %980 = vmatpush.msra.mxu3 %v920_v44  ;;  %v917_v51 = vld [vmem:[#allocation10 + $0xb8] sm:$0xff]  ;;  %v900_v52 = vld [vmem:[#allocation10 + $0x30] sm:$0xff] }
 0x18d   :  { %1013 = vmatpush.msrb.mxu0 %v1769_v21  ;;  %952 = vmatpush.msra.mxu2 %v903_v45 }
 0x18e   :  { %843 = vmatmul.f32.gmra.mxu1 %v1701_v57  ;;  %v608_v58 = vmul.f32 %v1205_v56, %v600_v55  ;;  %v700_v56 = vrot.slane %v1697_v41, 6  ;;  %v676_v6 = vrot.slane %v1701_v57, 4  ;;  %v701_v7 = vrot.slane %v1701_v57, 6  ;;  %981 = vmatpush.msra.mxu3 %v919_v46 }
 0x18f   :  { %1014 = vmatpush.msrb.mxu0 %v1772_v22  ;;  %953 = vmatpush.msra.mxu2 %v902_v47 }
 0x190   :  { %v616_v61 = vadd.f32 %v1206_v9, %v608_v58  ;;  %v705_v5 = vsel %vm229_vm1, %v699_v0, %v700_v56  ;;  %v680_v8 = vsel %vm678_vm8, %v675_v4, %v676_v6  ;;  %v704_v9 = vsel %vm229_vm1, %v700_v56, %v701_v7  ;;  %982 = vmatpush.msra.mxu3 %v918_v48  ;;  %v899_v58 = vld [vmem:[#allocation10 + $0x28] sm:$0xff]  ;;  %v896_v4 = vld [vmem:[#allocation10 + $0x10] sm:$0xff] }
 0x191   :  { %1015 = vmatpush.msrb.mxu0 %v1775_v23  ;;  %954 = vmatpush.msra.mxu2 %v901_v50  ;;  %v912_v56 = vld [vmem:[#allocation10 + $0x90] sm:$0xff] }
 0x192   :  { %v669_v53 = vadd.f32 %v664_v60, %v616_v61  ;;  %983 = vmatpush.msra.mxu3 %v917_v51  ;;  %v915_v60 = vld [vmem:[#allocation10 + $0xa8] sm:$0xff]  ;;  %v1208_v61 = vld [vmem:[%s1873_s12] ss:$0 sm:$0xff] }
 0x193   :  { %1016 = vmatpush.msrb.mxu0 %v1778_v24  ;;  %955 = vmatpush.msra.mxu2 %v900_v52 }
 0x194   :  { %v1704_v62 = vmax.f32 %v669_v53, 0.0  ;;  %984 = vmatpush.msra.mxu3 %v916_v54 }
 0x195   :  { %1017 = vmatpush.msrb.mxu0 %v1781_v26  ;;  %956 = vmatpush.msra.mxu2 %v899_v58 }
 0x196   :  { %846 = vmatmul.f32.gmra.mxu1 %v1704_v62  ;;  %v677_v63 = vrot.slane %v1704_v62, 4  ;;  %v702_v1 = vrot.slane %v1704_v62, 6  ;;  %985 = vmatpush.msra.mxu3 %v915_v60 }
 0x197   :  { %1018 = vmatpush.msrb.mxu0 %v1784_v29 }
 0x198   :  { %v682_v59 = vsel %vm678_vm8, %v677_v63, %v674_v35  ;;  %v706_v2 = vsel %vm229_vm1, %v702_v1, %v699_v0  ;;  %v679_v10 = vsel %vm678_vm8, %v676_v6, %v677_v63  ;;  %v703_v11 = vsel %vm229_vm1, %v701_v7, %v702_v1  ;;  %v898_v35 = vld [vmem:[#allocation10 + $0x20] sm:$0xff]  ;;  %v897_v1 = vld [vmem:[#allocation10 + $0x18] sm:$0xff]  ;;  %v911_v6 = vld [vmem:[#allocation10 + $0x88] sm:$0xff] }
 0x199   :  { %1152 = vmatmul.msk.f32.vlgmr.msrb.gmra.mxu3 %vm683_vm7, %v682_v59  ;;  %1154 = vmatmul.msk.f32.vlgmr.msra.gmra.mxu0 %vm234_vm3, %v706_v2  ;;  %v914_v63 = vld [vmem:[#allocation10 + $0xa0] sm:$0xff]  ;;  %v913_v59 = vld [vmem:[#allocation10 + $0x98] sm:$0xff] }
 0x19a   :  { %1019 = vmatpush.msrb.mxu0 %v1787_v32  ;;  %957 = vmatpush.msra.mxu2 %v898_v35  ;;  %v894_v7 = vld [vmem:[#allocation10] sm:$0xff] }
 0x19b   :  { %986 = vmatpush.msra.mxu3 %v914_v63 }
 0x19c   :  { %958 = vmatpush.msra.mxu2 %v897_v1 }
 0x19d   :  { %987 = vmatpush.msra.mxu3 %v913_v59  ;;  %v1076_v59 = vld [vmem:[#allocation11 + $0x78] sm:$0xff] }
 0x19e   :  { %959 = vmatpush.msra.mxu2 %v896_v4  ;;  %1081 = vmatpush.msrb.mxu1 %v1076_v59  ;;  %v1074_v4 = vld [vmem:[#allocation11 + $0x68] sm:$0xff] }
 0x19f   :  { %988 = vmatpush.msra.mxu3 %v912_v56  ;;  %v1073_v56 = vld [vmem:[#allocation11 + $0x60] sm:$0xff] }
 0x1a1   :  { %782 = vmatmul.f32.gmra.mxu3 %v681_v3  ;;  %811 = vmatmul.f32.gmra.mxu0 %v705_v5  ;;  %v895_v5 = vld [vmem:[#allocation10 + $0x8] sm:$0xff] }
 0x1a2   :  { %960 = vmatpush.msra.mxu2 %v895_v5  ;;  %989 = vmatpush.msra.mxu3 %v911_v6  ;;  %v1069_v5 = vld [vmem:[#allocation11 + $0x40] sm:$0xff]  ;;  %v1068_v6 = vld [vmem:[#allocation11 + $0x38] sm:$0xff] }
 0x1a4   :  { %961 = vmatpush.msra.mxu2 %v894_v7  ;;  %v1067_v7 = vld [vmem:[#allocation11 + $0x30] sm:$0xff] }
 0x1a6   :  { %1160 = vmatpush.msrb.mxu2 %v1742_v36 }
 0x1a8   :  { %1161 = vmatpush.msrb.mxu2 %v1745_v13 }
 0x1a9   :  { %1153 = vmatmul.msk.f32.gmra.mxu3 %vm685_vm9, %v680_v8  ;;  %1155 = vmatmul.msk.f32.gmra.mxu0 %vm236_vm5, %v704_v9  ;;  %v910_v8 = vld [vmem:[#allocation10 + $0x80] sm:$0xff] }
 0x1aa   :  { %990 = vmatpush.msra.mxu3 %v910_v8  ;;  %1162 = vmatpush.msrb.mxu2 %v1747_v14  ;;  %v1066_v8 = vld [vmem:[#allocation11 + $0x28] sm:$0xff] }
 0x1ac   :  { %1163 = vmatpush.msrb.mxu2 %v1750_v15  ;;  %1176 = vmatpush.msrb.mxu3 %v1076_v59 }
 0x1ae   :  { %1164 = vmatpush.msrb.mxu2 %v1753_v16 }
 0x1b0   :  { %1165 = vmatpush.msrb.mxu2 %v1757_v17 }
 0x1b1   :  { %788 = vmatmul.f32.gmra.mxu3 %v679_v10  ;;  %817 = vmatmul.f32.gmra.mxu0 %v703_v11  ;;  %v1209_v10 = vld [vmem:[%s1874_s13] ss:$0 sm:$0xff] }
 0x1b2   :  { %1166 = vmatpush.msrb.mxu2 %v1760_v18 }
 0x1b4   :  { %1167 = vmatpush.msrb.mxu2 %v1763_v19 }
 0x1b6   :  { %1168 = vmatpush.msrb.mxu2 %v1765_v20 }
 0x1b8   :  { %1169 = vmatpush.msrb.mxu2 %v1769_v21 }
 0x1ba   :  { %1170 = vmatpush.msrb.mxu2 %v1772_v22 }
 0x1bc   :  { %1171 = vmatpush.msrb.mxu2 %v1775_v23 }
 0x1be   :  { %1172 = vmatpush.msrb.mxu2 %v1778_v24 }
 0x1c0   :  { %1173 = vmatpush.msrb.mxu2 %v1781_v26 }
 0x1c2   :  { %1174 = vmatpush.msrb.mxu2 %v1784_v29 }
 0x1c4   :  { %1175 = vmatpush.msrb.mxu2 %v1787_v32 }
 0x1fb   :  { %v838_v53 = vpop.f32.mrf.mxu1 }
 0x203   :  { %v841_v30 = vpop.f32.mrf.mxu1 }
 0x20b   :  { %v844_v46 = vpop.f32.mrf.mxu1 }
 0x213   :  { %v847_v16 = vpop.f32.mrf.mxu1 }
 0x216   :  { %v809_v55 = vpop.f32.mrf.mxu0 }
 0x21c   :  { %v780_v0 = vpop.f32.mrf.mxu3 }
 0x21d   :  { %v781_v2 = vadd.f32 %v1208_v61, %v780_v0 }
 0x21e   :  { %v812_v11 = vpop.f32.mrf.mxu0 }
 0x21f   :  { %v810_v3 = vadd.f32 %v809_v55, %v781_v2  ;;  %v1075_v2 = vld [vmem:[#allocation11 + $0x70] sm:$0xff] }
 0x220   :  { %1082 = vmatpush.msrb.mxu1 %v1075_v2  ;;  %1177 = vmatpush.msrb.mxu3 %v1075_v2  ;;  %v1214_v2 = vld [vmem:[%s1881_s20] ss:$0 sm:$0xff] }
 0x221   :  { %v839_v9 = vadd.f32 %v838_v53, %v810_v3  ;;  %v1071_v3 = vld [vmem:[#allocation11 + $0x50] sm:$0xff] }
 0x222   :  { %1083 = vmatpush.msrb.mxu1 %v1074_v4  ;;  %1178 = vmatpush.msrb.mxu3 %v1074_v4 }
 0x223   :  { %v850_v27 = vmax.f32 %v839_v9, 0.0  ;;  %v1065_v9 = vld [vmem:[#allocation11 + $0x20] sm:$0xff] }
 0x224   :  { %v783_v31 = vpop.f32.mrf.mxu3  ;;  %1084 = vmatpush.msrb.mxu1 %v1073_v56  ;;  %1179 = vmatpush.msrb.mxu3 %v1073_v56 }
 0x225   :  { %v858_v33 = vmul.f32 %v1209_v10, %v850_v27  ;;  %v784_v34 = vadd.f32 %v1208_v61, %v783_v31  ;;  %v1062_v27 = vld [vmem:[#allocation11 + $0x8] sm:$0xff] }
 0x226   :  { %v815_v43 = vpop.f32.mrf.mxu0  ;;  %1085 = vmatpush.msrb.mxu1 %v1072_v12  ;;  %1180 = vmatpush.msrb.mxu3 %v1072_v12 }
 0x227   :  { %v813_v37 = vadd.f32 %v812_v11, %v784_v34  ;;  %v866_v38 = vadd.f32 %v1210_v28, %v858_v33  ;;  %v1063_v11 = vld [vmem:[#allocation11 + $0x10] sm:$0xff] }
 0x228   :  { %1086 = vmatpush.msrb.mxu1 %v1071_v3  ;;  %1181 = vmatpush.msrb.mxu3 %v1071_v3 }
 0x229   :  { %v842_v40 = vadd.f32 %v841_v30, %v813_v37  ;;  %1020 = vmatmul.f32.vlgmr.msrb.gmra.mxu0 %v866_v38  ;;  %v870_v21 = vrot.slane %v866_v38, 4  ;;  %v882_v54 = vrot.slane %v866_v38, 6  ;;  %v1211_v30 = vld [vmem:[%s1877_s16] ss:$0 sm:$0xff] }
 0x22a   :  { %1087 = vmatpush.msrb.mxu1 %v1070_v39  ;;  %1182 = vmatpush.msrb.mxu3 %v1070_v39 }
 0x22b   :  { %v851_v42 = vmax.f32 %v842_v40, 0.0 }
 0x22c   :  { %v786_v44 = vpop.f32.mrf.mxu3  ;;  %1088 = vmatpush.msrb.mxu1 %v1069_v5  ;;  %1183 = vmatpush.msrb.mxu3 %v1069_v5 }
 0x22d   :  { %v859_v45 = vmul.f32 %v1209_v10, %v851_v42  ;;  %v787_v47 = vadd.f32 %v1208_v61, %v786_v44  ;;  %v1212_v42 = vld [vmem:[%s1878_s17] ss:$0 sm:$0xff] }
 0x22e   :  { %v818_v15 = vpop.f32.mrf.mxu0  ;;  %1089 = vmatpush.msrb.mxu1 %v1068_v6  ;;  %1184 = vmatpush.msrb.mxu3 %v1068_v6  ;;  %v1213_v44 = vld [vmem:[%s1879_s18] ss:$0 sm:$0xff]  ;;  %s1401_s18 = smov [#allocation13]  }
 0x22f   :  { %v867_v36 = vadd.f32 %v1210_v28, %v859_v45  ;;  %v816_v17 = vadd.f32 %v815_v43, %v787_v47  ;;  %s1118_s11 = sshll.u32 %s1401_s18, 4  ;;  %s1119_s11 = int_to_ptr.vmem [resolvable:$true] %s1118_s11 }
 0x230   :  { %1090 = vmatpush.msrb.mxu1 %v1067_v7  ;;  %1185 = vmatpush.msrb.mxu3 %v1067_v7 }
 0x231   :  { %1023 = vmatmul.f32.gmra.mxu0 %v867_v36  ;;  %v845_v20 = vadd.f32 %v844_v46, %v816_v17  ;;  %v871_v29 = vrot.slane %v867_v36, 4  ;;  %v883_v58 = vrot.slane %v867_v36, 6 }
 0x232   :  { %1091 = vmatpush.msrb.mxu1 %v1066_v8  ;;  %1186 = vmatpush.msrb.mxu3 %v1066_v8 }
 0x233   :  { %v852_v22 = vmax.f32 %v845_v20, 0.0  ;;  %v876_v32 = vsel %vm678_vm8, %v870_v21, %v871_v29 }
 0x234   :  { %v789_v13 = vpop.f32.mrf.mxu3  ;;  %1092 = vmatpush.msrb.mxu1 %v1065_v9  ;;  %1187 = vmatpush.msrb.mxu3 %v1065_v9 }
 0x235   :  { %v790_v14 = vadd.f32 %v1208_v61, %v789_v13  ;;  %v860_v26 = vmul.f32 %v1209_v10, %v852_v22  ;;  %v888_v61 = vsel %vm229_vm1, %v882_v54, %v883_v58 }
 0x237   :  { %v819_v48 = vadd.f32 %v818_v15, %v790_v14  ;;  %v868_v60 = vadd.f32 %v1210_v28, %v860_v26 }
 0x239   :  { %v848_v50 = vadd.f32 %v847_v16, %v819_v48  ;;  %v872_v53 = vrot.slane %v868_v60, 4  ;;  %v884_v35 = vrot.slane %v868_v60, 6 }
 0x23b   :  { %v853_v18 = vmax.f32 %v848_v50, 0.0  ;;  %v875_v63 = vsel %vm678_vm8, %v871_v29, %v872_v53  ;;  %v887_v49 = vsel %vm229_vm1, %v883_v58, %v884_v35 }
 0x23d   :  { %v861_v19 = vmul.f32 %v1209_v10, %v853_v18  ;;  %v1064_v10 = vld [vmem:[#allocation11 + $0x18] sm:$0xff] }
 0x23e   :  { %1093 = vmatpush.msrb.mxu1 %v1064_v10  ;;  %1188 = vmatpush.msrb.mxu3 %v1064_v10 }
 0x23f   :  { %v869_v51 = vadd.f32 %v1210_v28, %v861_v19  ;;  %v1061_v28 = vld [vmem:[#allocation11] sm:$0xff] }
 0x240   :  { %1094 = vmatpush.msrb.mxu1 %v1063_v11  ;;  %1189 = vmatpush.msrb.mxu3 %v1063_v11 }
 0x241   :  { %v873_v52 = vrot.slane %v869_v51, 4  ;;  %v885_v55 = vrot.slane %v869_v51, 6 }
 0x242   :  { %1095 = vmatpush.msrb.mxu1 %v1062_v27  ;;  %1190 = vmatpush.msrb.mxu3 %v1062_v27 }
 0x243   :  { %v877_v23 = vsel %vm678_vm8, %v873_v52, %v870_v21  ;;  %v889_v24 = vsel %vm229_vm1, %v885_v55, %v882_v54  ;;  %v874_v0 = vsel %vm678_vm8, %v872_v53, %v873_v52  ;;  %v886_v1 = vsel %vm229_vm1, %v884_v35, %v885_v55 }
 0x244   :  { %1156 = vmatmul.msk.f32.vlgmr.msra.gmra.mxu2 %vm683_vm7, %v877_v23  ;;  %1158 = vmatmul.msk.f32.vlgmr.msra.gmra.mxu3 %vm234_vm3, %v889_v24 }
 0x245   :  { %1096 = vmatpush.msrb.mxu1 %v1061_v28  ;;  %1191 = vmatpush.msrb.mxu3 %v1061_v28 }
 0x24c   :  { %965 = vmatmul.f32.gmra.mxu2 %v876_v32  ;;  %994 = vmatmul.f32.gmra.mxu3 %v888_v61 }
 0x254   :  { %1157 = vmatmul.msk.f32.gmra.mxu2 %vm685_vm9, %v875_v63  ;;  %1159 = vmatmul.msk.f32.gmra.mxu3 %vm236_vm5, %v887_v49 }
 0x25c   :  { %971 = vmatmul.f32.gmra.mxu2 %v874_v0  ;;  %1000 = vmatmul.f32.gmra.mxu3 %v886_v1 }
 0x264   :  { %1026 = vmatmul.f32.vlgmr.msrb.gmra.mxu2 %v868_v60 }
 0x26c   :  { %1029 = vmatmul.f32.gmra.mxu2 %v869_v51 }
 0x2a6   :  { %v1021_v37 = vpop.f32.mrf.mxu0 }
 0x2ae   :  { %v1024_v47 = vpop.f32.mrf.mxu0 }
 0x2c7   :  { %v963_v31 = vpop.f32.mrf.mxu2  ;;  %v992_v33 = vpop.f32.mrf.mxu3 }
 0x2c8   :  { %v964_v34 = vadd.f32 %v1211_v30, %v963_v31 }
 0x2ca   :  { %v993_v38 = vadd.f32 %v992_v33, %v964_v34 }
 0x2cc   :  { %v1022_v40 = vadd.f32 %v1021_v37, %v993_v38 }
 0x2ce   :  { %v1033_v43 = vmax.f32 %v1022_v40, 0.0 }
 0x2cf   :  { %v966_v45 = vpop.f32.mrf.mxu2  ;;  %v995_v13 = vpop.f32.mrf.mxu3 }
 0x2d0   :  { %v1041_v46 = vmul.f32 %v1212_v42, %v1033_v43  ;;  %v967_v36 = vadd.f32 %v1211_v30, %v966_v45 }
 0x2d2   :  { %v1049_v14 = vadd.f32 %v1213_v44, %v1041_v46  ;;  %v996_v15 = vadd.f32 %v995_v13, %v967_v36 }
 0x2d4   :  { %v1025_v48 = vadd.f32 %v1024_v47, %v996_v15  ;;  %v1053_v16 = vadd.f32 %v1049_v14, %v1693_v25 }
 0x2d6   :  { %v1034_v50 = vmax.f32 %v1025_v48, 0.0  ;;  %v1057_v17 = vmax.f32 %v1053_v16, 0.0 }
 0x2d7   :  { %v969_v18 = vpop.f32.mrf.mxu2  ;;  %v998_v55 = vpop.f32.mrf.mxu3 }
 0x2d8   :  { %v1042_v19 = vmul.f32 %v1212_v42, %v1034_v50  ;;  %1097 = vmatmul.f32.vlgmr.msrb.gmra.mxu1 %v1057_v17  ;;  %v970_v54 = vadd.f32 %v1211_v30, %v969_v18 }
 0x2da   :  { %v1050_v20 = vadd.f32 %v1213_v44, %v1042_v19  ;;  %v999_v22 = vadd.f32 %v998_v55, %v970_v54 }
 0x2dc   :  { %v1054_v51 = vadd.f32 %v1050_v20, %v1697_v41 }
 0x2de   :  { %v1058_v21 = vmax.f32 %v1054_v51, 0.0 }
 0x2df   :  { %v972_v52 = vpop.f32.mrf.mxu2  ;;  %v1001_v25 = vpop.f32.mrf.mxu3 }
 0x2e0   :  { %1100 = vmatmul.f32.gmra.mxu1 %v1058_v21  ;;  %v973_v26 = vadd.f32 %v1211_v30, %v972_v52 }
 0x2e2   :  { %v1002_v60 = vadd.f32 %v1001_v25, %v973_v26 }
 0x2e7   :  { %v1027_v23 = vpop.f32.mrf.mxu2 }
 0x2e8   :  { %v1028_v24 = vadd.f32 %v1027_v23, %v999_v22 }
 0x2ea   :  { %v1035_v29 = vmax.f32 %v1028_v24, 0.0 }
 0x2ec   :  { %v1043_v58 = vmul.f32 %v1212_v42, %v1035_v29 }
 0x2ee   :  { %v1051_v32 = vadd.f32 %v1213_v44, %v1043_v58 }
 0x2ef   :  { %v1030_v61 = vpop.f32.mrf.mxu2 }
 0x2f0   :  { %v1055_v53 = vadd.f32 %v1051_v32, %v1701_v57  ;;  %v1031_v35 = vadd.f32 %v1030_v61, %v1002_v60 }
 0x2f2   :  { %v1036_v63 = vmax.f32 %v1031_v35, 0.0  ;;  %v1059_v41 = vmax.f32 %v1055_v53, 0.0 }
 0x2f4   :  { %v1044_v49 = vmul.f32 %v1212_v42, %v1036_v63  ;;  %1103 = vmatmul.f32.vlgmr.msrb.gmra.mxu3 %v1059_v41 }
 0x2f6   :  { %v1052_v0 = vadd.f32 %v1213_v44, %v1044_v49 }
 0x2f8   :  { %v1056_v1 = vadd.f32 %v1052_v0, %v1704_v62 }
 0x2fa   :  { %v1060_v59 = vmax.f32 %v1056_v1, 0.0 }
 0x2fc   :  { %1106 = vmatmul.f32.gmra.mxu3 %v1060_v59 }
 0x355   :  { %v1098_v4 = vpop.f32.mrf.mxu1 }
 0x356   :  { %v1099_v56 = vadd.f32 %v1214_v2, %v1098_v4 }
 0x358   :  { %1110 = vst [vmem:[#allocation13] sm:$0xff] %v1099_v56 }
 0x35d   :  { %v1101_v12 = vpop.f32.mrf.mxu1 }
 0x35e   :  { %v1102_v3 = vadd.f32 %v1214_v2, %v1101_v12 }
 0x360   :  { %1111 = vst [vmem:[#allocation13 + $0x8] sm:$0xff] %v1102_v3 }
 0x377   :  { %v1104_v57 = vpop.f32.mrf.mxu3 }
 0x378   :  { %v1105_v39 = vadd.f32 %v1214_v2, %v1104_v57 }
 0x37a   :  { %1112 = vst [vmem:[#allocation13 + $0x10] sm:$0xff] %v1105_v39 }
 0x37f   :  { %v1107_v62 = vpop.f32.mrf.mxu3 }
 0x380   :  { %v1108_v5 = vadd.f32 %v1214_v2, %v1107_v62 }
 0x382   :  { %1113 = vst [vmem:[#allocation13 + $0x18] sm:$0xff] %v1108_v5 }
 0x383   :  { %1126 = dma.vmem_to_hbm [thread:$0]  %s1119_s11, 512, %s1121_s19, [#allocation4], %s1394_s30, %s1394_s30, %s1395_s5  }
 0x384   :  { %1391 = dma.done.wait [#allocation4], 512  }
 0x385   :  { %1392 = vsyncadd [#allocation4], 4294966784 }
 0x386   :  { %1131 = vsyncpa [#allocation3], 1 }
 0x387   :  { %1132 = vsyncpa [#allocation6], 1 }
 0x388   :  { %1133 = vsyncpa [#allocation9], 1 }
 0x389   :  { %1134 = vsyncpa [#allocation12], 1 }
 0x38a   :  { %1135 = vsyncpa [#allocation4], 1 }

// kernel: tpu_custom_call.1
= control target key start
LH: loop header
LB: loop body
LE: loop exit
PB: predicated region body
PF: predicated region fallthrough
CT: control target
= control target key end

     0   :  { %s1861_s0 = inlined_call_operand.vmem [shape: f32[2,16,8], index: 0, kind: input, shape index: {}]   ;;  %s1862_s1 = inlined_call_operand.hbm [shape: f32[384,128], index: 1, kind: input, shape index: {}]   ;;  %s1863_s2 = inlined_call_operand.vmem [shape: f32[1,128], index: 2, kind: input, shape index: {}]   ;;  %s1864_s3 = inlined_call_operand.vmem [shape: f32[1,128], index: 3, kind: input, shape index: {}]   ;;  %s1865_s4 = inlined_call_operand.vmem [shape: f32[1,128], index: 4, kind: input, shape index: {}]   ;;  %s1866_s5 = inlined_call_operand.hbm [shape: f32[384,128], index: 5, kind: input, shape index: {}]   ;;  %s1867_s6 = inlined_call_operand.vmem [shape: f32[1,128], index: 6, kind: input, shape index: {}]   ;;  %s1868_s7 = inlined_call_operand.vmem [shape: f32[1,128], index: 7, kind: input, shape index: {}]   ;;  %s1869_s8 = inlined_call_operand.vmem [shape: f32[1,128], index: 8, kind: input, shape index: {}]   ;;  %s1870_s9 = inlined_call_operand.hbm [shape: f32[128,128], index: 9, kind: input, shape index: {}]   ;;  %s1871_s10 = inlined_call_operand.vmem [shape: f32[1,128], index: 10, kind: input, shape index: {}]   ;;  %s1872_s11 = inlined_call_operand.hbm [shape: f32[384,128], index: 11, kind: input, shape index: {}]   ;;  %s1873_s12 = inlined_call_operand.vmem [shape: f32[1,128], index: 12, kind: input, shape index: {}]   ;;  %s1874_s13 = inlined_call_operand.vmem [shape: f32[1,128], index: 13, kind: input, shape index: {}]   ;;  %s1875_s14 = inlined_call_operand.vmem [shape: f32[1,128], index: 14, kind: input, shape index: {}]   ;;  %s1876_s15 = inlined_call_operand.hbm [shape: f32[384,128], index: 15, kind: input, shape index: {}]   ;;  %s1877_s16 = inlined_call_operand.vmem [shape: f32[1,128], index: 16, kind: input, shape index: {}]   ;;  %s1878_s17 = inlined_call_operand.vmem [shape: f32[1,128], index: 17, kind: input, shape index: {}]   ;;  %s1879_s18 = inlined_call_operand.vmem [shape: f32[1,128], index: 18, kind: input, shape index: {}]   ;;  %s1880_s19 = inlined_call_operand.hbm [shape: f32[128,128], index: 19, kind: input, shape index: {}]   ;;  %s1881_s20 = inlined_call_operand.vmem [shape: f32[1,128], index: 20, kind: input, shape index: {}]   ;;  %s1882_s21 = inlined_call_operand.hbm [shape: f32[2,16,128], index: 21, kind: output, shape index: {}]  }
   0x1   :  { %1884 = sst [smem:[#allocation19_spill]] %s1861_s0 }
   0x2   :  { %1885 = sst [smem:[#allocation20_spill]] %s1862_s1 }
   0x3   :  { %1886 = sst [smem:[#allocation21_spill]] %s1863_s2 }
   0x4   :  { %1887 = sst [smem:[#allocation22_spill]] %s1864_s3 }
   0x5   :  { %1888 = sst [smem:[#allocation23_spill]] %s1865_s4 }
   0x6   :  { %1889 = sst [smem:[#allocation24_spill]] %s1866_s5 }
   0x7   :  { %26 = vsyncpa [#allocation3], 0 }
   0x8   :  { %27 = vsyncpa [#allocation6], 0 }
   0x9   :  { %28 = vsyncpa [#allocation9], 0 }
   0xa   :  { %29 = vsyncpa [#allocation12], 0 }
   0xb   :  { %30 = vsyncpa [#allocation4], 0  ;;  %s1890_s26 = sld [smem:[#allocation24_spill]]  ;;  %s1393_s3 = smov [#allocation5]  }
   0xc   :  { %s58_s28 = sshll.u32 %s1393_s3, 4  ;;  %s90_s4 = sshll.u32 %s1872_s11, 4  ;;  %s59_s28 = int_to_ptr.vmem [resolvable:$true] %s58_s28  ;;  %s91_s4 = int_to_ptr.hbm [resolvable:$true] %s90_s4 }
   0xd   :  { %s1394_s30 = smov 128   ;;  %s1395_s5 = smov 8  }
   0xe   :  { %s1396_s22 = smov [#allocation8]   ;;  %s1891_s2 = sld [smem:[#allocation20_spill]] }
   0xf   :  { %s92_s23 = sshll.u32 %s1396_s22, 4  ;;  %s75_s3 = sshll.u32 %s1870_s9, 4  ;;  %s93_s23 = int_to_ptr.vmem [resolvable:$true] %s92_s23  ;;  %s76_s3 = int_to_ptr.hbm [resolvable:$true] %s75_s3 }
  0x10   :  { %98 = dma.hbm_to_vmem [thread:$0]  %s91_s4, 6144, %s93_s23, [#allocation9], %s1394_s30, %s1394_s30, %s1395_s5  }
  0x11   :  { %s56_s27 = sshll.u32 %s1890_s26, 4  ;;  %s1397_s29 = smov [#allocation2]   ;;  %s57_s27 = int_to_ptr.hbm [resolvable:$true] %s56_s27 }
  0x12   :  { %64 = dma.hbm_to_vmem [thread:$0]  %s57_s27, 6144, %s59_s28, [#allocation6], %s1394_s30, %s1394_s30, %s1395_s5  }
  0x13   :  { %s39_s0 = sshll.u32 %s1397_s29, 4  ;;  %s1398_s27 = smov [#allocation7]   ;;  %s40_s0 = int_to_ptr.vmem [resolvable:$true] %s39_s0 }
  0x14   :  { %s37_s25 = sshll.u32 %s1891_s2, 4  ;;  %s77_s28 = sshll.u32 %s1398_s27, 4  ;;  %s38_s25 = int_to_ptr.hbm [resolvable:$true] %s37_s25  ;;  %s78_s28 = int_to_ptr.vmem [resolvable:$true] %s77_s28 }
  0x15   :  { %45 = dma.hbm_to_vmem [thread:$0]  %s38_s25, 6144, %s40_s0, [#allocation3], %s1394_s30, %s1394_s30, %s1395_s5  }
  0x16   :  { %s109_s24 = sshll.u32 %s1876_s15, 4  ;;  %s128_s23 = sshll.u32 %s1880_s19, 4  ;;  %s110_s24 = int_to_ptr.hbm [resolvable:$true] %s109_s24  ;;  %s129_s23 = int_to_ptr.hbm [resolvable:$true] %s128_s23 }
  0x17   :  { %83 = dma.hbm_to_vmem [thread:$0]  %s76_s3, 2048, %s78_s28, [#allocation6], %s1394_s30, %s1394_s30, %s1395_s5  }
  0x18   :  { %s1399_s2 = smov [#allocation10]   ;;  %s1400_s25 = smov [#allocation11]  }
  0x19   :  { %s111_s11 = sshll.u32 %s1399_s2, 4  ;;  %s130_s15 = sshll.u32 %s1400_s25, 4  ;;  %s112_s11 = int_to_ptr.vmem [resolvable:$true] %s111_s11  ;;  %s131_s15 = int_to_ptr.vmem [resolvable:$true] %s130_s15 }
  0x1a   :  { %117 = dma.hbm_to_vmem [thread:$0]  %s110_s24, 6144, %s112_s11, [#allocation9], %s1394_s30, %s1394_s30, %s1395_s5  }
  0x1b   :  { %136 = dma.hbm_to_vmem [thread:$0]  %s129_s23, 2048, %s131_s15, [#allocation12], %s1394_s30, %s1394_s30, %s1395_s5  }
  0x1c   :  { %1383 = dma.done.wait [#allocation3], 6144  }
  0x1d   :  { %1384 = vsyncadd [#allocation3], 4294961152 }
  0x1e   :  { %1385 = dma.done.wait [#allocation6], 8192  }
  0x1f   :  { %1386 = vsyncadd [#allocation6], 4294959104 }
  0x20   :  { %1387 = dma.done.wait [#allocation9], 12288  }
  0x21   :  { %1388 = vsyncadd [#allocation9], 4294955008 }
  0x22   :  { %1389 = dma.done.wait [#allocation12], 2048  }
  0x23   :  { %1390 = vsyncadd [#allocation12], 4294965248  ;;  %v322_v0 = vld [vmem:[#allocation2 + $0x178] sm:$0xff]  ;;  %v321_v2 = vld [vmem:[#allocation2 + $0x170] sm:$0xff]  ;;  %v172_v27 = vlaneseq  ;;  %s1892_s3 = sld [smem:[#allocation19_spill]]  ;;  %vm167_vm0 = vcmask 64512  }
  0x24   :  { %v290_v1 = vld [vmem:[#allocation2 + $0x78] sm:$0xff]  ;;  %385 = vmatpush.msra.mxu2 %v322_v0  ;;  %v289_v3 = vld [vmem:[#allocation2 + $0x70] sm:$0xff]  ;;  %v320_v5 = vld [vmem:[#allocation2 + $0x168] sm:$0xff]  ;;  %s1893_s4 = sld [smem:[#allocation21_spill]] }
  0x25   :  { %327 = vmatpush.msra.mxu0 %v290_v1  ;;  %v306_v4 = vld [vmem:[#allocation2 + $0xf8] sm:$0xff]  ;;  %v288_v6 = vld [vmem:[#allocation2 + $0x68] sm:$0xff]  ;;  %v305_v7 = vld [vmem:[#allocation2 + $0xf0] sm:$0xff]  ;;  %v1558_v39 = vshrl.u32 %v172_v27, 7  ;;  %s1894_s11 = sld [smem:[#allocation22_spill]] }
  0x26   :  { %356 = vmatpush.msra.mxu1 %v306_v4  ;;  %386 = vmatpush.msra.mxu2 %v321_v2  ;;  %v304_v8 = vld [vmem:[#allocation2 + $0xe8] sm:$0xff]  ;;  %v319_v9 = vld [vmem:[#allocation2 + $0x160] sm:$0xff]  ;;  %v318_v12 = vld [vmem:[#allocation2 + $0x158] sm:$0xff]  ;;  %s1895_s19 = sld [smem:[#allocation23_spill]] }
  0x27   :  { %328 = vmatpush.msra.mxu0 %v289_v3  ;;  %v287_v10 = vld [vmem:[#allocation2 + $0x60] sm:$0xff]  ;;  %v286_v13 = vld [vmem:[#allocation2 + $0x58] sm:$0xff]  ;;  %v317_v15 = vld [vmem:[#allocation2 + $0x150] sm:$0xff]  ;;  %v1567_v49 = vand.u32 15, %v1558_v39  ;;  %vm229_vm1 = vcmp.lt.s32.totalorder %v1558_v39, 2  ;;  %vm254_vm2 = vcmp.lt.s32.totalorder %v1558_v39, 1 }
  0x28   :  { %357 = vmatpush.msra.mxu1 %v305_v7  ;;  %387 = vmatpush.msra.mxu2 %v320_v5  ;;  %v303_v11 = vld [vmem:[#allocation2 + $0xe0] sm:$0xff]  ;;  %v302_v14 = vld [vmem:[#allocation2 + $0xd8] sm:$0xff]  ;;  %v285_v16 = vld [vmem:[#allocation2 + $0x50] sm:$0xff]  ;;  %vm678_vm8 = vcmp.lt.s32.totalorder %v1558_v39, 4 }
  0x29   :  { %329 = vmatpush.msra.mxu0 %v288_v6  ;;  %v301_v17 = vld [vmem:[#allocation2 + $0xd0] sm:$0xff]  ;;  %v316_v18 = vld [vmem:[#allocation2 + $0x148] sm:$0xff]  ;;  %v315_v21 = vld [vmem:[#allocation2 + $0x140] sm:$0xff]  ;;  %vm234_vm3 = vcmp.ge.s32.totalorder %v1567_v49, 2  ;;  %vm259_vm4 = vcmp.ge.s32.totalorder %v1567_v49, 1  ;;  %v175_v6 = vadd.s32 16, %v1558_v39 }
  0x2a   :  { %358 = vmatpush.msra.mxu1 %v304_v8  ;;  %388 = vmatpush.msra.mxu2 %v319_v9  ;;  %v284_v19 = vld [vmem:[#allocation2 + $0x48] sm:$0xff]  ;;  %v283_v22 = vld [vmem:[#allocation2 + $0x40] sm:$0xff]  ;;  %v314_v24 = vld [vmem:[#allocation2 + $0x138] sm:$0xff]  ;;  %vm683_vm7 = vcmp.ge.s32.totalorder %v1567_v49, 4 }
  0x2b   :  { %330 = vmatpush.msra.mxu0 %v287_v10  ;;  %v300_v20 = vld [vmem:[#allocation2 + $0xc8] sm:$0xff]  ;;  %v299_v23 = vld [vmem:[#allocation2 + $0xc0] sm:$0xff]  ;;  %v282_v25 = vld [vmem:[#allocation2 + $0x38] sm:$0xff] }
  0x2c   :  { %359 = vmatpush.msra.mxu1 %v303_v11  ;;  %389 = vmatpush.msra.mxu2 %v318_v12  ;;  %v298_v26 = vld [vmem:[#allocation2 + $0xb8] sm:$0xff]  ;;  %v313_v28 = vld [vmem:[#allocation2 + $0x130] sm:$0xff]  ;;  %v312_v30 = vld [vmem:[#allocation2 + $0x128] sm:$0xff]  ;;  %v1608_v12 = vand.u32 15, %v175_v6 }
  0x2d   :  { %331 = vmatpush.msra.mxu0 %v286_v13  ;;  %v281_v29 = vld [vmem:[#allocation2 + $0x30] sm:$0xff]  ;;  %v280_v31 = vld [vmem:[#allocation2 + $0x28] sm:$0xff]  ;;  %v311_v33 = vld [vmem:[#allocation2 + $0x120] sm:$0xff] }
  0x2e   :  { %360 = vmatpush.msra.mxu1 %v302_v14  ;;  %390 = vmatpush.msra.mxu2 %v317_v15  ;;  %v297_v32 = vld [vmem:[#allocation2 + $0xb0] sm:$0xff]  ;;  %v279_v34 = vld [vmem:[#allocation2 + $0x20] sm:$0xff]  ;;  %v1556_v36 = vld [vmem:[%s1892_s3 + $0x18] sm:$0xff]  ;;  %vm236_vm5 = vcmp.ge.s32.totalorder %v1608_v12, 2  ;;  %vm261_vm6 = vcmp.ge.s32.totalorder %v1608_v12, 1  ;;  %vm685_vm9 = vcmp.ge.s32.totalorder %v1608_v12, 4 }
  0x2f   :  { %332 = vmatpush.msra.mxu0 %v285_v16  ;;  %v1551_v35 = vld [vmem:[%s1892_s3] sm:$0xff]  ;;  %v296_v37 = vld [vmem:[#allocation2 + $0xa8] sm:$0xff]  ;;  %v310_v40 = vld [vmem:[#allocation2 + $0x118] sm:$0xff]  ;;  %v1564_v44 = vsel %vm167_vm0, %v1556_v36, 0.0 }
  0x30   :  { %361 = vmatpush.msra.mxu1 %v301_v17  ;;  %391 = vmatpush.msra.mxu2 %v316_v18  ;;  %v295_v38 = vld [vmem:[#allocation2 + $0xa0] sm:$0xff]  ;;  %v278_v41 = vld [vmem:[#allocation2 + $0x18] sm:$0xff]  ;;  %v168_v43 = vsel %vm167_vm0, %v1551_v35, 0.0  ;;  %v309_v45 = vld [vmem:[#allocation2 + $0x110] sm:$0xff]  ;;  %v228_v50 = vrot.slane %v1564_v44, 6  ;;  %v253_v55 = vrot.slane %v1564_v44, 7 }
  0x31   :  { %333 = vmatpush.msra.mxu0 %v284_v19  ;;  %v294_v42 = vld [vmem:[#allocation2 + $0x98] sm:$0xff]  ;;  %v277_v46 = vld [vmem:[#allocation2 + $0x10] sm:$0xff]  ;;  %v225_v48 = vrot.slane %v168_v43, 6  ;;  %v308_v51 = vld [vmem:[#allocation2 + $0x108] sm:$0xff]  ;;  %v250_v53 = vrot.slane %v168_v43, 7 }
  0x32   :  { %362 = vmatpush.msra.mxu1 %v300_v20  ;;  %392 = vmatpush.msra.mxu2 %v315_v21  ;;  %v293_v47 = vld [vmem:[#allocation2 + $0x90] sm:$0xff]  ;;  %v276_v52 = vld [vmem:[#allocation2 + $0x8] sm:$0xff]  ;;  %v307_v57 = vld [vmem:[#allocation2 + $0x100] sm:$0xff] }
  0x33   :  { %334 = vmatpush.msra.mxu0 %v283_v22  ;;  %v292_v54 = vld [vmem:[#allocation2 + $0x88] sm:$0xff]  ;;  %v275_v58 = vld [vmem:[#allocation2] sm:$0xff]  ;;  %v233_v59 = vsel %vm229_vm1, %v228_v50, %v225_v48  ;;  %v258_v62 = vsel %vm254_vm2, %v253_v55, %v250_v53  ;;  %v505_v63 = vld [vmem:[#allocation5 + $0x178] sm:$0xff] }
  0x34   :  { %363 = vmatpush.msra.mxu1 %v299_v23  ;;  %393 = vmatpush.msra.mxu2 %v314_v24  ;;  %v1575_v56 = vld [vmem:[%s1892_s3 + $0x8] sm:$0xff]  ;;  %v291_v60 = vld [vmem:[#allocation2 + $0x80] sm:$0xff]  ;;  %v504_v1 = vld [vmem:[#allocation5 + $0x170] sm:$0xff] }
  0x35   :  { %335 = vmatpush.msra.mxu0 %v282_v25  ;;  %v169_v61 = vsel %vm167_vm0, %v1575_v56, 0.0  ;;  %v1597_v3 = vld [vmem:[%s1892_s3 + $0x10] sm:$0xff]  ;;  %v503_v4 = vld [vmem:[#allocation5 + $0x168] sm:$0xff]  ;;  %v502_v8 = vld [vmem:[#allocation5 + $0x160] sm:$0xff] }
  0x36   :  { %364 = vmatpush.msra.mxu1 %v298_v26  ;;  %394 = vmatpush.msra.mxu2 %v313_v28  ;;  %v226_v0 = vrot.slane %v169_v61, 6  ;;  %v251_v2 = vrot.slane %v169_v61, 7  ;;  %v170_v7 = vsel %vm167_vm0, %v1597_v3, 0.0  ;;  %v501_v10 = vld [vmem:[#allocation5 + $0x158] sm:$0xff]  ;;  %v500_v13 = vld [vmem:[#allocation5 + $0x150] sm:$0xff]  ;;  %v499_v15 = vld [vmem:[#allocation5 + $0x148] sm:$0xff] }
  0x37   :  { %336 = vmatpush.msra.mxu0 %v281_v29  ;;  %v227_v11 = vrot.slane %v170_v7, 6  ;;  %v252_v14 = vrot.slane %v170_v7, 7  ;;  %v498_v17 = vld [vmem:[#allocation5 + $0x140] sm:$0xff]  ;;  %v497_v19 = vld [vmem:[#allocation5 + $0x138] sm:$0xff]  ;;  %v496_v22 = vld [vmem:[#allocation5 + $0x130] sm:$0xff] }
  0x38   :  { %365 = vmatpush.msra.mxu1 %v297_v32  ;;  %395 = vmatpush.msra.mxu2 %v312_v30  ;;  %v232_v5 = vsel %vm229_vm1, %v225_v48, %v226_v0  ;;  %v257_v9 = vsel %vm254_vm2, %v250_v53, %v251_v2  ;;  %v495_v23 = vld [vmem:[#allocation5 + $0x128] sm:$0xff]  ;;  %v494_v24 = vld [vmem:[#allocation5 + $0x120] sm:$0xff]  ;;  %v493_v25 = vld [vmem:[#allocation5 + $0x118] sm:$0xff] }
  0x39   :  { %337 = vmatpush.msra.mxu0 %v280_v31  ;;  %v231_v16 = vsel %vm229_vm1, %v226_v0, %v227_v11  ;;  %v256_v18 = vsel %vm254_vm2, %v251_v2, %v252_v14  ;;  %v230_v20 = vsel %vm229_vm1, %v227_v11, %v228_v50  ;;  %v255_v21 = vsel %vm254_vm2, %v252_v14, %v253_v55  ;;  %v492_v26 = vld [vmem:[#allocation5 + $0x110] sm:$0xff]  ;;  %v473_v27 = vld [vmem:[#allocation5 + $0x78] sm:$0xff]  ;;  %v491_v29 = vld [vmem:[#allocation5 + $0x108] sm:$0xff] }
  0x3a   :  { %366 = vmatpush.msra.mxu1 %v296_v37  ;;  %396 = vmatpush.msra.mxu2 %v311_v33  ;;  %v489_v28 = vld [vmem:[#allocation5 + $0xf8] sm:$0xff]  ;;  %v472_v30 = vld [vmem:[#allocation5 + $0x70] sm:$0xff]  ;;  %v490_v32 = vld [vmem:[#allocation5 + $0x100] sm:$0xff] }
  0x3b   :  { %338 = vmatpush.msra.mxu0 %v279_v34  ;;  %510 = vmatpush.msra.mxu3 %v473_v27  ;;  %v488_v31 = vld [vmem:[#allocation5 + $0xf0] sm:$0xff]  ;;  %v471_v33 = vld [vmem:[#allocation5 + $0x68] sm:$0xff]  ;;  %v470_v37 = vld [vmem:[#allocation5 + $0x60] sm:$0xff] }
  0x3c   :  { %367 = vmatpush.msra.mxu1 %v295_v38  ;;  %397 = vmatpush.msra.mxu2 %v310_v40  ;;  %v487_v34 = vld [vmem:[#allocation5 + $0xe8] sm:$0xff]  ;;  %v486_v38 = vld [vmem:[#allocation5 + $0xe0] sm:$0xff]  ;;  %v469_v40 = vld [vmem:[#allocation5 + $0x58] sm:$0xff] }
  0x3d   :  { %339 = vmatpush.msra.mxu0 %v278_v41  ;;  %511 = vmatpush.msra.mxu3 %v472_v30  ;;  %v485_v41 = vld [vmem:[#allocation5 + $0xd8] sm:$0xff]  ;;  %v468_v43 = vld [vmem:[#allocation5 + $0x50] sm:$0xff]  ;;  %v630_v48 = vld [vmem:[#allocation7 + $0x68] sm:$0xff] }
  0x3e   :  { %368 = vmatpush.msra.mxu1 %v294_v42  ;;  %398 = vmatpush.msra.mxu2 %v309_v45  ;;  %v632_v42 = vld [vmem:[#allocation7 + $0x78] sm:$0xff]  ;;  %v484_v44 = vld [vmem:[#allocation5 + $0xd0] sm:$0xff]  ;;  %v466_v50 = vld [vmem:[#allocation5 + $0x40] sm:$0xff] }
  0x3f   :  { %340 = vmatpush.msra.mxu0 %v277_v46  ;;  %512 = vmatpush.msra.mxu3 %v471_v33  ;;  %v631_v45 = vld [vmem:[#allocation7 + $0x70] sm:$0xff]  ;;  %v467_v46 = vld [vmem:[#allocation5 + $0x48] sm:$0xff]  ;;  %v465_v53 = vld [vmem:[#allocation5 + $0x38] sm:$0xff] }
  0x40   :  { %369 = vmatpush.msra.mxu1 %v293_v47  ;;  %399 = vmatpush.msra.mxu2 %v308_v51  ;;  %v483_v47 = vld [vmem:[#allocation5 + $0xc8] sm:$0xff]  ;;  %v482_v51 = vld [vmem:[#allocation5 + $0xc0] sm:$0xff]  ;;  %v628_v55 = vld [vmem:[#allocation7 + $0x58] sm:$0xff] }
  0x41   :  { %341 = vmatpush.msra.mxu0 %v276_v52  ;;  %513 = vmatpush.msra.mxu3 %v470_v37  ;;  %v629_v52 = vld [vmem:[#allocation7 + $0x60] sm:$0xff]  ;;  %v463_v61 = vld [vmem:[#allocation5 + $0x28] sm:$0xff]  ;;  %v461_v7 = vld [vmem:[#allocation5 + $0x18] sm:$0xff] }
  0x42   :  { %370 = vmatpush.msra.mxu1 %v292_v54  ;;  %400 = vmatpush.msra.mxu2 %v307_v57  ;;  %v481_v54 = vld [vmem:[#allocation5 + $0xb8] sm:$0xff]  ;;  %v464_v57 = vld [vmem:[#allocation5 + $0x30] sm:$0xff]  ;;  %v626_v0 = vld [vmem:[#allocation7 + $0x48] sm:$0xff] }
  0x43   :  { %342 = vmatpush.msra.mxu0 %v275_v58  ;;  %1140 = vmatmul.msk.f32.vlgmr.msra.gmra.mxu2 %vm167_vm0, %v1551_v35  ;;  %v480_v58 = vld [vmem:[#allocation5 + $0xb0] sm:$0xff]  ;;  %v478_v2 = vld [vmem:[#allocation5 + $0xa0] sm:$0xff]  ;;  %v618_v37 = vld [vmem:[#allocation7 + $0x8] sm:$0xff] }
  0x44   :  { %1136 = vmatmul.msk.f32.vlgmr.msra.gmra.mxu0 %vm234_vm3, %v233_v59  ;;  %371 = vmatpush.msra.mxu1 %v291_v60  ;;  %v1633_v59 = vld [vmem:[%s1893_s4] ss:$0 sm:$0xff]  ;;  %v627_v60 = vld [vmem:[#allocation7 + $0x50] sm:$0xff]  ;;  %v1072_v12 = vld [vmem:[#allocation11 + $0x58] sm:$0xff] }
  0x45   :  { %1138 = vmatmul.msk.f32.vlgmr.msra.gmra.mxu1 %vm259_vm4, %v258_v62  ;;  %539 = vmatpush.msrb.mxu0 %v489_v28  ;;  %v479_v62 = vld [vmem:[#allocation5 + $0xa8] sm:$0xff]  ;;  %v625_v6 = vld [vmem:[#allocation7 + $0x40] sm:$0xff]  ;;  %v460_v11 = vld [vmem:[#allocation5 + $0x10] sm:$0xff] }
  0x46   :  { %568 = vmatpush.msrb.mxu1 %v505_v63  ;;  %514 = vmatpush.msra.mxu3 %v469_v40  ;;  %v623_v14 = vld [vmem:[#allocation7 + $0x30] sm:$0xff]  ;;  %v621_v28 = vld [vmem:[#allocation7 + $0x20] sm:$0xff]  ;;  %v1070_v39 = vld [vmem:[#allocation11 + $0x48] sm:$0xff] }
  0x47   :  { %540 = vmatpush.msrb.mxu0 %v488_v31  ;;  %637 = vmatpush.msrb.mxu2 %v632_v42 }
  0x48   :  { %569 = vmatpush.msrb.mxu1 %v504_v1  ;;  %515 = vmatpush.msra.mxu3 %v468_v43  ;;  %v462_v1 = vld [vmem:[#allocation5 + $0x20] sm:$0xff] }
  0x49   :  { %541 = vmatpush.msrb.mxu0 %v487_v34  ;;  %638 = vmatpush.msrb.mxu2 %v631_v45 }
  0x4a   :  { %570 = vmatpush.msrb.mxu1 %v503_v4  ;;  %516 = vmatpush.msra.mxu3 %v467_v46 }
  0x4b   :  { %1141 = vmatmul.msk.f32.gmra.mxu2 %vm167_vm0, %v1575_v56  ;;  %542 = vmatpush.msrb.mxu0 %v486_v38 }
  0x4c   :  { %346 = vmatmul.f32.gmra.mxu0 %v232_v5  ;;  %571 = vmatpush.msrb.mxu1 %v502_v8  ;;  %v477_v8 = vld [vmem:[#allocation5 + $0x98] sm:$0xff] }
  0x4d   :  { %375 = vmatmul.f32.gmra.mxu1 %v257_v9  ;;  %543 = vmatpush.msrb.mxu0 %v485_v41 }
  0x4e   :  { %572 = vmatpush.msrb.mxu1 %v501_v10  ;;  %639 = vmatpush.msrb.mxu2 %v630_v48  ;;  %v624_v10 = vld [vmem:[#allocation7 + $0x38] sm:$0xff] }
  0x4f   :  { %544 = vmatpush.msrb.mxu0 %v484_v44  ;;  %517 = vmatpush.msra.mxu3 %v466_v50  ;;  %v617_v44 = vld [vmem:[#allocation7] sm:$0xff] }
  0x50   :  { %573 = vmatpush.msrb.mxu1 %v500_v13  ;;  %640 = vmatpush.msrb.mxu2 %v629_v52  ;;  %v476_v13 = vld [vmem:[#allocation5 + $0x90] sm:$0xff] }
  0x51   :  { %545 = vmatpush.msrb.mxu0 %v483_v47  ;;  %518 = vmatpush.msra.mxu3 %v465_v53 }
  0x52   :  { %574 = vmatpush.msrb.mxu1 %v499_v15  ;;  %641 = vmatpush.msrb.mxu2 %v628_v55  ;;  %v459_v15 = vld [vmem:[#allocation5 + $0x8] sm:$0xff] }
  0x53   :  { %1142 = vmatmul.msk.f32.gmra.mxu2 %vm167_vm0, %v1597_v3  ;;  %546 = vmatpush.msrb.mxu0 %v482_v51 }
  0x54   :  { %1137 = vmatmul.msk.f32.gmra.mxu0 %vm236_vm5, %v231_v16  ;;  %575 = vmatpush.msrb.mxu1 %v498_v17  ;;  %v475_v16 = vld [vmem:[#allocation5 + $0x88] sm:$0xff] }
  0x55   :  { %1139 = vmatmul.msk.f32.gmra.mxu1 %vm261_vm6, %v256_v18  ;;  %547 = vmatpush.msrb.mxu0 %v481_v54  ;;  %v1202_v18 = vld [vmem:[%s1894_s11] ss:$0 sm:$0xff] }
  0x56   :  { %576 = vmatpush.msrb.mxu1 %v497_v19  ;;  %519 = vmatpush.msra.mxu3 %v464_v57 }
  0x57   :  { %548 = vmatpush.msrb.mxu0 %v480_v58  ;;  %642 = vmatpush.msrb.mxu2 %v627_v60 }
  0x58   :  { %577 = vmatpush.msrb.mxu1 %v496_v22  ;;  %520 = vmatpush.msra.mxu3 %v463_v61  ;;  %v474_v22 = vld [vmem:[#allocation5 + $0x80] sm:$0xff] }
  0x59   :  { %549 = vmatpush.msrb.mxu0 %v479_v62  ;;  %643 = vmatpush.msrb.mxu2 %v626_v0 }
  0x5a   :  { %578 = vmatpush.msrb.mxu1 %v495_v23  ;;  %521 = vmatpush.msra.mxu3 %v462_v1 }
  0x5b   :  { %1143 = vmatmul.msk.f32.gmra.mxu2 %vm167_vm0, %v1556_v36  ;;  %550 = vmatpush.msrb.mxu0 %v478_v2 }
  0x5c   :  { %352 = vmatmul.f32.gmra.mxu0 %v230_v20  ;;  %579 = vmatpush.msrb.mxu1 %v494_v24  ;;  %v622_v20 = vld [vmem:[#allocation7 + $0x28] sm:$0xff] }
  0x5d   :  { %381 = vmatmul.f32.gmra.mxu1 %v255_v21  ;;  %644 = vmatpush.msrb.mxu2 %v625_v6  ;;  %v458_v21 = vld [vmem:[#allocation5] sm:$0xff] }
  0x5e   :  { %580 = vmatpush.msrb.mxu1 %v493_v25  ;;  %522 = vmatpush.msra.mxu3 %v461_v7 }
  0x5f   :  { %551 = vmatpush.msrb.mxu0 %v477_v8  ;;  %645 = vmatpush.msrb.mxu2 %v624_v10 }
  0x60   :  { %581 = vmatpush.msrb.mxu1 %v492_v26  ;;  %523 = vmatpush.msra.mxu3 %v460_v11  ;;  %v1203_v26 = vld [vmem:[%s1895_s19] ss:$0 sm:$0xff]  ;;  %s1120_s19 = sshll.u32 %s1882_s21, 4  ;;  %s1121_s19 = int_to_ptr.hbm [resolvable:$true] %s1120_s19 }
  0x61   :  { %552 = vmatpush.msrb.mxu0 %v476_v13  ;;  %646 = vmatpush.msrb.mxu2 %v623_v14  ;;  %v758_v14 = vld [vmem:[#allocation8 + $0x178] sm:$0xff] }
  0x62   :  { %582 = vmatpush.msrb.mxu1 %v491_v29  ;;  %524 = vmatpush.msra.mxu3 %v459_v15  ;;  %v620_v29 = vld [vmem:[#allocation7 + $0x18] sm:$0xff]  ;;  %v757_v15 = vld [vmem:[#allocation8 + $0x170] sm:$0xff] }
  0x63   :  { %553 = vmatpush.msrb.mxu0 %v475_v16  ;;  %647 = vmatpush.msrb.mxu2 %v622_v20  ;;  %v756_v16 = vld [vmem:[#allocation8 + $0x168] sm:$0xff] }
  0x64   :  { %583 = vmatpush.msrb.mxu1 %v490_v32  ;;  %525 = vmatpush.msra.mxu3 %v458_v21  ;;  %v619_v32 = vld [vmem:[#allocation7 + $0x10] sm:$0xff]  ;;  %v752_v20 = vld [vmem:[#allocation8 + $0x148] sm:$0xff]  ;;  %v751_v21 = vld [vmem:[#allocation8 + $0x140] sm:$0xff] }
  0x65   :  { %554 = vmatpush.msrb.mxu0 %v474_v22  ;;  %648 = vmatpush.msrb.mxu2 %v621_v28  ;;  %v750_v22 = vld [vmem:[#allocation8 + $0x138] sm:$0xff] }
  0x66   :  { %821 = vmatpush.msra.mxu1 %v758_v14  ;;  %v726_v28 = vld [vmem:[#allocation8 + $0x78] sm:$0xff] }
  0x67   :  { %649 = vmatpush.msrb.mxu2 %v620_v29  ;;  %v742_v29 = vld [vmem:[#allocation8 + $0xf8] sm:$0xff]  ;;  %763 = vmatpush.msrb.mxu3 %v726_v28 }
  0x68   :  { %822 = vmatpush.msra.mxu1 %v757_v15  ;;  %792 = vmatpush.msra.mxu0 %v742_v29 }
  0x69   :  { %650 = vmatpush.msrb.mxu2 %v619_v32  ;;  %v741_v32 = vld [vmem:[#allocation8 + $0xf0] sm:$0xff] }
  0x6a   :  { %823 = vmatpush.msra.mxu1 %v756_v16  ;;  %793 = vmatpush.msra.mxu0 %v741_v32 }
  0x6b   :  { %651 = vmatpush.msrb.mxu2 %v618_v37  ;;  %v740_v37 = vld [vmem:[#allocation8 + $0xe8] sm:$0xff] }
  0x6c   :  { %794 = vmatpush.msra.mxu0 %v740_v37 }
  0x6d   :  { %652 = vmatpush.msrb.mxu2 %v617_v44  ;;  %v737_v44 = vld [vmem:[#allocation8 + $0xd0] sm:$0xff] }
  0x6e   :  { %1148 = vmatmul.msk.f32.vlgmr.msrb.gmra.mxu2 %vm167_vm0, %v1551_v35 }
  0x76   :  { %1149 = vmatmul.msk.f32.gmra.mxu2 %vm167_vm0, %v1575_v56 }
  0x7e   :  { %1150 = vmatmul.msk.f32.gmra.mxu2 %vm167_vm0, %v1597_v3 }
  0x86   :  { %1151 = vmatmul.msk.f32.gmra.mxu2 %vm167_vm0, %v1556_v36 }
  0xc1   :  { %v344_v63 = vpop.f32.mrf.mxu0 }
  0xc2   :  { %v345_v4 = vadd.f32 %v1633_v59, %v344_v63  ;;  %v373_v5 = vpop.f32.mrf.mxu1 }
  0xc4   :  { %v374_v9 = vadd.f32 %v373_v5, %v345_v4 }
  0xc6   :  { %v402_v17 = vpop.f32.mrf.mxu2 }
  0xc7   :  { %v403_v19 = vadd.f32 %v402_v17, %v374_v9  ;;  %v755_v17 = vld [vmem:[#allocation8 + $0x160] sm:$0xff] }
  0xc8   :  { %824 = vmatpush.msra.mxu1 %v755_v17  ;;  %v711_v17 = vld [vmem:[#allocation8] sm:$0xff] }
  0xc9   :  { %v347_v23 = vpop.f32.mrf.mxu0  ;;  %v414_v24 = vmax.f32 %v403_v19, 0.0  ;;  %v753_v19 = vld [vmem:[#allocation8 + $0x150] sm:$0xff] }
  0xca   :  { %v348_v25 = vadd.f32 %v1633_v59, %v347_v23  ;;  %v376_v27 = vpop.f32.mrf.mxu1  ;;  %v749_v23 = vld [vmem:[#allocation8 + $0x130] sm:$0xff] }
  0xcb   :  { %v422_v30 = vmul.f32 %v1202_v18, %v414_v24  ;;  %v748_v24 = vld [vmem:[#allocation8 + $0x128] sm:$0xff] }
  0xcc   :  { %v377_v31 = vadd.f32 %v376_v27, %v348_v25  ;;  %v747_v25 = vld [vmem:[#allocation8 + $0x120] sm:$0xff]  ;;  %v745_v27 = vld [vmem:[#allocation8 + $0x110] sm:$0xff] }
  0xcd   :  { %v430_v33 = vadd.f32 %v1203_v26, %v422_v30  ;;  %v744_v30 = vld [vmem:[#allocation8 + $0x108] sm:$0xff] }
  0xce   :  { %v405_v34 = vpop.f32.mrf.mxu2 }
  0xcf   :  { %v406_v38 = vadd.f32 %v405_v34, %v377_v31  ;;  %584 = vmatmul.f32.vlgmr.msrb.gmra.mxu1 %v430_v33  ;;  %v434_v0 = vrot.slane %v430_v33, 6  ;;  %v725_v31 = vld [vmem:[#allocation8 + $0x70] sm:$0xff]  ;;  %v724_v34 = vld [vmem:[#allocation8 + $0x68] sm:$0xff] }
  0xd0   :  { %764 = vmatpush.msrb.mxu3 %v725_v31 }
  0xd1   :  { %v350_v40 = vpop.f32.mrf.mxu0  ;;  %v415_v41 = vmax.f32 %v406_v38, 0.0  ;;  %v723_v38 = vld [vmem:[#allocation8 + $0x60] sm:$0xff] }
  0xd2   :  { %v351_v42 = vadd.f32 %v1633_v59, %v350_v40  ;;  %v379_v43 = vpop.f32.mrf.mxu1  ;;  %765 = vmatpush.msrb.mxu3 %v724_v34  ;;  %v739_v40 = vld [vmem:[#allocation8 + $0xe0] sm:$0xff] }
  0xd3   :  { %v423_v45 = vmul.f32 %v1202_v18, %v415_v41  ;;  %795 = vmatpush.msra.mxu0 %v739_v40  ;;  %v722_v41 = vld [vmem:[#allocation8 + $0x58] sm:$0xff] }
  0xd4   :  { %v380_v46 = vadd.f32 %v379_v43, %v351_v42  ;;  %766 = vmatpush.msrb.mxu3 %v723_v38  ;;  %v738_v42 = vld [vmem:[#allocation8 + $0xd8] sm:$0xff]  ;;  %v721_v43 = vld [vmem:[#allocation8 + $0x50] sm:$0xff] }
  0xd5   :  { %v431_v47 = vadd.f32 %v1203_v26, %v423_v45  ;;  %796 = vmatpush.msra.mxu0 %v738_v42  ;;  %v720_v45 = vld [vmem:[#allocation8 + $0x48] sm:$0xff] }
  0xd6   :  { %v408_v48 = vpop.f32.mrf.mxu2  ;;  %767 = vmatpush.msrb.mxu3 %v722_v41 }
  0xd7   :  { %v409_v50 = vadd.f32 %v408_v48, %v380_v46  ;;  %587 = vmatmul.f32.gmra.mxu1 %v431_v47  ;;  %v435_v3 = vrot.slane %v431_v47, 6  ;;  %v447_v5 = vrot.slane %v431_v47, 7  ;;  %797 = vmatpush.msra.mxu0 %v737_v44  ;;  %v736_v46 = vld [vmem:[#allocation8 + $0xc8] sm:$0xff]  ;;  %v719_v47 = vld [vmem:[#allocation8 + $0x40] sm:$0xff] }
  0xd8   :  { %768 = vmatpush.msrb.mxu3 %v721_v43  ;;  %v735_v48 = vld [vmem:[#allocation8 + $0xc0] sm:$0xff] }
  0xd9   :  { %v353_v51 = vpop.f32.mrf.mxu0  ;;  %v416_v52 = vmax.f32 %v409_v50, 0.0  ;;  %v440_v6 = vsel %vm229_vm1, %v434_v0, %v435_v3  ;;  %798 = vmatpush.msra.mxu0 %v736_v46 }
  0xda   :  { %v354_v53 = vadd.f32 %v1633_v59, %v353_v51  ;;  %v382_v54 = vpop.f32.mrf.mxu1  ;;  %v446_v59 = vrot.slane %v430_v33, 7  ;;  %v743_v33 = vld [vmem:[#allocation8 + $0x100] sm:$0xff]  ;;  %769 = vmatpush.msrb.mxu3 %v720_v45  ;;  %v718_v51 = vld [vmem:[#allocation8 + $0x38] sm:$0xff] }
  0xdb   :  { %v424_v55 = vmul.f32 %v1202_v18, %v416_v52  ;;  %799 = vmatpush.msra.mxu0 %v735_v48  ;;  %v734_v52 = vld [vmem:[#allocation8 + $0xb8] sm:$0xff] }
  0xdc   :  { %v383_v57 = vadd.f32 %v382_v54, %v354_v53  ;;  %v452_v7 = vsel %vm254_vm2, %v446_v59, %v447_v5  ;;  %770 = vmatpush.msrb.mxu3 %v719_v47  ;;  %v1680_v53 = vld [vmem:[%s1867_s6] ss:$0 sm:$0xff] }
  0xdd   :  { %v432_v58 = vadd.f32 %v1203_v26, %v424_v55  ;;  %800 = vmatpush.msra.mxu0 %v734_v52  ;;  %v717_v55 = vld [vmem:[#allocation8 + $0x30] sm:$0xff] }
  0xde   :  { %v411_v60 = vpop.f32.mrf.mxu2  ;;  %771 = vmatpush.msrb.mxu3 %v718_v51 }
  0xdf   :  { %v412_v61 = vadd.f32 %v411_v60, %v383_v57  ;;  %590 = vmatmul.f32.gmra.mxu1 %v432_v58  ;;  %v436_v8 = vrot.slane %v432_v58, 6  ;;  %v448_v9 = vrot.slane %v432_v58, 7  ;;  %v733_v57 = vld [vmem:[#allocation8 + $0xb0] sm:$0xff]  ;;  %v716_v58 = vld [vmem:[#allocation8 + $0x28] sm:$0xff] }
  0xe0   :  { %772 = vmatpush.msrb.mxu3 %v717_v55  ;;  %801 = vmatpush.msra.mxu0 %v733_v57  ;;  %v732_v60 = vld [vmem:[#allocation8 + $0xa8] sm:$0xff] }
  0xe1   :  { %v417_v62 = vmax.f32 %v412_v61, 0.0  ;;  %v439_v10 = vsel %vm229_vm1, %v435_v3, %v436_v8  ;;  %v451_v11 = vsel %vm254_vm2, %v447_v5, %v448_v9  ;;  %v1207_v3 = vld [vmem:[%s1871_s10] ss:$0 sm:$0xff] }
  0xe2   :  { %773 = vmatpush.msrb.mxu3 %v716_v58  ;;  %802 = vmatpush.msra.mxu0 %v732_v60 }
  0xe3   :  { %v425_v35 = vmul.f32 %v1202_v18, %v417_v62  ;;  %v754_v18 = vld [vmem:[#allocation8 + $0x158] sm:$0xff] }
  0xe4   :  { %825 = vmatpush.msra.mxu1 %v754_v18  ;;  %v727_v18 = vld [vmem:[#allocation8 + $0x80] sm:$0xff] }
  0xe5   :  { %v433_v63 = vadd.f32 %v1203_v26, %v425_v35  ;;  %v746_v26 = vld [vmem:[#allocation8 + $0x118] sm:$0xff] }
  0xe6   :  { %826 = vmatpush.msra.mxu1 %v753_v19 }
  0xe7   :  { %593 = vmatmul.f32.gmra.mxu1 %v433_v63  ;;  %v437_v1 = vrot.slane %v433_v63, 6  ;;  %v449_v2 = vrot.slane %v433_v63, 7  ;;  %v715_v63 = vld [vmem:[#allocation8 + $0x20] sm:$0xff] }
  0xe8   :  { %827 = vmatpush.msra.mxu1 %v752_v20  ;;  %774 = vmatpush.msrb.mxu3 %v715_v63 }
  0xe9   :  { %v441_v4 = vsel %vm229_vm1, %v437_v1, %v434_v0  ;;  %v453_v56 = vsel %vm254_vm2, %v449_v2, %v446_v59  ;;  %v438_v36 = vsel %vm229_vm1, %v436_v8, %v437_v1  ;;  %v450_v13 = vsel %vm254_vm2, %v448_v9, %v449_v2  ;;  %v731_v0 = vld [vmem:[#allocation8 + $0xa0] sm:$0xff]  ;;  %v714_v59 = vld [vmem:[#allocation8 + $0x18] sm:$0xff] }
  0xea   :  { %1144 = vmatmul.msk.f32.vlgmr.msra.gmra.mxu3 %vm234_vm3, %v441_v4  ;;  %1146 = vmatmul.msk.f32.vlgmr.msrb.gmra.mxu0 %vm259_vm4, %v453_v56  ;;  %v730_v2 = vld [vmem:[#allocation8 + $0x98] sm:$0xff]  ;;  %v1205_v56 = vld [vmem:[%s1868_s7] ss:$0 sm:$0xff] }
  0xeb   :  { %828 = vmatpush.msra.mxu1 %v751_v21  ;;  %803 = vmatpush.msra.mxu0 %v731_v0  ;;  %v1206_v9 = vld [vmem:[%s1869_s8] ss:$0 sm:$0xff] }
  0xec   :  { %775 = vmatpush.msrb.mxu3 %v714_v59 }
  0xed   :  { %829 = vmatpush.msra.mxu1 %v750_v22  ;;  %804 = vmatpush.msra.mxu0 %v730_v2 }
  0xef   :  { %830 = vmatpush.msra.mxu1 %v749_v23 }
  0xf1   :  { %831 = vmatpush.msra.mxu1 %v748_v24  ;;  %v654_v62 = vpop.f32.mrf.mxu2 }
  0xf2   :  { %529 = vmatmul.f32.gmra.mxu3 %v440_v6  ;;  %558 = vmatmul.f32.gmra.mxu0 %v452_v7  ;;  %v713_v6 = vld [vmem:[#allocation8 + $0x10] sm:$0xff]  ;;  %v655_v16 = vadd.f32 %v1207_v3, %v654_v62 }
  0xf3   :  { %832 = vmatpush.msra.mxu1 %v747_v25  ;;  %v729_v7 = vld [vmem:[#allocation8 + $0x90] sm:$0xff]  ;;  %776 = vmatpush.msrb.mxu3 %v713_v6 }
  0xf4   :  { %805 = vmatpush.msra.mxu0 %v729_v7 }
  0xf5   :  { %833 = vmatpush.msra.mxu1 %v746_v26 }
  0xf7   :  { %834 = vmatpush.msra.mxu1 %v745_v27 }
  0xf9   :  { %835 = vmatpush.msra.mxu1 %v744_v30  ;;  %v657_v19 = vpop.f32.mrf.mxu2 }
  0xfa   :  { %1145 = vmatmul.msk.f32.gmra.mxu3 %vm236_vm5, %v439_v10  ;;  %1147 = vmatmul.msk.f32.gmra.mxu0 %vm261_vm6, %v451_v11  ;;  %v712_v10 = vld [vmem:[#allocation8 + $0x8] sm:$0xff]  ;;  %v658_v30 = vadd.f32 %v1207_v3, %v657_v19  ;;  %v1763_v19 = vld [vmem:[#allocation10 + $0x140] sm:$0xff] }
  0xfb   :  { %836 = vmatpush.msra.mxu1 %v743_v33  ;;  %v728_v11 = vld [vmem:[#allocation8 + $0x88] sm:$0xff]  ;;  %777 = vmatpush.msrb.mxu3 %v712_v10 }
  0xfc   :  { %806 = vmatpush.msra.mxu0 %v728_v11 }
  0xfd   :  { %778 = vmatpush.msrb.mxu3 %v711_v17  ;;  %v1757_v17 = vld [vmem:[#allocation10 + $0x150] sm:$0xff] }
  0xfe   :  { %807 = vmatpush.msra.mxu0 %v727_v18  ;;  %v1760_v18 = vld [vmem:[#allocation10 + $0x148] sm:$0xff] }
 0x101   :  { %v660_v34 = vpop.f32.mrf.mxu2 }
 0x102   :  { %535 = vmatmul.f32.gmra.mxu3 %v438_v36  ;;  %564 = vmatmul.f32.gmra.mxu0 %v450_v13  ;;  %v661_v45 = vadd.f32 %v1207_v3, %v660_v34  ;;  %v923_v34 = vld [vmem:[#allocation10 + $0xe8] sm:$0xff] }
 0x14c   :  { %v585_v54 = vpop.f32.mrf.mxu1 }
 0x154   :  { %v588_v36 = vpop.f32.mrf.mxu1 }
 0x15c   :  { %v591_v31 = vpop.f32.mrf.mxu1 }
 0x167   :  { %v556_v50 = vpop.f32.mrf.mxu0 }
 0x16d   :  { %v527_v61 = vpop.f32.mrf.mxu3 }
 0x16e   :  { %v528_v35 = vadd.f32 %v1680_v53, %v527_v61 }
 0x16f   :  { %v559_v5 = vpop.f32.mrf.mxu0 }
 0x170   :  { %v557_v1 = vadd.f32 %v556_v50, %v528_v35  ;;  %v594_v50 = vpop.f32.mrf.mxu1 }
 0x172   :  { %v586_v4 = vadd.f32 %v585_v54, %v557_v1  ;;  %v663_v54 = vpop.f32.mrf.mxu2 }
 0x173   :  { %v664_v60 = vadd.f32 %v1207_v3, %v663_v54  ;;  %v916_v54 = vld [vmem:[#allocation10 + $0xb0] sm:$0xff] }
 0x174   :  { %v597_v8 = vmax.f32 %v586_v4, 0.0 }
 0x175   :  { %v530_v13 = vpop.f32.mrf.mxu3 }
 0x176   :  { %v531_v14 = vadd.f32 %v1680_v53, %v530_v13  ;;  %v605_v15 = vmul.f32 %v1205_v56, %v597_v8  ;;  %v1745_v13 = vld [vmem:[#allocation10 + $0x170] sm:$0xff] }
 0x177   :  { %v562_v26 = vpop.f32.mrf.mxu0 }
 0x178   :  { %v560_v20 = vadd.f32 %v559_v5, %v531_v14  ;;  %v613_v21 = vadd.f32 %v1206_v9, %v605_v15  ;;  %v1747_v14 = vld [vmem:[#allocation10 + $0x168] sm:$0xff]  ;;  %v1750_v15 = vld [vmem:[#allocation10 + $0x160] sm:$0xff] }
 0x17a   :  { %v589_v22 = vadd.f32 %v588_v36, %v560_v20  ;;  %v666_v23 = vadd.f32 %v655_v16, %v613_v21  ;;  %v1742_v36 = vld [vmem:[#allocation10 + $0x178] sm:$0xff]  ;;  %v1769_v21 = vld [vmem:[#allocation10 + $0x130] sm:$0xff] }
 0x17b   :  { %1004 = vmatpush.msrb.mxu0 %v1742_v36  ;;  %v1753_v16 = vld [vmem:[#allocation10 + $0x158] sm:$0xff] }
 0x17c   :  { %v598_v24 = vmax.f32 %v589_v22, 0.0  ;;  %v1693_v25 = vmax.f32 %v666_v23, 0.0  ;;  %v1765_v20 = vld [vmem:[#allocation10 + $0x138] sm:$0xff]  ;;  %v1772_v22 = vld [vmem:[#allocation10 + $0x128] sm:$0xff]  ;;  %v1775_v23 = vld [vmem:[#allocation10 + $0x120] sm:$0xff] }
 0x17d   :  { %v533_v27 = vpop.f32.mrf.mxu3  ;;  %1005 = vmatpush.msrb.mxu0 %v1745_v13 }
 0x17e   :  { %v534_v28 = vadd.f32 %v1680_v53, %v533_v27  ;;  %837 = vmatmul.f32.vlgmr.msra.gmra.mxu1 %v1693_v25  ;;  %v606_v29 = vmul.f32 %v1205_v56, %v598_v24  ;;  %v674_v35 = vrot.slane %v1693_v25, 4  ;;  %v699_v0 = vrot.slane %v1693_v25, 6  ;;  %v1778_v24 = vld [vmem:[#allocation10 + $0x118] sm:$0xff] }
 0x17f   :  { %v565_v46 = vpop.f32.mrf.mxu0  ;;  %1006 = vmatpush.msrb.mxu0 %v1747_v14  ;;  %v909_v27 = vld [vmem:[#allocation10 + $0x78] sm:$0xff] }
 0x180   :  { %v563_v32 = vadd.f32 %v562_v26, %v534_v28  ;;  %v614_v33 = vadd.f32 %v1206_v9, %v606_v29  ;;  %v1781_v26 = vld [vmem:[#allocation10 + $0x110] sm:$0xff]  ;;  %v925_v28 = vld [vmem:[#allocation10 + $0xf8] sm:$0xff]  ;;  %946 = vmatpush.msra.mxu2 %v909_v27  ;;  %v1784_v29 = vld [vmem:[#allocation10 + $0x108] sm:$0xff] }
 0x181   :  { %1007 = vmatpush.msrb.mxu0 %v1750_v15  ;;  %975 = vmatpush.msra.mxu3 %v925_v28  ;;  %v1210_v28 = vld [vmem:[%s1875_s14] ss:$0 sm:$0xff] }
 0x182   :  { %v592_v37 = vadd.f32 %v591_v31, %v563_v32  ;;  %v667_v38 = vadd.f32 %v658_v30, %v614_v33  ;;  %v908_v30 = vld [vmem:[#allocation10 + $0x70] sm:$0xff]  ;;  %v1787_v32 = vld [vmem:[#allocation10 + $0x100] sm:$0xff]  ;;  %v907_v33 = vld [vmem:[#allocation10 + $0x68] sm:$0xff] }
 0x183   :  { %1008 = vmatpush.msrb.mxu0 %v1753_v16  ;;  %v924_v31 = vld [vmem:[#allocation10 + $0xf0] sm:$0xff]  ;;  %947 = vmatpush.msra.mxu2 %v908_v30 }
 0x184   :  { %v599_v40 = vmax.f32 %v592_v37, 0.0  ;;  %v1697_v41 = vmax.f32 %v667_v38, 0.0  ;;  %976 = vmatpush.msra.mxu3 %v924_v31  ;;  %v906_v37 = vld [vmem:[#allocation10 + $0x60] sm:$0xff] }
 0x185   :  { %v536_v42 = vpop.f32.mrf.mxu3  ;;  %1009 = vmatpush.msrb.mxu0 %v1757_v17  ;;  %948 = vmatpush.msra.mxu2 %v907_v33  ;;  %v922_v38 = vld [vmem:[#allocation10 + $0xe0] sm:$0xff] }
 0x186   :  { %v537_v43 = vadd.f32 %v1680_v53, %v536_v42  ;;  %840 = vmatmul.f32.gmra.mxu1 %v1697_v41  ;;  %v607_v44 = vmul.f32 %v1205_v56, %v599_v40  ;;  %v675_v4 = vrot.slane %v1697_v41, 4  ;;  %977 = vmatpush.msra.mxu3 %v923_v34  ;;  %v905_v40 = vld [vmem:[#allocation10 + $0x58] sm:$0xff] }
 0x187   :  { %1010 = vmatpush.msrb.mxu0 %v1760_v18  ;;  %949 = vmatpush.msra.mxu2 %v906_v37  ;;  %v921_v42 = vld [vmem:[#allocation10 + $0xd8] sm:$0xff] }
 0x188   :  { %v566_v47 = vadd.f32 %v565_v46, %v537_v43  ;;  %v615_v48 = vadd.f32 %v1206_v9, %v607_v44  ;;  %v681_v3 = vsel %vm678_vm8, %v674_v35, %v675_v4  ;;  %978 = vmatpush.msra.mxu3 %v922_v38  ;;  %v904_v43 = vld [vmem:[#allocation10 + $0x50] sm:$0xff]  ;;  %v919_v46 = vld [vmem:[#allocation10 + $0xc8] sm:$0xff] }
 0x189   :  { %1011 = vmatpush.msrb.mxu0 %v1763_v19  ;;  %950 = vmatpush.msra.mxu2 %v905_v40  ;;  %v920_v44 = vld [vmem:[#allocation10 + $0xd0] sm:$0xff] }
 0x18a   :  { %v595_v51 = vadd.f32 %v594_v50, %v566_v47  ;;  %v668_v52 = vadd.f32 %v661_v45, %v615_v48  ;;  %979 = vmatpush.msra.mxu3 %v921_v42  ;;  %v903_v45 = vld [vmem:[#allocation10 + $0x48] sm:$0xff]  ;;  %v902_v47 = vld [vmem:[#allocation10 + $0x40] sm:$0xff]  ;;  %v901_v50 = vld [vmem:[#allocation10 + $0x38] sm:$0xff] }
 0x18b   :  { %1012 = vmatpush.msrb.mxu0 %v1765_v20  ;;  %951 = vmatpush.msra.mxu2 %v904_v43  ;;  %v918_v48 = vld [vmem:[#allocation10 + $0xc0] sm:$0xff] }
 0x18c   :  { %v600_v55 = vmax.f32 %v595_v51, 0.0  ;;  %v1701_v57 = vmax.f32 %v668_v52, 0.0  ;;  %980 = vmatpush.msra.mxu3 %v920_v44  ;;  %v917_v51 = vld [vmem:[#allocation10 + $0xb8] sm:$0xff]  ;;  %v900_v52 = vld [vmem:[#allocation10 + $0x30] sm:$0xff] }
 0x18d   :  { %1013 = vmatpush.msrb.mxu0 %v1769_v21  ;;  %952 = vmatpush.msra.mxu2 %v903_v45 }
 0x18e   :  { %843 = vmatmul.f32.gmra.mxu1 %v1701_v57  ;;  %v608_v58 = vmul.f32 %v1205_v56, %v600_v55  ;;  %v700_v56 = vrot.slane %v1697_v41, 6  ;;  %v676_v6 = vrot.slane %v1701_v57, 4  ;;  %v701_v7 = vrot.slane %v1701_v57, 6  ;;  %981 = vmatpush.msra.mxu3 %v919_v46 }
 0x18f   :  { %1014 = vmatpush.msrb.mxu0 %v1772_v22  ;;  %953 = vmatpush.msra.mxu2 %v902_v47 }
 0x190   :  { %v616_v61 = vadd.f32 %v1206_v9, %v608_v58  ;;  %v705_v5 = vsel %vm229_vm1, %v699_v0, %v700_v56  ;;  %v680_v8 = vsel %vm678_vm8, %v675_v4, %v676_v6  ;;  %v704_v9 = vsel %vm229_vm1, %v700_v56, %v701_v7  ;;  %982 = vmatpush.msra.mxu3 %v918_v48  ;;  %v899_v58 = vld [vmem:[#allocation10 + $0x28] sm:$0xff]  ;;  %v896_v4 = vld [vmem:[#allocation10 + $0x10] sm:$0xff] }
 0x191   :  { %1015 = vmatpush.msrb.mxu0 %v1775_v23  ;;  %954 = vmatpush.msra.mxu2 %v901_v50  ;;  %v912_v56 = vld [vmem:[#allocation10 + $0x90] sm:$0xff] }
 0x192   :  { %v669_v53 = vadd.f32 %v664_v60, %v616_v61  ;;  %983 = vmatpush.msra.mxu3 %v917_v51  ;;  %v915_v60 = vld [vmem:[#allocation10 + $0xa8] sm:$0xff]  ;;  %v1208_v61 = vld [vmem:[%s1873_s12] ss:$0 sm:$0xff] }
 0x193   :  { %1016 = vmatpush.msrb.mxu0 %v1778_v24  ;;  %955 = vmatpush.msra.mxu2 %v900_v52 }
 0x194   :  { %v1704_v62 = vmax.f32 %v669_v53, 0.0  ;;  %984 = vmatpush.msra.mxu3 %v916_v54 }
 0x195   :  { %1017 = vmatpush.msrb.mxu0 %v1781_v26  ;;  %956 = vmatpush.msra.mxu2 %v899_v58 }
 0x196   :  { %846 = vmatmul.f32.gmra.mxu1 %v1704_v62  ;;  %v677_v63 = vrot.slane %v1704_v62, 4  ;;  %v702_v1 = vrot.slane %v1704_v62, 6  ;;  %985 = vmatpush.msra.mxu3 %v915_v60 }
 0x197   :  { %1018 = vmatpush.msrb.mxu0 %v1784_v29 }
 0x198   :  { %v682_v59 = vsel %vm678_vm8, %v677_v63, %v674_v35  ;;  %v706_v2 = vsel %vm229_vm1, %v702_v1, %v699_v0  ;;  %v679_v10 = vsel %vm678_vm8, %v676_v6, %v677_v63  ;;  %v703_v11 = vsel %vm229_vm1, %v701_v7, %v702_v1  ;;  %v898_v35 = vld [vmem:[#allocation10 + $0x20] sm:$0xff]  ;;  %v897_v1 = vld [vmem:[#allocation10 + $0x18] sm:$0xff]  ;;  %v911_v6 = vld [vmem:[#allocation10 + $0x88] sm:$0xff] }
 0x199   :  { %1152 = vmatmul.msk.f32.vlgmr.msrb.gmra.mxu3 %vm683_vm7, %v682_v59  ;;  %1154 = vmatmul.msk.f32.vlgmr.msra.gmra.mxu0 %vm234_vm3, %v706_v2  ;;  %v914_v63 = vld [vmem:[#allocation10 + $0xa0] sm:$0xff]  ;;  %v913_v59 = vld [vmem:[#allocation10 + $0x98] sm:$0xff] }
 0x19a   :  { %1019 = vmatpush.msrb.mxu0 %v1787_v32  ;;  %957 = vmatpush.msra.mxu2 %v898_v35  ;;  %v894_v7 = vld [vmem:[#allocation10] sm:$0xff] }
 0x19b   :  { %986 = vmatpush.msra.mxu3 %v914_v63 }
 0x19c   :  { %958 = vmatpush.msra.mxu2 %v897_v1 }
 0x19d   :  { %987 = vmatpush.msra.mxu3 %v913_v59  ;;  %v1076_v59 = vld [vmem:[#allocation11 + $0x78] sm:$0xff] }
 0x19e   :  { %959 = vmatpush.msra.mxu2 %v896_v4  ;;  %1081 = vmatpush.msrb.mxu1 %v1076_v59  ;;  %v1074_v4 = vld [vmem:[#allocation11 + $0x68] sm:$0xff] }
 0x19f   :  { %988 = vmatpush.msra.mxu3 %v912_v56  ;;  %v1073_v56 = vld [vmem:[#allocation11 + $0x60] sm:$0xff] }
 0x1a1   :  { %782 = vmatmul.f32.gmra.mxu3 %v681_v3  ;;  %811 = vmatmul.f32.gmra.mxu0 %v705_v5  ;;  %v895_v5 = vld [vmem:[#allocation10 + $0x8] sm:$0xff] }
 0x1a2   :  { %960 = vmatpush.msra.mxu2 %v895_v5  ;;  %989 = vmatpush.msra.mxu3 %v911_v6  ;;  %v1069_v5 = vld [vmem:[#allocation11 + $0x40] sm:$0xff]  ;;  %v1068_v6 = vld [vmem:[#allocation11 + $0x38] sm:$0xff] }
 0x1a4   :  { %961 = vmatpush.msra.mxu2 %v894_v7  ;;  %v1067_v7 = vld [vmem:[#allocation11 + $0x30] sm:$0xff] }
 0x1a6   :  { %1160 = vmatpush.msrb.mxu2 %v1742_v36 }
 0x1a8   :  { %1161 = vmatpush.msrb.mxu2 %v1745_v13 }
 0x1a9   :  { %1153 = vmatmul.msk.f32.gmra.mxu3 %vm685_vm9, %v680_v8  ;;  %1155 = vmatmul.msk.f32.gmra.mxu0 %vm236_vm5, %v704_v9  ;;  %v910_v8 = vld [vmem:[#allocation10 + $0x80] sm:$0xff] }
 0x1aa   :  { %990 = vmatpush.msra.mxu3 %v910_v8  ;;  %1162 = vmatpush.msrb.mxu2 %v1747_v14  ;;  %v1066_v8 = vld [vmem:[#allocation11 + $0x28] sm:$0xff] }
 0x1ac   :  { %1163 = vmatpush.msrb.mxu2 %v1750_v15  ;;  %1176 = vmatpush.msrb.mxu3 %v1076_v59 }
 0x1ae   :  { %1164 = vmatpush.msrb.mxu2 %v1753_v16 }
 0x1b0   :  { %1165 = vmatpush.msrb.mxu2 %v1757_v17 }
 0x1b1   :  { %788 = vmatmul.f32.gmra.mxu3 %v679_v10  ;;  %817 = vmatmul.f32.gmra.mxu0 %v703_v11  ;;  %v1209_v10 = vld [vmem:[%s1874_s13] ss:$0 sm:$0xff] }
 0x1b2   :  { %1166 = vmatpush.msrb.mxu2 %v1760_v18 }
 0x1b4   :  { %1167 = vmatpush.msrb.mxu2 %v1763_v19 }
 0x1b6   :  { %1168 = vmatpush.msrb.mxu2 %v1765_v20 }
 0x1b8   :  { %1169 = vmatpush.msrb.mxu2 %v1769_v21 }
 0x1ba   :  { %1170 = vmatpush.msrb.mxu2 %v1772_v22 }
 0x1bc   :  { %1171 = vmatpush.msrb.mxu2 %v1775_v23 }
 0x1be   :  { %1172 = vmatpush.msrb.mxu2 %v1778_v24 }
 0x1c0   :  { %1173 = vmatpush.msrb.mxu2 %v1781_v26 }
 0x1c2   :  { %1174 = vmatpush.msrb.mxu2 %v1784_v29 }
 0x1c4   :  { %1175 = vmatpush.msrb.mxu2 %v1787_v32 }
 0x1fb   :  { %v838_v53 = vpop.f32.mrf.mxu1 }
 0x203   :  { %v841_v30 = vpop.f32.mrf.mxu1 }
 0x20b   :  { %v844_v46 = vpop.f32.mrf.mxu1 }
 0x213   :  { %v847_v16 = vpop.f32.mrf.mxu1 }
 0x216   :  { %v809_v55 = vpop.f32.mrf.mxu0 }
 0x21c   :  { %v780_v0 = vpop.f32.mrf.mxu3 }
 0x21d   :  { %v781_v2 = vadd.f32 %v1208_v61, %v780_v0 }
 0x21e   :  { %v812_v11 = vpop.f32.mrf.mxu0 }
 0x21f   :  { %v810_v3 = vadd.f32 %v809_v55, %v781_v2  ;;  %v1075_v2 = vld [vmem:[#allocation11 + $0x70] sm:$0xff] }
 0x220   :  { %1082 = vmatpush.msrb.mxu1 %v1075_v2  ;;  %1177 = vmatpush.msrb.mxu3 %v1075_v2  ;;  %v1214_v2 = vld [vmem:[%s1881_s20] ss:$0 sm:$0xff] }
 0x221   :  { %v839_v9 = vadd.f32 %v838_v53, %v810_v3  ;;  %v1071_v3 = vld [vmem:[#allocation11 + $0x50] sm:$0xff] }
 0x222   :  { %1083 = vmatpush.msrb.mxu1 %v1074_v4  ;;  %1178 = vmatpush.msrb.mxu3 %v1074_v4 }
 0x223   :  { %v850_v27 = vmax.f32 %v839_v9, 0.0  ;;  %v1065_v9 = vld [vmem:[#allocation11 + $0x20] sm:$0xff] }
 0x224   :  { %v783_v31 = vpop.f32.mrf.mxu3  ;;  %1084 = vmatpush.msrb.mxu1 %v1073_v56  ;;  %1179 = vmatpush.msrb.mxu3 %v1073_v56 }
 0x225   :  { %v858_v33 = vmul.f32 %v1209_v10, %v850_v27  ;;  %v784_v34 = vadd.f32 %v1208_v61, %v783_v31  ;;  %v1062_v27 = vld [vmem:[#allocation11 + $0x8] sm:$0xff] }
 0x226   :  { %v815_v43 = vpop.f32.mrf.mxu0  ;;  %1085 = vmatpush.msrb.mxu1 %v1072_v12  ;;  %1180 = vmatpush.msrb.mxu3 %v1072_v12 }
 0x227   :  { %v813_v37 = vadd.f32 %v812_v11, %v784_v34  ;;  %v866_v38 = vadd.f32 %v1210_v28, %v858_v33  ;;  %v1063_v11 = vld [vmem:[#allocation11 + $0x10] sm:$0xff] }
 0x228   :  { %1086 = vmatpush.msrb.mxu1 %v1071_v3  ;;  %1181 = vmatpush.msrb.mxu3 %v1071_v3 }
 0x229   :  { %v842_v40 = vadd.f32 %v841_v30, %v813_v37  ;;  %1020 = vmatmul.f32.vlgmr.msrb.gmra.mxu0 %v866_v38  ;;  %v870_v21 = vrot.slane %v866_v38, 4  ;;  %v882_v54 = vrot.slane %v866_v38, 6  ;;  %v1211_v30 = vld [vmem:[%s1877_s16] ss:$0 sm:$0xff] }
 0x22a   :  { %1087 = vmatpush.msrb.mxu1 %v1070_v39  ;;  %1182 = vmatpush.msrb.mxu3 %v1070_v39 }
 0x22b   :  { %v851_v42 = vmax.f32 %v842_v40, 0.0 }
 0x22c   :  { %v786_v44 = vpop.f32.mrf.mxu3  ;;  %1088 = vmatpush.msrb.mxu1 %v1069_v5  ;;  %1183 = vmatpush.msrb.mxu3 %v1069_v5 }
 0x22d   :  { %v859_v45 = vmul.f32 %v1209_v10, %v851_v42  ;;  %v787_v47 = vadd.f32 %v1208_v61, %v786_v44  ;;  %v1212_v42 = vld [vmem:[%s1878_s17] ss:$0 sm:$0xff] }
 0x22e   :  { %v818_v15 = vpop.f32.mrf.mxu0  ;;  %1089 = vmatpush.msrb.mxu1 %v1068_v6  ;;  %1184 = vmatpush.msrb.mxu3 %v1068_v6  ;;  %v1213_v44 = vld [vmem:[%s1879_s18] ss:$0 sm:$0xff]  ;;  %s1401_s18 = smov [#allocation13]  }
 0x22f   :  { %v867_v36 = vadd.f32 %v1210_v28, %v859_v45  ;;  %v816_v17 = vadd.f32 %v815_v43, %v787_v47  ;;  %s1118_s11 = sshll.u32 %s1401_s18, 4  ;;  %s1119_s11 = int_to_ptr.vmem [resolvable:$true] %s1118_s11 }
 0x230   :  { %1090 = vmatpush.msrb.mxu1 %v1067_v7  ;;  %1185 = vmatpush.msrb.mxu3 %v1067_v7 }
 0x231   :  { %1023 = vmatmul.f32.gmra.mxu0 %v867_v36  ;;  %v845_v20 = vadd.f32 %v844_v46, %v816_v17  ;;  %v871_v29 = vrot.slane %v867_v36, 4  ;;  %v883_v58 = vrot.slane %v867_v36, 6 }
 0x232   :  { %1091 = vmatpush.msrb.mxu1 %v1066_v8  ;;  %1186 = vmatpush.msrb.mxu3 %v1066_v8 }
 0x233   :  { %v852_v22 = vmax.f32 %v845_v20, 0.0  ;;  %v876_v32 = vsel %vm678_vm8, %v870_v21, %v871_v29 }
 0x234   :  { %v789_v13 = vpop.f32.mrf.mxu3  ;;  %1092 = vmatpush.msrb.mxu1 %v1065_v9  ;;  %1187 = vmatpush.msrb.mxu3 %v1065_v9 }
 0x235   :  { %v790_v14 = vadd.f32 %v1208_v61, %v789_v13  ;;  %v860_v26 = vmul.f32 %v1209_v10, %v852_v22  ;;  %v888_v61 = vsel %vm229_vm1, %v882_v54, %v883_v58 }
 0x237   :  { %v819_v48 = vadd.f32 %v818_v15, %v790_v14  ;;  %v868_v60 = vadd.f32 %v1210_v28, %v860_v26 }
 0x239   :  { %v848_v50 = vadd.f32 %v847_v16, %v819_v48  ;;  %v872_v53 = vrot.slane %v868_v60, 4  ;;  %v884_v35 = vrot.slane %v868_v60, 6 }
 0x23b   :  { %v853_v18 = vmax.f32 %v848_v50, 0.0  ;;  %v875_v63 = vsel %vm678_vm8, %v871_v29, %v872_v53  ;;  %v887_v49 = vsel %vm229_vm1, %v883_v58, %v884_v35 }
 0x23d   :  { %v861_v19 = vmul.f32 %v1209_v10, %v853_v18  ;;  %v1064_v10 = vld [vmem:[#allocation11 + $0x18] sm:$0xff] }
 0x23e   :  { %1093 = vmatpush.msrb.mxu1 %v1064_v10  ;;  %1188 = vmatpush.msrb.mxu3 %v1064_v10 }
 0x23f   :  { %v869_v51 = vadd.f32 %v1210_v28, %v861_v19  ;;  %v1061_v28 = vld [vmem:[#allocation11] sm:$0xff] }
 0x240   :  { %1094 = vmatpush.msrb.mxu1 %v1063_v11  ;;  %1189 = vmatpush.msrb.mxu3 %v1063_v11 }
 0x241   :  { %v873_v52 = vrot.slane %v869_v51, 4  ;;  %v885_v55 = vrot.slane %v869_v51, 6 }
 0x242   :  { %1095 = vmatpush.msrb.mxu1 %v1062_v27  ;;  %1190 = vmatpush.msrb.mxu3 %v1062_v27 }
 0x243   :  { %v877_v23 = vsel %vm678_vm8, %v873_v52, %v870_v21  ;;  %v889_v24 = vsel %vm229_vm1, %v885_v55, %v882_v54  ;;  %v874_v0 = vsel %vm678_vm8, %v872_v53, %v873_v52  ;;  %v886_v1 = vsel %vm229_vm1, %v884_v35, %v885_v55 }
 0x244   :  { %1156 = vmatmul.msk.f32.vlgmr.msra.gmra.mxu2 %vm683_vm7, %v877_v23  ;;  %1158 = vmatmul.msk.f32.vlgmr.msra.gmra.mxu3 %vm234_vm3, %v889_v24 }
 0x245   :  { %1096 = vmatpush.msrb.mxu1 %v1061_v28  ;;  %1191 = vmatpush.msrb.mxu3 %v1061_v28 }
 0x24c   :  { %965 = vmatmul.f32.gmra.mxu2 %v876_v32  ;;  %994 = vmatmul.f32.gmra.mxu3 %v888_v61 }
 0x254   :  { %1157 = vmatmul.msk.f32.gmra.mxu2 %vm685_vm9, %v875_v63  ;;  %1159 = vmatmul.msk.f32.gmra.mxu3 %vm236_vm5, %v887_v49 }
 0x25c   :  { %971 = vmatmul.f32.gmra.mxu2 %v874_v0  ;;  %1000 = vmatmul.f32.gmra.mxu3 %v886_v1 }
 0x264   :  { %1026 = vmatmul.f32.vlgmr.msrb.gmra.mxu2 %v868_v60 }
 0x26c   :  { %1029 = vmatmul.f32.gmra.mxu2 %v869_v51 }
 0x2a6   :  { %v1021_v37 = vpop.f32.mrf.mxu0 }
 0x2ae   :  { %v1024_v47 = vpop.f32.mrf.mxu0 }
 0x2c7   :  { %v963_v31 = vpop.f32.mrf.mxu2  ;;  %v992_v33 = vpop.f32.mrf.mxu3 }
 0x2c8   :  { %v964_v34 = vadd.f32 %v1211_v30, %v963_v31 }
 0x2ca   :  { %v993_v38 = vadd.f32 %v992_v33, %v964_v34 }
 0x2cc   :  { %v1022_v40 = vadd.f32 %v1021_v37, %v993_v38 }
 0x2ce   :  { %v1033_v43 = vmax.f32 %v1022_v40, 0.0 }
 0x2cf   :  { %v966_v45 = vpop.f32.mrf.mxu2  ;;  %v995_v13 = vpop.f32.mrf.mxu3 }
 0x2d0   :  { %v1041_v46 = vmul.f32 %v1212_v42, %v1033_v43  ;;  %v967_v36 = vadd.f32 %v1211_v30, %v966_v45 }
 0x2d2   :  { %v1049_v14 = vadd.f32 %v1213_v44, %v1041_v46  ;;  %v996_v15 = vadd.f32 %v995_v13, %v967_v36 }
 0x2d4   :  { %v1025_v48 = vadd.f32 %v1024_v47, %v996_v15  ;;  %v1053_v16 = vadd.f32 %v1049_v14, %v1693_v25 }
 0x2d6   :  { %v1034_v50 = vmax.f32 %v1025_v48, 0.0  ;;  %v1057_v17 = vmax.f32 %v1053_v16, 0.0 }
 0x2d7   :  { %v969_v18 = vpop.f32.mrf.mxu2  ;;  %v998_v55 = vpop.f32.mrf.mxu3 }
 0x2d8   :  { %v1042_v19 = vmul.f32 %v1212_v42, %v1034_v50  ;;  %1097 = vmatmul.f32.vlgmr.msrb.gmra.mxu1 %v1057_v17  ;;  %v970_v54 = vadd.f32 %v1211_v30, %v969_v18 }
 0x2da   :  { %v1050_v20 = vadd.f32 %v1213_v44, %v1042_v19  ;;  %v999_v22 = vadd.f32 %v998_v55, %v970_v54 }
 0x2dc   :  { %v1054_v51 = vadd.f32 %v1050_v20, %v1697_v41 }
 0x2de   :  { %v1058_v21 = vmax.f32 %v1054_v51, 0.0 }
 0x2df   :  { %v972_v52 = vpop.f32.mrf.mxu2  ;;  %v1001_v25 = vpop.f32.mrf.mxu3 }
 0x2e0   :  { %1100 = vmatmul.f32.gmra.mxu1 %v1058_v21  ;;  %v973_v26 = vadd.f32 %v1211_v30, %v972_v52 }
 0x2e2   :  { %v1002_v60 = vadd.f32 %v1001_v25, %v973_v26 }
 0x2e7   :  { %v1027_v23 = vpop.f32.mrf.mxu2 }
 0x2e8   :  { %v1028_v24 = vadd.f32 %v1027_v23, %v999_v22 }
 0x2ea   :  { %v1035_v29 = vmax.f32 %v1028_v24, 0.0 }
 0x2ec   :  { %v1043_v58 = vmul.f32 %v1212_v42, %v1035_v29 }
 0x2ee   :  { %v1051_v32 = vadd.f32 %v1213_v44, %v1043_v58 }
 0x2ef   :  { %v1030_v61 = vpop.f32.mrf.mxu2 }
 0x2f0   :  { %v1055_v53 = vadd.f32 %v1051_v32, %v1701_v57  ;;  %v1031_v35 = vadd.f32 %v1030_v61, %v1002_v60 }
 0x2f2   :  { %v1036_v63 = vmax.f32 %v1031_v35, 0.0  ;;  %v1059_v41 = vmax.f32 %v1055_v53, 0.0 }
 0x2f4   :  { %v1044_v49 = vmul.f32 %v1212_v42, %v1036_v63  ;;  %1103 = vmatmul.f32.vlgmr.msrb.gmra.mxu3 %v1059_v41 }
 0x2f6   :  { %v1052_v0 = vadd.f32 %v1213_v44, %v1044_v49 }
 0x2f8   :  { %v1056_v1 = vadd.f32 %v1052_v0, %v1704_v62 }
 0x2fa   :  { %v1060_v59 = vmax.f32 %v1056_v1, 0.0 }
 0x2fc   :  { %1106 = vmatmul.f32.gmra.mxu3 %v1060_v59 }
 0x355   :  { %v1098_v4 = vpop.f32.mrf.mxu1 }
 0x356   :  { %v1099_v56 = vadd.f32 %v1214_v2, %v1098_v4 }
 0x358   :  { %1110 = vst [vmem:[#allocation13] sm:$0xff] %v1099_v56 }
 0x35d   :  { %v1101_v12 = vpop.f32.mrf.mxu1 }
 0x35e   :  { %v1102_v3 = vadd.f32 %v1214_v2, %v1101_v12 }
 0x360   :  { %1111 = vst [vmem:[#allocation13 + $0x8] sm:$0xff] %v1102_v3 }
 0x377   :  { %v1104_v57 = vpop.f32.mrf.mxu3 }
 0x378   :  { %v1105_v39 = vadd.f32 %v1214_v2, %v1104_v57 }
 0x37a   :  { %1112 = vst [vmem:[#allocation13 + $0x10] sm:$0xff] %v1105_v39 }
 0x37f   :  { %v1107_v62 = vpop.f32.mrf.mxu3 }
 0x380   :  { %v1108_v5 = vadd.f32 %v1214_v2, %v1107_v62 }
 0x382   :  { %1113 = vst [vmem:[#allocation13 + $0x18] sm:$0xff] %v1108_v5 }
 0x383   :  { %1126 = dma.vmem_to_hbm [thread:$0]  %s1119_s11, 512, %s1121_s19, [#allocation4], %s1394_s30, %s1394_s30, %s1395_s5  }
 0x384   :  { %1391 = dma.done.wait [#allocation4], 512  }
 0x385   :  { %1392 = vsyncadd [#allocation4], 4294966784 }
 0x386   :  { %1131 = vsyncpa [#allocation3], 1 }
 0x387   :  { %1132 = vsyncpa [#allocation6], 1 }
 0x388   :  { %1133 = vsyncpa [#allocation9], 1 }
 0x389   :  { %1134 = vsyncpa [#allocation12], 1 }
 0x38a   :  { %1135 = vsyncpa [#allocation4], 1 }

// kernel: tpu_custom_call.1
= control target key start
LH: loop header
LB: loop body
LE: loop exit
PB: predicated region body
PF: predicated region fallthrough
CT: control target
= control target key end

     0   :  { %s1878_s0 = inlined_call_operand.vmem [shape: f32[2,16,8], index: 0, kind: input, shape index: {}]   ;;  %s1879_s1 = inlined_call_operand.hbm [shape: f32[384,128], index: 1, kind: input, shape index: {}]   ;;  %s1880_s2 = inlined_call_operand.vmem [shape: f32[1,128], index: 2, kind: input, shape index: {}]   ;;  %s1881_s3 = inlined_call_operand.vmem [shape: f32[1,128], index: 3, kind: input, shape index: {}]   ;;  %s1882_s4 = inlined_call_operand.vmem [shape: f32[1,128], index: 4, kind: input, shape index: {}]   ;;  %s1883_s5 = inlined_call_operand.hbm [shape: f32[384,128], index: 5, kind: input, shape index: {}]   ;;  %s1884_s6 = inlined_call_operand.vmem [shape: f32[1,128], index: 6, kind: input, shape index: {}]   ;;  %s1885_s7 = inlined_call_operand.vmem [shape: f32[1,128], index: 7, kind: input, shape index: {}]   ;;  %s1886_s8 = inlined_call_operand.vmem [shape: f32[1,128], index: 8, kind: input, shape index: {}]   ;;  %s1887_s9 = inlined_call_operand.hbm [shape: f32[128,128], index: 9, kind: input, shape index: {}]   ;;  %s1888_s10 = inlined_call_operand.vmem [shape: f32[1,128], index: 10, kind: input, shape index: {}]   ;;  %s1889_s11 = inlined_call_operand.hbm [shape: f32[384,128], index: 11, kind: input, shape index: {}]   ;;  %s1890_s12 = inlined_call_operand.vmem [shape: f32[1,128], index: 12, kind: input, shape index: {}]   ;;  %s1891_s13 = inlined_call_operand.vmem [shape: f32[1,128], index: 13, kind: input, shape index: {}]   ;;  %s1892_s14 = inlined_call_operand.vmem [shape: f32[1,128], index: 14, kind: input, shape index: {}]   ;;  %s1893_s15 = inlined_call_operand.hbm [shape: f32[384,128], index: 15, kind: input, shape index: {}]   ;;  %s1894_s16 = inlined_call_operand.vmem [shape: f32[1,128], index: 16, kind: input, shape index: {}]   ;;  %s1895_s17 = inlined_call_operand.vmem [shape: f32[1,128], index: 17, kind: input, shape index: {}]   ;;  %s1896_s18 = inlined_call_operand.vmem [shape: f32[1,128], index: 18, kind: input, shape index: {}]   ;;  %s1897_s19 = inlined_call_operand.hbm [shape: f32[128,128], index: 19, kind: input, shape index: {}]   ;;  %s1898_s20 = inlined_call_operand.vmem [shape: f32[1,128], index: 20, kind: input, shape index: {}]   ;;  %s1899_s21 = inlined_call_operand.hbm [shape: f32[2,16,128], index: 21, kind: output, shape index: {}]  }
   0x1   :  { %1901 = sst [smem:[#allocation19_spill]] %s1878_s0 }
   0x2   :  { %1902 = sst [smem:[#allocation20_spill]] %s1879_s1 }
   0x3   :  { %1903 = sst [smem:[#allocation21_spill]] %s1880_s2 }
   0x4   :  { %1904 = sst [smem:[#allocation22_spill]] %s1881_s3 }
   0x5   :  { %1905 = sst [smem:[#allocation23_spill]] %s1882_s4 }
   0x6   :  { %1906 = sst [smem:[#allocation24_spill]] %s1883_s5 }
   0x7   :  { %26 = vsyncpa [#allocation3], 0 }
   0x8   :  { %27 = vsyncpa [#allocation6], 0 }
   0x9   :  { %28 = vsyncpa [#allocation9], 0 }
   0xa   :  { %29 = vsyncpa [#allocation12], 0 }
   0xb   :  { %30 = vsyncpa [#allocation4], 0  ;;  %s1907_s26 = sld [smem:[#allocation24_spill]]  ;;  %s1449_s3 = smov [#allocation5]  }
   0xc   :  { %s58_s28 = sshll.u32 %s1449_s3, 4  ;;  %s90_s4 = sshll.u32 %s1889_s11, 4  ;;  %s59_s28 = int_to_ptr.vmem [resolvable:$true] %s58_s28  ;;  %s91_s4 = int_to_ptr.hbm [resolvable:$true] %s90_s4 }
   0xd   :  { %s1450_s30 = smov 128   ;;  %s1451_s5 = smov 8  }
   0xe   :  { %s1452_s22 = smov [#allocation8]   ;;  %s1908_s2 = sld [smem:[#allocation20_spill]] }
   0xf   :  { %s92_s23 = sshll.u32 %s1452_s22, 4  ;;  %s75_s3 = sshll.u32 %s1887_s9, 4  ;;  %s93_s23 = int_to_ptr.vmem [resolvable:$true] %s92_s23  ;;  %s76_s3 = int_to_ptr.hbm [resolvable:$true] %s75_s3 }
  0x10   :  { %98 = dma.hbm_to_vmem [thread:$0]  %s91_s4, 6144, %s93_s23, [#allocation9], %s1450_s30, %s1450_s30, %s1451_s5  }
  0x11   :  { %s56_s27 = sshll.u32 %s1907_s26, 4  ;;  %s1453_s29 = smov [#allocation2]   ;;  %s57_s27 = int_to_ptr.hbm [resolvable:$true] %s56_s27 }
  0x12   :  { %64 = dma.hbm_to_vmem [thread:$0]  %s57_s27, 6144, %s59_s28, [#allocation6], %s1450_s30, %s1450_s30, %s1451_s5  }
  0x13   :  { %s39_s0 = sshll.u32 %s1453_s29, 4  ;;  %s1454_s27 = smov [#allocation7]   ;;  %s40_s0 = int_to_ptr.vmem [resolvable:$true] %s39_s0 }
  0x14   :  { %s37_s25 = sshll.u32 %s1908_s2, 4  ;;  %s77_s28 = sshll.u32 %s1454_s27, 4  ;;  %s38_s25 = int_to_ptr.hbm [resolvable:$true] %s37_s25  ;;  %s78_s28 = int_to_ptr.vmem [resolvable:$true] %s77_s28 }
  0x15   :  { %45 = dma.hbm_to_vmem [thread:$0]  %s38_s25, 6144, %s40_s0, [#allocation3], %s1450_s30, %s1450_s30, %s1451_s5  }
  0x16   :  { %s109_s24 = sshll.u32 %s1893_s15, 4  ;;  %s128_s23 = sshll.u32 %s1897_s19, 4  ;;  %s110_s24 = int_to_ptr.hbm [resolvable:$true] %s109_s24  ;;  %s129_s23 = int_to_ptr.hbm [resolvable:$true] %s128_s23 }
  0x17   :  { %83 = dma.hbm_to_vmem [thread:$0]  %s76_s3, 2048, %s78_s28, [#allocation6], %s1450_s30, %s1450_s30, %s1451_s5  }
  0x18   :  { %s1455_s2 = smov [#allocation10]   ;;  %s1456_s25 = smov [#allocation11]  }
  0x19   :  { %s111_s11 = sshll.u32 %s1455_s2, 4  ;;  %s130_s15 = sshll.u32 %s1456_s25, 4  ;;  %s112_s11 = int_to_ptr.vmem [resolvable:$true] %s111_s11  ;;  %s131_s15 = int_to_ptr.vmem [resolvable:$true] %s130_s15 }
  0x1a   :  { %117 = dma.hbm_to_vmem [thread:$0]  %s110_s24, 6144, %s112_s11, [#allocation9], %s1450_s30, %s1450_s30, %s1451_s5  }
  0x1b   :  { %136 = dma.hbm_to_vmem [thread:$0]  %s129_s23, 2048, %s131_s15, [#allocation12], %s1450_s30, %s1450_s30, %s1451_s5  }
  0x1c   :  { %1439 = dma.done.wait [#allocation3], 6144  }
  0x1d   :  { %1440 = vsyncadd [#allocation3], 4294961152 }
  0x1e   :  { %1441 = dma.done.wait [#allocation6], 8192  }
  0x1f   :  { %1442 = vsyncadd [#allocation6], 4294959104 }
  0x20   :  { %1443 = dma.done.wait [#allocation9], 12288  }
  0x21   :  { %1444 = vsyncadd [#allocation9], 4294955008 }
  0x22   :  { %1445 = dma.done.wait [#allocation12], 2048  }
  0x23   :  { %1446 = vsyncadd [#allocation12], 4294965248  ;;  %v336_v0 = vld [vmem:[#allocation2 + $0x178] sm:$0xff]  ;;  %v335_v2 = vld [vmem:[#allocation2 + $0x170] sm:$0xff]  ;;  %v172_v27 = vlaneseq  ;;  %s1909_s3 = sld [smem:[#allocation19_spill]]  ;;  %vm167_vm0 = vcmask 64512  }
  0x24   :  { %v304_v1 = vld [vmem:[#allocation2 + $0x78] sm:$0xff]  ;;  %399 = vmatpush.msra.mxu2 %v336_v0  ;;  %v303_v3 = vld [vmem:[#allocation2 + $0x70] sm:$0xff]  ;;  %v334_v5 = vld [vmem:[#allocation2 + $0x168] sm:$0xff]  ;;  %vm231_vm1 = vcmask 1041408   ;;  %vm261_vm2 = vcmask 1040384   ;;  %s1910_s4 = sld [smem:[#allocation21_spill]] }
  0x25   :  { %341 = vmatpush.msra.mxu0 %v304_v1  ;;  %v320_v4 = vld [vmem:[#allocation2 + $0xf8] sm:$0xff]  ;;  %v302_v6 = vld [vmem:[#allocation2 + $0x68] sm:$0xff]  ;;  %v319_v7 = vld [vmem:[#allocation2 + $0xf0] sm:$0xff]  ;;  %v173_v39 = vshrl.u32 %v172_v27, 7  ;;  %s1911_s11 = sld [smem:[#allocation22_spill]]  ;;  %vm708_vm8 = vcmask 1043456  }
  0x26   :  { %370 = vmatpush.msra.mxu1 %v320_v4  ;;  %400 = vmatpush.msra.mxu2 %v335_v2  ;;  %v318_v8 = vld [vmem:[#allocation2 + $0xe8] sm:$0xff]  ;;  %v333_v9 = vld [vmem:[#allocation2 + $0x160] sm:$0xff]  ;;  %v332_v12 = vld [vmem:[#allocation2 + $0x158] sm:$0xff]  ;;  %s1912_s19 = sld [smem:[#allocation23_spill]] }
  0x27   :  { %342 = vmatpush.msra.mxu0 %v303_v3  ;;  %v301_v10 = vld [vmem:[#allocation2 + $0x60] sm:$0xff]  ;;  %v300_v13 = vld [vmem:[#allocation2 + $0x58] sm:$0xff]  ;;  %v331_v15 = vld [vmem:[#allocation2 + $0x150] sm:$0xff]  ;;  %v1620_v49 = vand.u32 15, %v173_v39 }
  0x28   :  { %371 = vmatpush.msra.mxu1 %v319_v7  ;;  %401 = vmatpush.msra.mxu2 %v334_v5  ;;  %v317_v11 = vld [vmem:[#allocation2 + $0xe0] sm:$0xff]  ;;  %v316_v14 = vld [vmem:[#allocation2 + $0xd8] sm:$0xff]  ;;  %v299_v16 = vld [vmem:[#allocation2 + $0x50] sm:$0xff] }
  0x29   :  { %343 = vmatpush.msra.mxu0 %v302_v6  ;;  %v315_v17 = vld [vmem:[#allocation2 + $0xd0] sm:$0xff]  ;;  %v330_v18 = vld [vmem:[#allocation2 + $0x148] sm:$0xff]  ;;  %v329_v21 = vld [vmem:[#allocation2 + $0x140] sm:$0xff]  ;;  %vm243_vm3 = vcmp.ge.s32.totalorder %v1620_v49, 2  ;;  %vm273_vm4 = vcmp.ge.s32.totalorder %v1620_v49, 1  ;;  %v175_v6 = vadd.s32 16, %v173_v39 }
  0x2a   :  { %372 = vmatpush.msra.mxu1 %v318_v8  ;;  %402 = vmatpush.msra.mxu2 %v333_v9  ;;  %v298_v19 = vld [vmem:[#allocation2 + $0x48] sm:$0xff]  ;;  %v297_v22 = vld [vmem:[#allocation2 + $0x40] sm:$0xff]  ;;  %v328_v24 = vld [vmem:[#allocation2 + $0x138] sm:$0xff]  ;;  %vm720_vm7 = vcmp.ge.s32.totalorder %v1620_v49, 4 }
  0x2b   :  { %344 = vmatpush.msra.mxu0 %v301_v10  ;;  %v314_v20 = vld [vmem:[#allocation2 + $0xc8] sm:$0xff]  ;;  %v313_v23 = vld [vmem:[#allocation2 + $0xc0] sm:$0xff]  ;;  %v296_v25 = vld [vmem:[#allocation2 + $0x38] sm:$0xff] }
  0x2c   :  { %373 = vmatpush.msra.mxu1 %v317_v11  ;;  %403 = vmatpush.msra.mxu2 %v332_v12  ;;  %v312_v26 = vld [vmem:[#allocation2 + $0xb8] sm:$0xff]  ;;  %v327_v28 = vld [vmem:[#allocation2 + $0x130] sm:$0xff]  ;;  %v326_v30 = vld [vmem:[#allocation2 + $0x128] sm:$0xff]  ;;  %v1654_v12 = vand.u32 15, %v175_v6 }
  0x2d   :  { %345 = vmatpush.msra.mxu0 %v300_v13  ;;  %v295_v29 = vld [vmem:[#allocation2 + $0x30] sm:$0xff]  ;;  %v294_v31 = vld [vmem:[#allocation2 + $0x28] sm:$0xff]  ;;  %v325_v33 = vld [vmem:[#allocation2 + $0x120] sm:$0xff] }
  0x2e   :  { %374 = vmatpush.msra.mxu1 %v316_v14  ;;  %404 = vmatpush.msra.mxu2 %v331_v15  ;;  %v311_v32 = vld [vmem:[#allocation2 + $0xb0] sm:$0xff]  ;;  %v293_v34 = vld [vmem:[#allocation2 + $0x20] sm:$0xff]  ;;  %v1612_v36 = vld [vmem:[%s1909_s3 + $0x18] sm:$0xff]  ;;  %vm245_vm5 = vcmp.ge.s32.totalorder %v1654_v12, 2  ;;  %vm275_vm6 = vcmp.ge.s32.totalorder %v1654_v12, 1  ;;  %vm722_vm9 = vcmp.ge.s32.totalorder %v1654_v12, 4 }
  0x2f   :  { %346 = vmatpush.msra.mxu0 %v299_v16  ;;  %v1607_v35 = vld [vmem:[%s1909_s3] sm:$0xff]  ;;  %v310_v37 = vld [vmem:[#allocation2 + $0xa8] sm:$0xff]  ;;  %v324_v40 = vld [vmem:[#allocation2 + $0x118] sm:$0xff]  ;;  %v1618_v44 = vsel %vm167_vm0, %v1612_v36, 0.0 }
  0x30   :  { %375 = vmatpush.msra.mxu1 %v315_v17  ;;  %405 = vmatpush.msra.mxu2 %v330_v18  ;;  %v309_v38 = vld [vmem:[#allocation2 + $0xa0] sm:$0xff]  ;;  %v292_v41 = vld [vmem:[#allocation2 + $0x18] sm:$0xff]  ;;  %v168_v43 = vsel %vm167_vm0, %v1607_v35, 0.0  ;;  %v323_v45 = vld [vmem:[#allocation2 + $0x110] sm:$0xff]  ;;  %v226_v50 = vrot.slane %v1618_v44, 6  ;;  %v259_v55 = vrot.slane %v1618_v44, 7 }
  0x31   :  { %347 = vmatpush.msra.mxu0 %v298_v19  ;;  %v308_v42 = vld [vmem:[#allocation2 + $0x98] sm:$0xff]  ;;  %v291_v46 = vld [vmem:[#allocation2 + $0x10] sm:$0xff]  ;;  %v232_v48 = vrot.slane %v168_v43, 6  ;;  %v322_v51 = vld [vmem:[#allocation2 + $0x108] sm:$0xff]  ;;  %v262_v53 = vrot.slane %v168_v43, 7 }
  0x32   :  { %376 = vmatpush.msra.mxu1 %v314_v20  ;;  %406 = vmatpush.msra.mxu2 %v329_v21  ;;  %v307_v47 = vld [vmem:[#allocation2 + $0x90] sm:$0xff]  ;;  %v290_v52 = vld [vmem:[#allocation2 + $0x8] sm:$0xff]  ;;  %v321_v57 = vld [vmem:[#allocation2 + $0x100] sm:$0xff] }
  0x33   :  { %348 = vmatpush.msra.mxu0 %v297_v22  ;;  %v306_v54 = vld [vmem:[#allocation2 + $0x88] sm:$0xff]  ;;  %v289_v58 = vld [vmem:[#allocation2] sm:$0xff]  ;;  %v242_v59 = vsel %vm231_vm1, %v226_v50, %v232_v48  ;;  %v272_v62 = vsel %vm261_vm2, %v259_v55, %v262_v53  ;;  %v533_v63 = vld [vmem:[#allocation5 + $0x178] sm:$0xff] }
  0x34   :  { %377 = vmatpush.msra.mxu1 %v313_v23  ;;  %407 = vmatpush.msra.mxu2 %v328_v24  ;;  %v1627_v56 = vld [vmem:[%s1909_s3 + $0x8] sm:$0xff]  ;;  %v305_v60 = vld [vmem:[#allocation2 + $0x80] sm:$0xff]  ;;  %v532_v1 = vld [vmem:[#allocation5 + $0x170] sm:$0xff] }
  0x35   :  { %349 = vmatpush.msra.mxu0 %v296_v25  ;;  %v169_v61 = vsel %vm167_vm0, %v1627_v56, 0.0  ;;  %v1646_v3 = vld [vmem:[%s1909_s3 + $0x10] sm:$0xff]  ;;  %v531_v4 = vld [vmem:[#allocation5 + $0x168] sm:$0xff]  ;;  %v530_v8 = vld [vmem:[#allocation5 + $0x160] sm:$0xff] }
  0x36   :  { %378 = vmatpush.msra.mxu1 %v312_v26  ;;  %408 = vmatpush.msra.mxu2 %v327_v28  ;;  %v233_v0 = vrot.slane %v169_v61, 6  ;;  %v263_v2 = vrot.slane %v169_v61, 7  ;;  %v170_v7 = vsel %vm167_vm0, %v1646_v3, 0.0  ;;  %v529_v10 = vld [vmem:[#allocation5 + $0x158] sm:$0xff]  ;;  %v528_v13 = vld [vmem:[#allocation5 + $0x150] sm:$0xff]  ;;  %v527_v15 = vld [vmem:[#allocation5 + $0x148] sm:$0xff] }
  0x37   :  { %350 = vmatpush.msra.mxu0 %v295_v29  ;;  %v235_v11 = vrot.slane %v170_v7, 6  ;;  %v265_v14 = vrot.slane %v170_v7, 7  ;;  %v526_v17 = vld [vmem:[#allocation5 + $0x140] sm:$0xff]  ;;  %v525_v19 = vld [vmem:[#allocation5 + $0x138] sm:$0xff]  ;;  %v524_v22 = vld [vmem:[#allocation5 + $0x130] sm:$0xff] }
  0x38   :  { %379 = vmatpush.msra.mxu1 %v311_v32  ;;  %409 = vmatpush.msra.mxu2 %v326_v30  ;;  %v234_v5 = vsel %vm231_vm1, %v232_v48, %v233_v0  ;;  %v264_v9 = vsel %vm261_vm2, %v262_v53, %v263_v2  ;;  %v523_v23 = vld [vmem:[#allocation5 + $0x128] sm:$0xff]  ;;  %v522_v24 = vld [vmem:[#allocation5 + $0x120] sm:$0xff]  ;;  %v521_v25 = vld [vmem:[#allocation5 + $0x118] sm:$0xff] }
  0x39   :  { %351 = vmatpush.msra.mxu0 %v294_v31  ;;  %v236_v16 = vsel %vm231_vm1, %v233_v0, %v235_v11  ;;  %v266_v18 = vsel %vm261_vm2, %v263_v2, %v265_v14  ;;  %v237_v20 = vsel %vm231_vm1, %v235_v11, %v226_v50  ;;  %v267_v21 = vsel %vm261_vm2, %v265_v14, %v259_v55  ;;  %v520_v26 = vld [vmem:[#allocation5 + $0x110] sm:$0xff]  ;;  %v501_v27 = vld [vmem:[#allocation5 + $0x78] sm:$0xff]  ;;  %v519_v29 = vld [vmem:[#allocation5 + $0x108] sm:$0xff] }
  0x3a   :  { %380 = vmatpush.msra.mxu1 %v310_v37  ;;  %410 = vmatpush.msra.mxu2 %v325_v33  ;;  %v517_v28 = vld [vmem:[#allocation5 + $0xf8] sm:$0xff]  ;;  %v500_v30 = vld [vmem:[#allocation5 + $0x70] sm:$0xff]  ;;  %v518_v32 = vld [vmem:[#allocation5 + $0x100] sm:$0xff] }
  0x3b   :  { %352 = vmatpush.msra.mxu0 %v293_v34  ;;  %538 = vmatpush.msra.mxu3 %v501_v27  ;;  %v516_v31 = vld [vmem:[#allocation5 + $0xf0] sm:$0xff]  ;;  %v499_v33 = vld [vmem:[#allocation5 + $0x68] sm:$0xff]  ;;  %v498_v37 = vld [vmem:[#allocation5 + $0x60] sm:$0xff] }
  0x3c   :  { %381 = vmatpush.msra.mxu1 %v309_v38  ;;  %411 = vmatpush.msra.mxu2 %v324_v40  ;;  %v515_v34 = vld [vmem:[#allocation5 + $0xe8] sm:$0xff]  ;;  %v514_v38 = vld [vmem:[#allocation5 + $0xe0] sm:$0xff]  ;;  %v497_v39 = vld [vmem:[#allocation5 + $0x58] sm:$0xff] }
  0x3d   :  { %353 = vmatpush.msra.mxu0 %v292_v41  ;;  %539 = vmatpush.msra.mxu3 %v500_v30  ;;  %v513_v40 = vld [vmem:[#allocation5 + $0xd8] sm:$0xff]  ;;  %v512_v43 = vld [vmem:[#allocation5 + $0xd0] sm:$0xff]  ;;  %v494_v48 = vld [vmem:[#allocation5 + $0x40] sm:$0xff] }
  0x3e   :  { %382 = vmatpush.msra.mxu1 %v308_v42  ;;  %412 = vmatpush.msra.mxu2 %v323_v45  ;;  %v660_v41 = vld [vmem:[#allocation7 + $0x78] sm:$0xff]  ;;  %v496_v42 = vld [vmem:[#allocation5 + $0x50] sm:$0xff]  ;;  %v495_v45 = vld [vmem:[#allocation5 + $0x48] sm:$0xff] }
  0x3f   :  { %354 = vmatpush.msra.mxu0 %v291_v46  ;;  %540 = vmatpush.msra.mxu3 %v499_v33  ;;  %v659_v44 = vld [vmem:[#allocation7 + $0x70] sm:$0xff]  ;;  %v511_v46 = vld [vmem:[#allocation5 + $0xc8] sm:$0xff]  ;;  %v510_v50 = vld [vmem:[#allocation5 + $0xc0] sm:$0xff] }
  0x40   :  { %383 = vmatpush.msra.mxu1 %v307_v47  ;;  %413 = vmatpush.msra.mxu2 %v322_v51  ;;  %v658_v47 = vld [vmem:[#allocation7 + $0x68] sm:$0xff]  ;;  %v657_v51 = vld [vmem:[#allocation7 + $0x60] sm:$0xff]  ;;  %v509_v53 = vld [vmem:[#allocation5 + $0xb8] sm:$0xff] }
  0x41   :  { %355 = vmatpush.msra.mxu0 %v290_v52  ;;  %541 = vmatpush.msra.mxu3 %v498_v37  ;;  %v493_v52 = vld [vmem:[#allocation5 + $0x38] sm:$0xff]  ;;  %v492_v55 = vld [vmem:[#allocation5 + $0x30] sm:$0xff]  ;;  %v507_v61 = vld [vmem:[#allocation5 + $0xa8] sm:$0xff] }
  0x42   :  { %384 = vmatpush.msra.mxu1 %v306_v54  ;;  %414 = vmatpush.msra.mxu2 %v321_v57  ;;  %v656_v54 = vld [vmem:[#allocation7 + $0x58] sm:$0xff]  ;;  %v508_v57 = vld [vmem:[#allocation5 + $0xb0] sm:$0xff]  ;;  %v490_v0 = vld [vmem:[#allocation5 + $0x20] sm:$0xff] }
  0x43   :  { %356 = vmatpush.msra.mxu0 %v289_v58  ;;  %1196 = vmatmul.msk.f32.vlgmr.msra.gmra.mxu2 %vm167_vm0, %v1607_v35  ;;  %v1675_v58 = vld [vmem:[%s1910_s4] ss:$0 sm:$0xff]  ;;  %v489_v6 = vld [vmem:[#allocation5 + $0x18] sm:$0xff]  ;;  %v504_v11 = vld [vmem:[#allocation5 + $0x90] sm:$0xff] }
  0x44   :  { %1192 = vmatmul.msk.f32.vlgmr.msra.gmra.mxu0 %vm243_vm3, %v242_v59  ;;  %385 = vmatpush.msra.mxu1 %v305_v60  ;;  %v655_v59 = vld [vmem:[#allocation7 + $0x50] sm:$0xff]  ;;  %v491_v60 = vld [vmem:[#allocation5 + $0x28] sm:$0xff]  ;;  %v505_v7 = vld [vmem:[#allocation5 + $0x98] sm:$0xff] }
  0x45   :  { %1194 = vmatmul.msk.f32.vlgmr.msra.gmra.mxu1 %vm273_vm4, %v272_v62  ;;  %567 = vmatpush.msrb.mxu0 %v517_v28  ;;  %v487_v14 = vld [vmem:[#allocation5 + $0x8] sm:$0xff]  ;;  %v649_v27 = vld [vmem:[#allocation7 + $0x20] sm:$0xff]  ;;  %v648_v28 = vld [vmem:[#allocation7 + $0x18] sm:$0xff] }
  0x46   :  { %596 = vmatpush.msrb.mxu1 %v533_v63  ;;  %542 = vmatpush.msra.mxu3 %v497_v39  ;;  %v654_v63 = vld [vmem:[#allocation7 + $0x48] sm:$0xff]  ;;  %v1128_v12 = vld [vmem:[#allocation11 + $0x58] sm:$0xff] }
  0x47   :  { %568 = vmatpush.msrb.mxu0 %v516_v31  ;;  %665 = vmatpush.msrb.mxu2 %v660_v41  ;;  %v647_v31 = vld [vmem:[#allocation7 + $0x10] sm:$0xff] }
  0x48   :  { %597 = vmatpush.msrb.mxu1 %v532_v1  ;;  %543 = vmatpush.msra.mxu3 %v496_v42  ;;  %v506_v1 = vld [vmem:[#allocation5 + $0xa0] sm:$0xff] }
  0x49   :  { %569 = vmatpush.msrb.mxu0 %v515_v34  ;;  %666 = vmatpush.msrb.mxu2 %v659_v44  ;;  %v646_v34 = vld [vmem:[#allocation7 + $0x8] sm:$0xff]  ;;  %v645_v42 = vld [vmem:[#allocation7] sm:$0xff] }
  0x4a   :  { %598 = vmatpush.msrb.mxu1 %v531_v4  ;;  %544 = vmatpush.msra.mxu3 %v495_v45 }
  0x4b   :  { %1197 = vmatmul.msk.f32.gmra.mxu2 %vm167_vm0, %v1627_v56  ;;  %570 = vmatpush.msrb.mxu0 %v514_v38 }
  0x4c   :  { %360 = vmatmul.f32.gmra.mxu0 %v234_v5  ;;  %599 = vmatpush.msrb.mxu1 %v530_v8  ;;  %v653_v5 = vld [vmem:[#allocation7 + $0x40] sm:$0xff] }
  0x4d   :  { %389 = vmatmul.f32.gmra.mxu1 %v264_v9  ;;  %571 = vmatpush.msrb.mxu0 %v513_v40  ;;  %v652_v9 = vld [vmem:[#allocation7 + $0x38] sm:$0xff] }
  0x4e   :  { %600 = vmatpush.msrb.mxu1 %v529_v10  ;;  %667 = vmatpush.msrb.mxu2 %v658_v47  ;;  %v488_v10 = vld [vmem:[#allocation5 + $0x10] sm:$0xff] }
  0x4f   :  { %572 = vmatpush.msrb.mxu0 %v512_v43  ;;  %545 = vmatpush.msra.mxu3 %v494_v48 }
  0x50   :  { %601 = vmatpush.msrb.mxu1 %v528_v13  ;;  %668 = vmatpush.msrb.mxu2 %v657_v51  ;;  %v651_v13 = vld [vmem:[#allocation7 + $0x30] sm:$0xff] }
  0x51   :  { %573 = vmatpush.msrb.mxu0 %v511_v46  ;;  %546 = vmatpush.msra.mxu3 %v493_v52 }
  0x52   :  { %602 = vmatpush.msrb.mxu1 %v527_v15  ;;  %669 = vmatpush.msrb.mxu2 %v656_v54  ;;  %v503_v15 = vld [vmem:[#allocation5 + $0x88] sm:$0xff] }
  0x53   :  { %1198 = vmatmul.msk.f32.gmra.mxu2 %vm167_vm0, %v1646_v3  ;;  %574 = vmatpush.msrb.mxu0 %v510_v50 }
  0x54   :  { %1193 = vmatmul.msk.f32.gmra.mxu0 %vm245_vm5, %v236_v16  ;;  %603 = vmatpush.msrb.mxu1 %v526_v17  ;;  %v1258_v17 = vld [vmem:[%s1911_s11] ss:$0 sm:$0xff] }
  0x55   :  { %1195 = vmatmul.msk.f32.gmra.mxu1 %vm275_vm6, %v266_v18  ;;  %575 = vmatpush.msrb.mxu0 %v509_v53 }
  0x56   :  { %604 = vmatpush.msrb.mxu1 %v525_v19  ;;  %547 = vmatpush.msra.mxu3 %v492_v55  ;;  %v650_v19 = vld [vmem:[#allocation7 + $0x28] sm:$0xff] }
  0x57   :  { %576 = vmatpush.msrb.mxu0 %v508_v57  ;;  %670 = vmatpush.msrb.mxu2 %v655_v59 }
  0x58   :  { %605 = vmatpush.msrb.mxu1 %v524_v22  ;;  %548 = vmatpush.msra.mxu3 %v491_v60 }
  0x59   :  { %577 = vmatpush.msrb.mxu0 %v507_v61  ;;  %671 = vmatpush.msrb.mxu2 %v654_v63 }
  0x5a   :  { %606 = vmatpush.msrb.mxu1 %v523_v23  ;;  %549 = vmatpush.msra.mxu3 %v490_v0 }
  0x5b   :  { %1199 = vmatmul.msk.f32.gmra.mxu2 %vm167_vm0, %v1612_v36  ;;  %578 = vmatpush.msrb.mxu0 %v506_v1 }
  0x5c   :  { %366 = vmatmul.f32.gmra.mxu0 %v237_v20  ;;  %607 = vmatpush.msrb.mxu1 %v522_v24  ;;  %v486_v20 = vld [vmem:[#allocation5] sm:$0xff] }
  0x5d   :  { %395 = vmatmul.f32.gmra.mxu1 %v267_v21  ;;  %672 = vmatpush.msrb.mxu2 %v653_v5  ;;  %v502_v21 = vld [vmem:[#allocation5 + $0x80] sm:$0xff] }
  0x5e   :  { %608 = vmatpush.msrb.mxu1 %v521_v25  ;;  %550 = vmatpush.msra.mxu3 %v489_v6  ;;  %v1259_v25 = vld [vmem:[%s1912_s19] ss:$0 sm:$0xff]  ;;  %s1176_s19 = sshll.u32 %s1899_s21, 4  ;;  %s1177_s19 = int_to_ptr.hbm [resolvable:$true] %s1176_s19 }
  0x5f   :  { %579 = vmatpush.msrb.mxu0 %v505_v7  ;;  %673 = vmatpush.msrb.mxu2 %v652_v9 }
  0x60   :  { %609 = vmatpush.msrb.mxu1 %v520_v26  ;;  %551 = vmatpush.msra.mxu3 %v488_v10 }
  0x61   :  { %580 = vmatpush.msrb.mxu0 %v504_v11  ;;  %674 = vmatpush.msrb.mxu2 %v651_v13  ;;  %v800_v11 = vld [vmem:[#allocation8 + $0x178] sm:$0xff]  ;;  %v799_v13 = vld [vmem:[#allocation8 + $0x170] sm:$0xff] }
  0x62   :  { %610 = vmatpush.msrb.mxu1 %v519_v29  ;;  %552 = vmatpush.msra.mxu3 %v487_v14  ;;  %v798_v14 = vld [vmem:[#allocation8 + $0x168] sm:$0xff] }
  0x63   :  { %581 = vmatpush.msrb.mxu0 %v503_v15  ;;  %675 = vmatpush.msrb.mxu2 %v650_v19  ;;  %v797_v15 = vld [vmem:[#allocation8 + $0x160] sm:$0xff] }
  0x64   :  { %611 = vmatpush.msrb.mxu1 %v518_v32  ;;  %553 = vmatpush.msra.mxu3 %v486_v20  ;;  %v793_v19 = vld [vmem:[#allocation8 + $0x140] sm:$0xff]  ;;  %v792_v20 = vld [vmem:[#allocation8 + $0x138] sm:$0xff] }
  0x65   :  { %582 = vmatpush.msrb.mxu0 %v502_v21  ;;  %676 = vmatpush.msrb.mxu2 %v649_v27  ;;  %v791_v21 = vld [vmem:[#allocation8 + $0x130] sm:$0xff]  ;;  %v784_v27 = vld [vmem:[#allocation8 + $0xf8] sm:$0xff] }
  0x66   :  { %863 = vmatpush.msra.mxu1 %v800_v11 }
  0x67   :  { %677 = vmatpush.msrb.mxu2 %v648_v28  ;;  %834 = vmatpush.msra.mxu0 %v784_v27  ;;  %v786_v28 = vld [vmem:[#allocation8 + $0x108] sm:$0xff] }
  0x68   :  { %864 = vmatpush.msra.mxu1 %v799_v13 }
  0x69   :  { %678 = vmatpush.msrb.mxu2 %v647_v31  ;;  %v785_v31 = vld [vmem:[#allocation8 + $0x100] sm:$0xff] }
  0x6a   :  { %865 = vmatpush.msra.mxu1 %v798_v14  ;;  %v753_v14 = vld [vmem:[#allocation8] sm:$0xff] }
  0x6b   :  { %679 = vmatpush.msrb.mxu2 %v646_v34  ;;  %v765_v34 = vld [vmem:[#allocation8 + $0x60] sm:$0xff] }
  0x6c   :  { %866 = vmatpush.msra.mxu1 %v797_v15  ;;  %v769_v15 = vld [vmem:[#allocation8 + $0x80] sm:$0xff] }
  0x6d   :  { %680 = vmatpush.msrb.mxu2 %v645_v42  ;;  %v762_v42 = vld [vmem:[#allocation8 + $0x48] sm:$0xff] }
  0x6e   :  { %1204 = vmatmul.msk.f32.vlgmr.msrb.gmra.mxu2 %vm167_vm0, %v1607_v35 }
  0x76   :  { %1205 = vmatmul.msk.f32.gmra.mxu2 %vm167_vm0, %v1627_v56 }
  0x7e   :  { %1206 = vmatmul.msk.f32.gmra.mxu2 %vm167_vm0, %v1646_v3 }
  0x86   :  { %1207 = vmatmul.msk.f32.gmra.mxu2 %vm167_vm0, %v1612_v36 }
  0xc1   :  { %v358_v62 = vpop.f32.mrf.mxu0 }
  0xc2   :  { %v359_v2 = vadd.f32 %v1675_v58, %v358_v62  ;;  %v387_v4 = vpop.f32.mrf.mxu1 }
  0xc4   :  { %v388_v8 = vadd.f32 %v387_v4, %v359_v2 }
  0xc6   :  { %v416_v16 = vpop.f32.mrf.mxu2 }
  0xc7   :  { %v417_v18 = vadd.f32 %v416_v16, %v388_v8  ;;  %v796_v16 = vld [vmem:[#allocation8 + $0x158] sm:$0xff] }
  0xc8   :  { %867 = vmatpush.msra.mxu1 %v796_v16 }
  0xc9   :  { %v361_v22 = vpop.f32.mrf.mxu0  ;;  %v428_v23 = vmax.f32 %v417_v18, 0.0  ;;  %v794_v18 = vld [vmem:[#allocation8 + $0x148] sm:$0xff] }
  0xca   :  { %v362_v24 = vadd.f32 %v1675_v58, %v361_v22  ;;  %v390_v26 = vpop.f32.mrf.mxu1  ;;  %v790_v22 = vld [vmem:[#allocation8 + $0x128] sm:$0xff] }
  0xcb   :  { %v436_v29 = vmul.f32 %v1258_v17, %v428_v23  ;;  %v789_v23 = vld [vmem:[#allocation8 + $0x120] sm:$0xff] }
  0xcc   :  { %v391_v30 = vadd.f32 %v390_v26, %v362_v24  ;;  %v788_v24 = vld [vmem:[#allocation8 + $0x118] sm:$0xff] }
  0xcd   :  { %v444_v32 = vadd.f32 %v1259_v25, %v436_v29  ;;  %v768_v26 = vld [vmem:[#allocation8 + $0x78] sm:$0xff]  ;;  %v767_v29 = vld [vmem:[#allocation8 + $0x70] sm:$0xff] }
  0xce   :  { %v419_v33 = vpop.f32.mrf.mxu2  ;;  %805 = vmatpush.msrb.mxu3 %v768_v26 }
  0xcf   :  { %v420_v37 = vadd.f32 %v419_v33, %v391_v30  ;;  %612 = vmatmul.f32.vlgmr.msrb.gmra.mxu1 %v444_v32  ;;  %v454_v63 = vrot.slane %v444_v32, 6  ;;  %v471_v0 = vrot.slane %v444_v32, 7  ;;  %v783_v30 = vld [vmem:[#allocation8 + $0xf0] sm:$0xff]  ;;  %v766_v32 = vld [vmem:[#allocation8 + $0x68] sm:$0xff] }
  0xd0   :  { %806 = vmatpush.msrb.mxu3 %v767_v29  ;;  %835 = vmatpush.msra.mxu0 %v783_v30  ;;  %v782_v33 = vld [vmem:[#allocation8 + $0xe8] sm:$0xff] }
  0xd1   :  { %v364_v38 = vpop.f32.mrf.mxu0  ;;  %v429_v39 = vmax.f32 %v420_v37, 0.0  ;;  %v781_v37 = vld [vmem:[#allocation8 + $0xe0] sm:$0xff] }
  0xd2   :  { %v365_v40 = vadd.f32 %v1675_v58, %v364_v38  ;;  %v393_v41 = vpop.f32.mrf.mxu1  ;;  %807 = vmatpush.msrb.mxu3 %v766_v32  ;;  %836 = vmatpush.msra.mxu0 %v782_v33  ;;  %v764_v38 = vld [vmem:[#allocation8 + $0x58] sm:$0xff] }
  0xd3   :  { %v437_v43 = vmul.f32 %v1258_v17, %v429_v39  ;;  %v780_v39 = vld [vmem:[#allocation8 + $0xd8] sm:$0xff] }
  0xd4   :  { %v394_v44 = vadd.f32 %v393_v41, %v365_v40  ;;  %808 = vmatpush.msrb.mxu3 %v765_v34  ;;  %837 = vmatpush.msra.mxu0 %v781_v37  ;;  %v763_v40 = vld [vmem:[#allocation8 + $0x50] sm:$0xff] }
  0xd5   :  { %v445_v45 = vadd.f32 %v1259_v25, %v437_v43  ;;  %v779_v41 = vld [vmem:[#allocation8 + $0xd0] sm:$0xff]  ;;  %v778_v43 = vld [vmem:[#allocation8 + $0xc8] sm:$0xff] }
  0xd6   :  { %v422_v46 = vpop.f32.mrf.mxu2  ;;  %809 = vmatpush.msrb.mxu3 %v764_v38  ;;  %838 = vmatpush.msra.mxu0 %v780_v39 }
  0xd7   :  { %v423_v47 = vadd.f32 %v422_v46, %v394_v44  ;;  %615 = vmatmul.f32.gmra.mxu1 %v445_v45  ;;  %v455_v56 = vrot.slane %v445_v45, 6  ;;  %v472_v3 = vrot.slane %v445_v45, 7  ;;  %v761_v44 = vld [vmem:[#allocation8 + $0x40] sm:$0xff] }
  0xd8   :  { %810 = vmatpush.msrb.mxu3 %v763_v40  ;;  %839 = vmatpush.msra.mxu0 %v779_v41  ;;  %v777_v45 = vld [vmem:[#allocation8 + $0xc0] sm:$0xff] }
  0xd9   :  { %v367_v48 = vpop.f32.mrf.mxu0  ;;  %v430_v50 = vmax.f32 %v423_v47, 0.0  ;;  %v456_v4 = vsel %vm231_vm1, %v454_v63, %v455_v56  ;;  %v473_v5 = vsel %vm261_vm2, %v471_v0, %v472_v3  ;;  %v760_v47 = vld [vmem:[#allocation8 + $0x38] sm:$0xff] }
  0xda   :  { %v368_v51 = vadd.f32 %v1675_v58, %v367_v48  ;;  %v396_v52 = vpop.f32.mrf.mxu1  ;;  %811 = vmatpush.msrb.mxu3 %v762_v42  ;;  %840 = vmatpush.msra.mxu0 %v778_v43  ;;  %v776_v48 = vld [vmem:[#allocation8 + $0xb8] sm:$0xff] }
  0xdb   :  { %v438_v53 = vmul.f32 %v1258_v17, %v430_v50  ;;  %v1714_v50 = vld [vmem:[%s1884_s6] ss:$0 sm:$0xff] }
  0xdc   :  { %v397_v54 = vadd.f32 %v396_v52, %v368_v51  ;;  %812 = vmatpush.msrb.mxu3 %v761_v44  ;;  %841 = vmatpush.msra.mxu0 %v777_v45  ;;  %v759_v52 = vld [vmem:[#allocation8 + $0x30] sm:$0xff] }
  0xdd   :  { %v446_v55 = vadd.f32 %v1259_v25, %v438_v53  ;;  %v775_v53 = vld [vmem:[#allocation8 + $0xb0] sm:$0xff] }
  0xde   :  { %v425_v57 = vpop.f32.mrf.mxu2  ;;  %813 = vmatpush.msrb.mxu3 %v760_v47  ;;  %842 = vmatpush.msra.mxu0 %v776_v48 }
  0xdf   :  { %v426_v59 = vadd.f32 %v425_v57, %v397_v54  ;;  %618 = vmatmul.f32.gmra.mxu1 %v446_v55  ;;  %v457_v6 = vrot.slane %v446_v55, 6  ;;  %v474_v7 = vrot.slane %v446_v55, 7  ;;  %v758_v54 = vld [vmem:[#allocation8 + $0x28] sm:$0xff] }
  0xe0   :  { %814 = vmatpush.msrb.mxu3 %v759_v52  ;;  %843 = vmatpush.msra.mxu0 %v775_v53  ;;  %v774_v55 = vld [vmem:[#allocation8 + $0xa8] sm:$0xff] }
  0xe1   :  { %v431_v60 = vmax.f32 %v426_v59, 0.0  ;;  %v458_v8 = vsel %vm231_vm1, %v455_v56, %v457_v6  ;;  %v475_v9 = vsel %vm261_vm2, %v472_v3, %v474_v7  ;;  %v755_v3 = vld [vmem:[#allocation8 + $0x10] sm:$0xff] }
  0xe2   :  { %815 = vmatpush.msrb.mxu3 %v758_v54  ;;  %844 = vmatpush.msra.mxu0 %v774_v55 }
  0xe3   :  { %v439_v35 = vmul.f32 %v1258_v17, %v431_v60  ;;  %v795_v17 = vld [vmem:[#allocation8 + $0x150] sm:$0xff] }
  0xe4   :  { %868 = vmatpush.msra.mxu1 %v795_v17 }
  0xe5   :  { %v447_v61 = vadd.f32 %v1259_v25, %v439_v35  ;;  %v787_v25 = vld [vmem:[#allocation8 + $0x110] sm:$0xff]  ;;  %v757_v35 = vld [vmem:[#allocation8 + $0x20] sm:$0xff] }
  0xe6   :  { %869 = vmatpush.msra.mxu1 %v794_v18  ;;  %816 = vmatpush.msrb.mxu3 %v757_v35 }
  0xe7   :  { %621 = vmatmul.f32.gmra.mxu1 %v447_v61  ;;  %v449_v62 = vrot.slane %v447_v61, 6  ;;  %v469_v58 = vrot.slane %v447_v61, 7  ;;  %v773_v61 = vld [vmem:[#allocation8 + $0xa0] sm:$0xff] }
  0xe8   :  { %870 = vmatpush.msra.mxu1 %v793_v19  ;;  %845 = vmatpush.msra.mxu0 %v773_v61 }
  0xe9   :  { %v464_v1 = vsel %vm231_vm1, %v449_v62, %v454_v63  ;;  %v481_v2 = vsel %vm261_vm2, %v469_v58, %v471_v0  ;;  %v459_v36 = vsel %vm231_vm1, %v457_v6, %v449_v62  ;;  %v476_v10 = vsel %vm261_vm2, %v474_v7, %v469_v58  ;;  %v756_v63 = vld [vmem:[#allocation8 + $0x18] sm:$0xff]  ;;  %v1262_v6 = vld [vmem:[%s1886_s8] ss:$0 sm:$0xff]  ;;  %v754_v7 = vld [vmem:[#allocation8 + $0x8] sm:$0xff] }
  0xea   :  { %1200 = vmatmul.msk.f32.vlgmr.msra.gmra.mxu3 %vm243_vm3, %v464_v1  ;;  %1202 = vmatmul.msk.f32.vlgmr.msrb.gmra.mxu0 %vm273_vm4, %v481_v2  ;;  %v772_v58 = vld [vmem:[#allocation8 + $0x98] sm:$0xff]  ;;  %v1261_v1 = vld [vmem:[%s1885_s7] ss:$0 sm:$0xff] }
  0xeb   :  { %871 = vmatpush.msra.mxu1 %v792_v20  ;;  %v1263_v2 = vld [vmem:[%s1888_s10] ss:$0 sm:$0xff]  ;;  %817 = vmatpush.msrb.mxu3 %v756_v63 }
  0xec   :  { %846 = vmatpush.msra.mxu0 %v772_v58 }
  0xed   :  { %872 = vmatpush.msra.mxu1 %v791_v21  ;;  %818 = vmatpush.msrb.mxu3 %v755_v3 }
  0xef   :  { %873 = vmatpush.msra.mxu1 %v790_v22  ;;  %819 = vmatpush.msrb.mxu3 %v754_v7 }
  0xf1   :  { %874 = vmatpush.msra.mxu1 %v789_v23  ;;  %v682_v59 = vpop.f32.mrf.mxu2  ;;  %820 = vmatpush.msrb.mxu3 %v753_v14  ;;  %v1785_v14 = vld [vmem:[#allocation10 + $0x148] sm:$0xff] }
  0xf2   :  { %557 = vmatmul.f32.gmra.mxu3 %v456_v4  ;;  %586 = vmatmul.f32.gmra.mxu0 %v473_v5  ;;  %v771_v4 = vld [vmem:[#allocation8 + $0x90] sm:$0xff]  ;;  %v683_v13 = vadd.f32 %v1263_v2, %v682_v59 }
  0xf3   :  { %875 = vmatpush.msra.mxu1 %v788_v24  ;;  %847 = vmatpush.msra.mxu0 %v771_v4 }
  0xf5   :  { %876 = vmatpush.msra.mxu1 %v787_v25 }
  0xf7   :  { %877 = vmatpush.msra.mxu1 %v786_v28 }
  0xf9   :  { %878 = vmatpush.msra.mxu1 %v785_v31  ;;  %v685_v16 = vpop.f32.mrf.mxu2 }
  0xfa   :  { %1201 = vmatmul.msk.f32.gmra.mxu3 %vm245_vm5, %v458_v8  ;;  %1203 = vmatmul.msk.f32.gmra.mxu0 %vm275_vm6, %v475_v9  ;;  %v770_v8 = vld [vmem:[#allocation8 + $0x88] sm:$0xff]  ;;  %v686_v27 = vadd.f32 %v1263_v2, %v685_v16  ;;  %v1790_v16 = vld [vmem:[#allocation10 + $0x138] sm:$0xff] }
  0xfb   :  { %848 = vmatpush.msra.mxu0 %v770_v8  ;;  %v1767_v8 = vld [vmem:[#allocation10 + $0x178] sm:$0xff] }
  0xfd   :  { %849 = vmatpush.msra.mxu0 %v769_v15  ;;  %v1788_v15 = vld [vmem:[#allocation10 + $0x140] sm:$0xff] }
  0xff   :  { %1060 = vmatpush.msrb.mxu0 %v1767_v8 }
 0x101   :  { %v688_v31 = vpop.f32.mrf.mxu2 }
 0x102   :  { %563 = vmatmul.f32.gmra.mxu3 %v459_v36  ;;  %592 = vmatmul.f32.gmra.mxu0 %v476_v10  ;;  %v689_v41 = vadd.f32 %v1263_v2, %v688_v31  ;;  %v962_v31 = vld [vmem:[#allocation10 + $0x60] sm:$0xff] }
 0x109   :  { %v691_v48 = vpop.f32.mrf.mxu2 }
 0x10a   :  { %v692_v54 = vadd.f32 %v1263_v2, %v691_v48 }
 0x14c   :  { %v613_v51 = vpop.f32.mrf.mxu1 }
 0x154   :  { %v616_v9 = vpop.f32.mrf.mxu1 }
 0x15c   :  { %v619_v28 = vpop.f32.mrf.mxu1 }
 0x164   :  { %v622_v45 = vpop.f32.mrf.mxu1 }
 0x167   :  { %v584_v46 = vpop.f32.mrf.mxu0 }
 0x16d   :  { %v555_v57 = vpop.f32.mrf.mxu3 }
 0x16e   :  { %v556_v60 = vadd.f32 %v1714_v50, %v555_v57 }
 0x16f   :  { %v587_v56 = vpop.f32.mrf.mxu0 }
 0x170   :  { %v585_v62 = vadd.f32 %v584_v46, %v556_v60 }
 0x172   :  { %v614_v0 = vadd.f32 %v613_v51, %v585_v62 }
 0x174   :  { %v625_v5 = vmax.f32 %v614_v0, 0.0 }
 0x175   :  { %v558_v36 = vpop.f32.mrf.mxu3 }
 0x176   :  { %v559_v10 = vadd.f32 %v1714_v50, %v558_v36  ;;  %v633_v11 = vmul.f32 %v1261_v1, %v625_v5  ;;  %v1772_v36 = vld [vmem:[#allocation10 + $0x168] sm:$0xff] }
 0x177   :  { %v590_v23 = vpop.f32.mrf.mxu0 }
 0x178   :  { %v588_v17 = vadd.f32 %v587_v56, %v559_v10  ;;  %v641_v18 = vadd.f32 %v1262_v6, %v633_v11  ;;  %v1775_v10 = vld [vmem:[#allocation10 + $0x160] sm:$0xff]  ;;  %v1778_v11 = vld [vmem:[#allocation10 + $0x158] sm:$0xff] }
 0x17a   :  { %v617_v19 = vadd.f32 %v616_v9, %v588_v17  ;;  %v694_v20 = vadd.f32 %v683_v13, %v641_v18  ;;  %v1770_v9 = vld [vmem:[#allocation10 + $0x170] sm:$0xff]  ;;  %v1797_v18 = vld [vmem:[#allocation10 + $0x128] sm:$0xff] }
 0x17b   :  { %1061 = vmatpush.msrb.mxu0 %v1770_v9  ;;  %v1782_v13 = vld [vmem:[#allocation10 + $0x150] sm:$0xff] }
 0x17c   :  { %v626_v21 = vmax.f32 %v617_v19, 0.0  ;;  %v1727_v22 = vmax.f32 %v694_v20, 0.0  ;;  %v1794_v17 = vld [vmem:[#allocation10 + $0x130] sm:$0xff]  ;;  %v1800_v19 = vld [vmem:[#allocation10 + $0x120] sm:$0xff]  ;;  %v1803_v20 = vld [vmem:[#allocation10 + $0x118] sm:$0xff] }
 0x17d   :  { %v561_v24 = vpop.f32.mrf.mxu3  ;;  %1062 = vmatpush.msrb.mxu0 %v1772_v36 }
 0x17e   :  { %v562_v25 = vadd.f32 %v1714_v50, %v561_v24  ;;  %879 = vmatmul.f32.vlgmr.msra.gmra.mxu1 %v1727_v22  ;;  %v634_v26 = vmul.f32 %v1261_v1, %v626_v21  ;;  %v709_v60 = vrot.slane %v1727_v22, 4  ;;  %v738_v61 = vrot.slane %v1727_v22, 6  ;;  %v1806_v21 = vld [vmem:[#allocation10 + $0x110] sm:$0xff]  ;;  %v981_v24 = vld [vmem:[#allocation10 + $0xf8] sm:$0xff] }
 0x17f   :  { %v593_v42 = vpop.f32.mrf.mxu0  ;;  %1063 = vmatpush.msrb.mxu0 %v1775_v10  ;;  %1031 = vmatpush.msra.mxu3 %v981_v24 }
 0x180   :  { %v591_v29 = vadd.f32 %v590_v23, %v562_v25  ;;  %v642_v30 = vadd.f32 %v1262_v6, %v634_v26  ;;  %v965_v23 = vld [vmem:[#allocation10 + $0x78] sm:$0xff]  ;;  %v1809_v25 = vld [vmem:[#allocation10 + $0x108] sm:$0xff]  ;;  %v964_v26 = vld [vmem:[#allocation10 + $0x70] sm:$0xff] }
 0x181   :  { %1064 = vmatpush.msrb.mxu0 %v1778_v11  ;;  %1002 = vmatpush.msra.mxu2 %v965_v23  ;;  %v1266_v23 = vld [vmem:[%s1892_s14] ss:$0 sm:$0xff] }
 0x182   :  { %v620_v32 = vadd.f32 %v619_v28, %v591_v29  ;;  %v695_v33 = vadd.f32 %v686_v27, %v642_v30  ;;  %v980_v27 = vld [vmem:[#allocation10 + $0xf0] sm:$0xff]  ;;  %v1812_v28 = vld [vmem:[#allocation10 + $0x100] sm:$0xff]  ;;  %v963_v29 = vld [vmem:[#allocation10 + $0x68] sm:$0xff] }
 0x183   :  { %1065 = vmatpush.msrb.mxu0 %v1782_v13  ;;  %1003 = vmatpush.msra.mxu2 %v964_v26  ;;  %v979_v30 = vld [vmem:[#allocation10 + $0xe8] sm:$0xff] }
 0x184   :  { %v627_v34 = vmax.f32 %v620_v32, 0.0  ;;  %v1731_v37 = vmax.f32 %v695_v33, 0.0  ;;  %1032 = vmatpush.msra.mxu3 %v980_v27  ;;  %v978_v32 = vld [vmem:[#allocation10 + $0xe0] sm:$0xff]  ;;  %v961_v33 = vld [vmem:[#allocation10 + $0x58] sm:$0xff] }
 0x185   :  { %v564_v38 = vpop.f32.mrf.mxu3  ;;  %1066 = vmatpush.msrb.mxu0 %v1785_v14  ;;  %1004 = vmatpush.msra.mxu2 %v963_v29 }
 0x186   :  { %v565_v39 = vadd.f32 %v1714_v50, %v564_v38  ;;  %882 = vmatmul.f32.gmra.mxu1 %v1731_v37  ;;  %v635_v40 = vmul.f32 %v1261_v1, %v627_v34  ;;  %v710_v58 = vrot.slane %v1731_v37, 4  ;;  %v739_v0 = vrot.slane %v1731_v37, 6  ;;  %1033 = vmatpush.msra.mxu3 %v979_v30  ;;  %v977_v34 = vld [vmem:[#allocation10 + $0xd8] sm:$0xff]  ;;  %v960_v38 = vld [vmem:[#allocation10 + $0x50] sm:$0xff] }
 0x187   :  { %1067 = vmatpush.msrb.mxu0 %v1788_v15  ;;  %1005 = vmatpush.msra.mxu2 %v962_v31 }
 0x188   :  { %v594_v43 = vadd.f32 %v593_v42, %v565_v39  ;;  %v643_v44 = vadd.f32 %v1262_v6, %v635_v40  ;;  %v740_v2 = vsel %vm231_vm1, %v738_v61, %v739_v0  ;;  %1034 = vmatpush.msra.mxu3 %v978_v32  ;;  %v976_v39 = vld [vmem:[#allocation10 + $0xd0] sm:$0xff]  ;;  %v959_v40 = vld [vmem:[#allocation10 + $0x48] sm:$0xff]  ;;  %v958_v42 = vld [vmem:[#allocation10 + $0x40] sm:$0xff] }
 0x189   :  { %1068 = vmatpush.msrb.mxu0 %v1790_v16  ;;  %1006 = vmatpush.msra.mxu2 %v961_v33 }
 0x18a   :  { %v623_v46 = vadd.f32 %v622_v45, %v594_v43  ;;  %v696_v47 = vadd.f32 %v689_v41, %v643_v44  ;;  %1035 = vmatpush.msra.mxu3 %v977_v34  ;;  %v975_v41 = vld [vmem:[#allocation10 + $0xc8] sm:$0xff]  ;;  %v974_v43 = vld [vmem:[#allocation10 + $0xc0] sm:$0xff]  ;;  %v957_v44 = vld [vmem:[#allocation10 + $0x38] sm:$0xff] }
 0x18b   :  { %1069 = vmatpush.msrb.mxu0 %v1794_v17  ;;  %1007 = vmatpush.msra.mxu2 %v960_v38  ;;  %v973_v45 = vld [vmem:[#allocation10 + $0xb8] sm:$0xff] }
 0x18c   :  { %v628_v51 = vmax.f32 %v623_v46, 0.0  ;;  %v1735_v52 = vmax.f32 %v696_v47, 0.0  ;;  %1036 = vmatpush.msra.mxu3 %v976_v39  ;;  %v956_v46 = vld [vmem:[#allocation10 + $0x30] sm:$0xff] }
 0x18d   :  { %1070 = vmatpush.msrb.mxu0 %v1797_v18  ;;  %1008 = vmatpush.msra.mxu2 %v959_v40  ;;  %v972_v47 = vld [vmem:[#allocation10 + $0xb0] sm:$0xff] }
 0x18e   :  { %885 = vmatmul.f32.gmra.mxu1 %v1735_v52  ;;  %v636_v53 = vmul.f32 %v1261_v1, %v628_v51  ;;  %v711_v1 = vsel %vm708_vm8, %v709_v60, %v710_v58  ;;  %v712_v56 = vrot.slane %v1735_v52, 4  ;;  %v741_v3 = vrot.slane %v1735_v52, 6  ;;  %1037 = vmatpush.msra.mxu3 %v975_v41  ;;  %v955_v51 = vld [vmem:[#allocation10 + $0x28] sm:$0xff] }
 0x18f   :  { %1071 = vmatpush.msrb.mxu0 %v1800_v19  ;;  %1009 = vmatpush.msra.mxu2 %v958_v42 }
 0x190   :  { %v644_v55 = vadd.f32 %v1262_v6, %v636_v53  ;;  %v713_v4 = vsel %vm708_vm8, %v710_v58, %v712_v56  ;;  %v742_v5 = vsel %vm231_vm1, %v739_v0, %v741_v3  ;;  %1038 = vmatpush.msra.mxu3 %v974_v43  ;;  %v971_v53 = vld [vmem:[#allocation10 + $0xa8] sm:$0xff]  ;;  %v968_v58 = vld [vmem:[#allocation10 + $0x90] sm:$0xff] }
 0x191   :  { %1072 = vmatpush.msrb.mxu0 %v1803_v20  ;;  %1010 = vmatpush.msra.mxu2 %v957_v44 }
 0x192   :  { %v697_v50 = vadd.f32 %v692_v54, %v644_v55  ;;  %1039 = vmatpush.msra.mxu3 %v973_v45  ;;  %v1264_v54 = vld [vmem:[%s1890_s12] ss:$0 sm:$0xff] }
 0x193   :  { %1073 = vmatpush.msrb.mxu0 %v1806_v21  ;;  %1011 = vmatpush.msra.mxu2 %v956_v46 }
 0x194   :  { %v1738_v57 = vmax.f32 %v697_v50, 0.0  ;;  %1040 = vmatpush.msra.mxu3 %v972_v47  ;;  %v954_v50 = vld [vmem:[#allocation10 + $0x20] sm:$0xff] }
 0x195   :  { %1074 = vmatpush.msrb.mxu0 %v1809_v25  ;;  %1012 = vmatpush.msra.mxu2 %v955_v51 }
 0x196   :  { %888 = vmatmul.f32.gmra.mxu1 %v1738_v57  ;;  %v703_v59 = vrot.slane %v1738_v57, 4  ;;  %v736_v35 = vrot.slane %v1738_v57, 6  ;;  %1041 = vmatpush.msra.mxu3 %v971_v53 }
 0x197   :  { %1075 = vmatpush.msrb.mxu0 %v1812_v28  ;;  %1013 = vmatpush.msra.mxu2 %v954_v50 }
 0x198   :  { %v719_v62 = vsel %vm708_vm8, %v703_v59, %v709_v60  ;;  %v748_v63 = vsel %vm231_vm1, %v736_v35, %v738_v61  ;;  %v714_v6 = vsel %vm708_vm8, %v712_v56, %v703_v59  ;;  %v743_v7 = vsel %vm231_vm1, %v741_v3, %v736_v35  ;;  %v970_v59 = vld [vmem:[#allocation10 + $0xa0] sm:$0xff]  ;;  %v953_v35 = vld [vmem:[#allocation10 + $0x18] sm:$0xff] }
 0x199   :  { %1208 = vmatmul.msk.f32.vlgmr.msrb.gmra.mxu3 %vm720_vm7, %v719_v62  ;;  %1210 = vmatmul.msk.f32.vlgmr.msra.gmra.mxu0 %vm243_vm3, %v748_v63  ;;  %v969_v61 = vld [vmem:[#allocation10 + $0x98] sm:$0xff]  ;;  %v952_v63 = vld [vmem:[#allocation10 + $0x10] sm:$0xff]  ;;  %v950_v56 = vld [vmem:[#allocation10] sm:$0xff] }
 0x19a   :  { %1042 = vmatpush.msra.mxu3 %v970_v59  ;;  %1014 = vmatpush.msra.mxu2 %v953_v35  ;;  %v966_v3 = vld [vmem:[#allocation10 + $0x80] sm:$0xff]  ;;  %v1132_v35 = vld [vmem:[#allocation11 + $0x78] sm:$0xff] }
 0x19b   :  { %1137 = vmatpush.msrb.mxu1 %v1132_v35 }
 0x19c   :  { %1043 = vmatpush.msra.mxu3 %v969_v61  ;;  %1015 = vmatpush.msra.mxu2 %v952_v63  ;;  %v1131_v61 = vld [vmem:[#allocation11 + $0x70] sm:$0xff]  ;;  %v1129_v63 = vld [vmem:[#allocation11 + $0x60] sm:$0xff] }
 0x19d   :  { %1138 = vmatpush.msrb.mxu1 %v1131_v61 }
 0x19e   :  { %1044 = vmatpush.msra.mxu3 %v968_v58  ;;  %v1127_v58 = vld [vmem:[#allocation11 + $0x50] sm:$0xff] }
 0x1a1   :  { %824 = vmatmul.f32.gmra.mxu3 %v711_v1  ;;  %853 = vmatmul.f32.gmra.mxu0 %v740_v2  ;;  %v951_v1 = vld [vmem:[#allocation10 + $0x8] sm:$0xff] }
 0x1a2   :  { %v967_v2 = vld [vmem:[#allocation10 + $0x88] sm:$0xff]  ;;  %1016 = vmatpush.msra.mxu2 %v951_v1  ;;  %v1125_v1 = vld [vmem:[#allocation11 + $0x40] sm:$0xff] }
 0x1a3   :  { %1045 = vmatpush.msra.mxu3 %v967_v2  ;;  %v1124_v2 = vld [vmem:[#allocation11 + $0x38] sm:$0xff] }
 0x1a4   :  { %1017 = vmatpush.msra.mxu2 %v950_v56  ;;  %v1123_v56 = vld [vmem:[#allocation11 + $0x30] sm:$0xff] }
 0x1a5   :  { %1046 = vmatpush.msra.mxu3 %v966_v3  ;;  %v1122_v3 = vld [vmem:[#allocation11 + $0x28] sm:$0xff] }
 0x1a6   :  { %1216 = vmatpush.msrb.mxu2 %v1767_v8 }
 0x1a7   :  { %1232 = vmatpush.msrb.mxu3 %v1132_v35 }
 0x1a8   :  { %1217 = vmatpush.msrb.mxu2 %v1770_v9 }
 0x1a9   :  { %1209 = vmatmul.msk.f32.gmra.mxu3 %vm722_vm9, %v713_v4  ;;  %1211 = vmatmul.msk.f32.gmra.mxu0 %vm245_vm5, %v742_v5  ;;  %v1265_v5 = vld [vmem:[%s1891_s13] ss:$0 sm:$0xff] }
 0x1aa   :  { %1218 = vmatpush.msrb.mxu2 %v1772_v36  ;;  %1233 = vmatpush.msrb.mxu3 %v1131_v61  ;;  %v1270_v61 = vld [vmem:[%s1898_s20] ss:$0 sm:$0xff] }
 0x1ac   :  { %1219 = vmatpush.msrb.mxu2 %v1775_v10 }
 0x1ae   :  { %1220 = vmatpush.msrb.mxu2 %v1778_v11 }
 0x1b0   :  { %1221 = vmatpush.msrb.mxu2 %v1782_v13 }
 0x1b1   :  { %830 = vmatmul.f32.gmra.mxu3 %v714_v6  ;;  %859 = vmatmul.f32.gmra.mxu0 %v743_v7 }
 0x1b2   :  { %1222 = vmatpush.msrb.mxu2 %v1785_v14 }
 0x1b4   :  { %1223 = vmatpush.msrb.mxu2 %v1788_v15 }
 0x1b6   :  { %1224 = vmatpush.msrb.mxu2 %v1790_v16 }
 0x1b8   :  { %1225 = vmatpush.msrb.mxu2 %v1794_v17 }
 0x1ba   :  { %1226 = vmatpush.msrb.mxu2 %v1797_v18 }
 0x1bc   :  { %1227 = vmatpush.msrb.mxu2 %v1800_v19 }
 0x1be   :  { %1228 = vmatpush.msrb.mxu2 %v1803_v20 }
 0x1c0   :  { %1229 = vmatpush.msrb.mxu2 %v1806_v21 }
 0x1c2   :  { %1230 = vmatpush.msrb.mxu2 %v1809_v25 }
 0x1c4   :  { %1231 = vmatpush.msrb.mxu2 %v1812_v28 }
 0x1fb   :  { %v880_v55 = vpop.f32.mrf.mxu1 }
 0x203   :  { %v883_v24 = vpop.f32.mrf.mxu1 }
 0x20b   :  { %v886_v40 = vpop.f32.mrf.mxu1 }
 0x213   :  { %v889_v11 = vpop.f32.mrf.mxu1 }
 0x216   :  { %v851_v48 = vpop.f32.mrf.mxu0 }
 0x21c   :  { %v822_v60 = vpop.f32.mrf.mxu3 }
 0x21d   :  { %v823_v62 = vadd.f32 %v1264_v54, %v822_v60 }
 0x21e   :  { %v854_v6 = vpop.f32.mrf.mxu0 }
 0x21f   :  { %v852_v0 = vadd.f32 %v851_v48, %v823_v62  ;;  %v1130_v62 = vld [vmem:[#allocation11 + $0x68] sm:$0xff] }
 0x220   :  { %1139 = vmatpush.msrb.mxu1 %v1130_v62  ;;  %1234 = vmatpush.msrb.mxu3 %v1130_v62 }
 0x221   :  { %v881_v4 = vadd.f32 %v880_v55, %v852_v0  ;;  %v1126_v0 = vld [vmem:[#allocation11 + $0x48] sm:$0xff] }
 0x222   :  { %1140 = vmatpush.msrb.mxu1 %v1129_v63  ;;  %1235 = vmatpush.msrb.mxu3 %v1129_v63 }
 0x223   :  { %v892_v7 = vmax.f32 %v881_v4, 0.0  ;;  %v1121_v4 = vld [vmem:[#allocation11 + $0x20] sm:$0xff] }
 0x224   :  { %v825_v26 = vpop.f32.mrf.mxu3  ;;  %1141 = vmatpush.msrb.mxu1 %v1128_v12  ;;  %1236 = vmatpush.msrb.mxu3 %v1128_v12 }
 0x225   :  { %v900_v27 = vmul.f32 %v1265_v5, %v892_v7  ;;  %v826_v29 = vadd.f32 %v1264_v54, %v825_v26  ;;  %v1118_v7 = vld [vmem:[#allocation11 + $0x8] sm:$0xff] }
 0x226   :  { %v857_v34 = vpop.f32.mrf.mxu0  ;;  %1142 = vmatpush.msrb.mxu1 %v1127_v58  ;;  %1237 = vmatpush.msrb.mxu3 %v1127_v58 }
 0x227   :  { %v855_v30 = vadd.f32 %v854_v6, %v826_v29  ;;  %v908_v31 = vadd.f32 %v1266_v23, %v900_v27  ;;  %v1119_v6 = vld [vmem:[#allocation11 + $0x10] sm:$0xff] }
 0x228   :  { %1143 = vmatpush.msrb.mxu1 %v1126_v0  ;;  %1238 = vmatpush.msrb.mxu3 %v1126_v0 }
 0x229   :  { %v884_v32 = vadd.f32 %v883_v24, %v855_v30  ;;  %1076 = vmatmul.f32.vlgmr.msrb.gmra.mxu0 %v908_v31  ;;  %v918_v45 = vrot.slane %v908_v31, 4  ;;  %v935_v47 = vrot.slane %v908_v31, 6  ;;  %v1267_v24 = vld [vmem:[%s1894_s16] ss:$0 sm:$0xff] }
 0x22a   :  { %1144 = vmatpush.msrb.mxu1 %v1125_v1  ;;  %1239 = vmatpush.msrb.mxu3 %v1125_v1 }
 0x22b   :  { %v893_v33 = vmax.f32 %v884_v32, 0.0 }
 0x22c   :  { %v828_v38 = vpop.f32.mrf.mxu3  ;;  %1145 = vmatpush.msrb.mxu1 %v1124_v2  ;;  %1240 = vmatpush.msrb.mxu3 %v1124_v2 }
 0x22d   :  { %v901_v39 = vmul.f32 %v1265_v5, %v893_v33  ;;  %v829_v41 = vadd.f32 %v1264_v54, %v828_v38  ;;  %v1268_v33 = vld [vmem:[%s1895_s17] ss:$0 sm:$0xff] }
 0x22e   :  { %v860_v10 = vpop.f32.mrf.mxu0  ;;  %1146 = vmatpush.msrb.mxu1 %v1123_v56  ;;  %1241 = vmatpush.msrb.mxu3 %v1123_v56  ;;  %v1269_v38 = vld [vmem:[%s1896_s18] ss:$0 sm:$0xff]  ;;  %s1457_s18 = smov [#allocation13]  }
 0x22f   :  { %v909_v8 = vadd.f32 %v1266_v23, %v901_v39  ;;  %v858_v13 = vadd.f32 %v857_v34, %v829_v41  ;;  %s1174_s11 = sshll.u32 %s1457_s18, 4  ;;  %s1175_s11 = int_to_ptr.vmem [resolvable:$true] %s1174_s11 }
 0x230   :  { %1147 = vmatpush.msrb.mxu1 %v1122_v3  ;;  %1242 = vmatpush.msrb.mxu3 %v1122_v3 }
 0x231   :  { %1079 = vmatmul.f32.gmra.mxu0 %v909_v8  ;;  %v887_v16 = vadd.f32 %v886_v40, %v858_v13  ;;  %v919_v21 = vrot.slane %v909_v8, 4  ;;  %v936_v25 = vrot.slane %v909_v8, 6 }
 0x232   :  { %1148 = vmatpush.msrb.mxu1 %v1121_v4  ;;  %1243 = vmatpush.msrb.mxu3 %v1121_v4 }
 0x233   :  { %v894_v18 = vmax.f32 %v887_v16, 0.0  ;;  %v920_v53 = vsel %vm708_vm8, %v918_v45, %v919_v21 }
 0x234   :  { %v831_v9 = vpop.f32.mrf.mxu3 }
 0x235   :  { %v832_v36 = vadd.f32 %v1264_v54, %v831_v9  ;;  %v902_v20 = vmul.f32 %v1265_v5, %v894_v18  ;;  %v937_v54 = vsel %vm231_vm1, %v935_v47, %v936_v25 }
 0x237   :  { %v861_v42 = vadd.f32 %v860_v10, %v832_v36  ;;  %v910_v51 = vadd.f32 %v1266_v23, %v902_v20 }
 0x239   :  { %v890_v43 = vadd.f32 %v889_v11, %v861_v42  ;;  %v921_v28 = vrot.slane %v910_v51, 4  ;;  %v938_v55 = vrot.slane %v910_v51, 6 }
 0x23b   :  { %v895_v14 = vmax.f32 %v890_v43, 0.0  ;;  %v922_v50 = vsel %vm708_vm8, %v919_v21, %v921_v28  ;;  %v939_v59 = vsel %vm231_vm1, %v936_v25, %v938_v55 }
 0x23d   :  { %v903_v15 = vmul.f32 %v1265_v5, %v895_v14  ;;  %v1120_v5 = vld [vmem:[#allocation11 + $0x18] sm:$0xff] }
 0x23e   :  { %1149 = vmatpush.msrb.mxu1 %v1120_v5  ;;  %1244 = vmatpush.msrb.mxu3 %v1120_v5 }
 0x23f   :  { %v911_v44 = vadd.f32 %v1266_v23, %v903_v15  ;;  %v1117_v23 = vld [vmem:[#allocation11] sm:$0xff] }
 0x240   :  { %1150 = vmatpush.msrb.mxu1 %v1119_v6  ;;  %1245 = vmatpush.msrb.mxu3 %v1119_v6 }
 0x241   :  { %v913_v17 = vrot.slane %v911_v44, 4  ;;  %v933_v46 = vrot.slane %v911_v44, 6 }
 0x242   :  { %1151 = vmatpush.msrb.mxu1 %v1118_v7  ;;  %1246 = vmatpush.msrb.mxu3 %v1118_v7 }
 0x243   :  { %v928_v19 = vsel %vm708_vm8, %v913_v17, %v918_v45  ;;  %v945_v48 = vsel %vm231_vm1, %v933_v46, %v935_v47  ;;  %v923_v49 = vsel %vm708_vm8, %v921_v28, %v913_v17  ;;  %v940_v60 = vsel %vm231_vm1, %v938_v55, %v933_v46 }
 0x244   :  { %1212 = vmatmul.msk.f32.vlgmr.msra.gmra.mxu2 %vm720_vm7, %v928_v19  ;;  %1214 = vmatmul.msk.f32.vlgmr.msra.gmra.mxu3 %vm243_vm3, %v945_v48 }
 0x245   :  { %1152 = vmatpush.msrb.mxu1 %v1117_v23  ;;  %1247 = vmatpush.msrb.mxu3 %v1117_v23 }
 0x24c   :  { %1021 = vmatmul.f32.gmra.mxu2 %v920_v53  ;;  %1050 = vmatmul.f32.gmra.mxu3 %v937_v54 }
 0x254   :  { %1213 = vmatmul.msk.f32.gmra.mxu2 %vm722_vm9, %v922_v50  ;;  %1215 = vmatmul.msk.f32.gmra.mxu3 %vm245_vm5, %v939_v59 }
 0x25c   :  { %1027 = vmatmul.f32.gmra.mxu2 %v923_v49  ;;  %1056 = vmatmul.f32.gmra.mxu3 %v940_v60 }
 0x264   :  { %1082 = vmatmul.f32.vlgmr.msrb.gmra.mxu2 %v910_v51 }
 0x26c   :  { %1085 = vmatmul.f32.gmra.mxu2 %v911_v44 }
 0x2a6   :  { %v1077_v30 = vpop.f32.mrf.mxu0 }
 0x2ae   :  { %v1080_v41 = vpop.f32.mrf.mxu0 }
 0x2c7   :  { %v1019_v26 = vpop.f32.mrf.mxu2  ;;  %v1048_v27 = vpop.f32.mrf.mxu3 }
 0x2c8   :  { %v1020_v29 = vadd.f32 %v1267_v24, %v1019_v26 }
 0x2ca   :  { %v1049_v31 = vadd.f32 %v1048_v27, %v1020_v29 }
 0x2cc   :  { %v1078_v32 = vadd.f32 %v1077_v30, %v1049_v31 }
 0x2ce   :  { %v1089_v34 = vmax.f32 %v1078_v32, 0.0 }
 0x2cf   :  { %v1022_v39 = vpop.f32.mrf.mxu2  ;;  %v1051_v9 = vpop.f32.mrf.mxu3 }
 0x2d0   :  { %v1097_v40 = vmul.f32 %v1268_v33, %v1089_v34  ;;  %v1023_v8 = vadd.f32 %v1267_v24, %v1022_v39 }
 0x2d2   :  { %v1105_v36 = vadd.f32 %v1269_v38, %v1097_v40  ;;  %v1052_v10 = vadd.f32 %v1051_v9, %v1023_v8 }
 0x2d4   :  { %v1081_v42 = vadd.f32 %v1080_v41, %v1052_v10  ;;  %v1109_v11 = vadd.f32 %v1105_v36, %v1727_v22 }
 0x2d6   :  { %v1090_v43 = vmax.f32 %v1081_v42, 0.0  ;;  %v1113_v13 = vmax.f32 %v1109_v11, 0.0 }
 0x2d7   :  { %v1025_v14 = vpop.f32.mrf.mxu2  ;;  %v1054_v47 = vpop.f32.mrf.mxu3 }
 0x2d8   :  { %v1098_v15 = vmul.f32 %v1268_v33, %v1090_v43  ;;  %1153 = vmatmul.f32.vlgmr.msrb.gmra.mxu1 %v1113_v13  ;;  %v1026_v46 = vadd.f32 %v1267_v24, %v1025_v14 }
 0x2da   :  { %v1106_v16 = vadd.f32 %v1269_v38, %v1098_v15  ;;  %v1055_v18 = vadd.f32 %v1054_v47, %v1026_v46 }
 0x2dc   :  { %v1110_v44 = vadd.f32 %v1106_v16, %v1731_v37 }
 0x2de   :  { %v1114_v17 = vmax.f32 %v1110_v44, 0.0 }
 0x2df   :  { %v1028_v45 = vpop.f32.mrf.mxu2  ;;  %v1057_v22 = vpop.f32.mrf.mxu3 }
 0x2e0   :  { %1156 = vmatmul.f32.gmra.mxu1 %v1114_v17  ;;  %v1029_v20 = vadd.f32 %v1267_v24, %v1028_v45 }
 0x2e2   :  { %v1058_v51 = vadd.f32 %v1057_v22, %v1029_v20 }
 0x2e7   :  { %v1083_v19 = vpop.f32.mrf.mxu2 }
 0x2e8   :  { %v1084_v48 = vadd.f32 %v1083_v19, %v1055_v18 }
 0x2ea   :  { %v1091_v21 = vmax.f32 %v1084_v48, 0.0 }
 0x2ec   :  { %v1099_v25 = vmul.f32 %v1268_v33, %v1091_v21 }
 0x2ee   :  { %v1107_v53 = vadd.f32 %v1269_v38, %v1099_v25 }
 0x2ef   :  { %v1086_v54 = vpop.f32.mrf.mxu2 }
 0x2f0   :  { %v1111_v28 = vadd.f32 %v1107_v53, %v1735_v52  ;;  %v1087_v55 = vadd.f32 %v1086_v54, %v1058_v51 }
 0x2f2   :  { %v1092_v50 = vmax.f32 %v1087_v55, 0.0  ;;  %v1115_v37 = vmax.f32 %v1111_v28, 0.0 }
 0x2f4   :  { %v1100_v59 = vmul.f32 %v1268_v33, %v1092_v50  ;;  %1159 = vmatmul.f32.vlgmr.msrb.gmra.mxu3 %v1115_v37 }
 0x2f6   :  { %v1108_v49 = vadd.f32 %v1269_v38, %v1100_v59 }
 0x2f8   :  { %v1112_v60 = vadd.f32 %v1108_v49, %v1738_v57 }
 0x2fa   :  { %v1116_v35 = vmax.f32 %v1112_v60, 0.0 }
 0x2fc   :  { %1162 = vmatmul.f32.gmra.mxu3 %v1116_v35 }
 0x355   :  { %v1154_v62 = vpop.f32.mrf.mxu1 }
 0x356   :  { %v1155_v63 = vadd.f32 %v1270_v61, %v1154_v62 }
 0x358   :  { %1166 = vst [vmem:[#allocation13] sm:$0xff] %v1155_v63 }
 0x35d   :  { %v1157_v12 = vpop.f32.mrf.mxu1 }
 0x35e   :  { %v1158_v58 = vadd.f32 %v1270_v61, %v1157_v12 }
 0x360   :  { %1167 = vst [vmem:[#allocation13 + $0x8] sm:$0xff] %v1158_v58 }
 0x377   :  { %v1160_v52 = vpop.f32.mrf.mxu3 }
 0x378   :  { %v1161_v0 = vadd.f32 %v1270_v61, %v1160_v52 }
 0x37a   :  { %1168 = vst [vmem:[#allocation13 + $0x10] sm:$0xff] %v1161_v0 }
 0x37f   :  { %v1163_v57 = vpop.f32.mrf.mxu3 }
 0x380   :  { %v1164_v1 = vadd.f32 %v1270_v61, %v1163_v57 }
 0x382   :  { %1169 = vst [vmem:[#allocation13 + $0x18] sm:$0xff] %v1164_v1 }
 0x383   :  { %1182 = dma.vmem_to_hbm [thread:$0]  %s1175_s11, 512, %s1177_s19, [#allocation4], %s1450_s30, %s1450_s30, %s1451_s5  }
 0x384   :  { %1447 = dma.done.wait [#allocation4], 512  }
 0x385   :  { %1448 = vsyncadd [#allocation4], 4294966784 }
 0x386   :  { %1187 = vsyncpa [#allocation3], 1 }
 0x387   :  { %1188 = vsyncpa [#allocation6], 1 }
 0x388   :  { %1189 = vsyncpa [#allocation9], 1 }
 0x389   :  { %1190 = vsyncpa [#allocation12], 1 }
 0x38a   :  { %1191 = vsyncpa [#allocation4], 1 }

</bundles_post_ra>
